<compile_context>
chip_gen: v6e
topology: v6e:2x2x1
jax: 0.10.0
libtpu: 0.0.40
codegen_flags: <defaults>
</compile_context>

<pallas_src>
import functools

import jax
import jax.numpy as jnp
from jax import lax
from jax.experimental import pallas as pl
from jax.experimental.pallas import tpu as pltpu

LANES = 128


def _device_kind():
    try:
        return jax.devices()[0].device_kind.lower()
    except Exception:
        return ""


_KIND = _device_kind()
# Dual-TensorCore chips (v7x, megacore v4/v5p) split a "parallel" grid axis
# across cores -> keep >= 2 steps per core there; single-core v5e/v6e should
# not shrink tiles (per-step overhead ~0.35us for nothing).
_TWO_CORE = any(tag in _KIND for tag in ("v7", "7x", "v4", "v5p"))
_MIN_GRID = 4 if _TWO_CORE else 1
# v7x has 64 MiB physical VMEM per core -> leave headroom; v5e/v6e have 128 MiB.
VMEM_LIMIT = (48 if ("v7" in _KIND or "7x" in _KIND) else 96) * 1024 * 1024


# ----------------------------- Pallas kernels -----------------------------

def _packed_linear_kernel(x_ref, add_ref, w_ref, b_ref, o_ref, *, act):
    # y = add + x @ W_blockdiag + b_tiled   (all blocks are lane-dense)
    y = (add_ref[...]
         + jnp.dot(x_ref[...], w_ref[...], preferred_element_type=jnp.float32)
         + b_ref[...])
    if act == "gelu":
        # exact (erf-based) GELU, matching torch.nn.functional.gelu default
        y = 0.5 * y * (1.0 + lax.erf(y * 0.7071067811865476))
    o_ref[...] = y


def _decoder_kernel(xt_ref, w1t_ref, b1_ref, w2_ref, b2_ref, o_ref):
    # xt: (C, tile) lane-dense.  h^T = relu(w1^T @ xt + b1): (128, tile);
    # y = w2_row @ h^T + b2: (1, tile).  Both matmuls are in natural MXU
    # orientation (no transposed contractions) and the store is lane-dense.
    h = jnp.dot(w1t_ref[...], xt_ref[...], preferred_element_type=jnp.float32)
    h = jnp.maximum(h + b1_ref[...], 0.0)
    y = jnp.dot(w2_ref[...], h, preferred_element_type=jnp.float32) + b2_ref[...]
    o_ref[...] = y[None]                      # o_ref block is (1, 1, tile)


# ------------------------------ small helpers ------------------------------

def _choose_tile(n_div, max_tile, *, mult=8, total=None, min_grid=None):
    """Largest `mult`-aligned divisor of n_div that is <= max_tile while the
    launch grid (total // tile) stays >= min_grid (generation-aware)."""
    total = n_div if total is None else total
    min_grid = _MIN_GRID if min_grid is None else min_grid
    best = None
    d = mult
    lim = min(n_div, max_tile)
    while d <= lim:
        if n_div % d == 0 and total // d >= min_grid:
            best = d
        d += mult
    return best if best is not None else n_div


def _pack(x2d, pack):
    n, c = x2d.shape
    assert n % pack == 0, (n, pack)
    return x2d.reshape(n // pack, c * pack)          # contiguous reshape (bitcast)


def _unpack(xp, c):
    n_p, w = xp.shape
    return xp.reshape(n_p * (w // c), c)


def _compiler_params():
    return pltpu.CompilerParams(dimension_semantics=("parallel",),
                                vmem_limit_bytes=VMEM_LIMIT)


# ----------------------------- kernel wrappers -----------------------------

def packed_linear(xp, addp, w_bd, b_t, *, act, alias_add=False, max_tile=1024):
    n, cin = xp.shape
    add_n, cout = addp.shape
    assert n % add_n == 0 and cout == w_bd.shape[1]
    if alias_add:
        assert add_n == n
    tile = _choose_tile(add_n, max_tile, total=n)
    grid = n // tile
    add_steps = add_n // tile
    if add_steps == grid:
        add_map = lambda i: (i, 0)
    else:
        # add stream is shared across the batch -> revisit its blocks
        add_map = lambda i: (i % add_steps, 0)
    cost = pl.CostEstimate(
        flops=2 * n * cin * cout + 2 * n * cout,
        transcendentals=n * cout if act == "gelu" else 0,
        bytes_accessed=4 * (n * cin + n * cout + add_n * cout + cin * cout + cout))
    kern = functools.partial(_packed_linear_kernel, act=act)
    return pl.pallas_call(
        kern,
        out_shape=jax.ShapeDtypeStruct((n, cout), jnp.float32),
        grid=(grid,),
        in_specs=[
            pl.BlockSpec((tile, cin), lambda i: (i, 0)),
            pl.BlockSpec((tile, cout), add_map),
            pl.BlockSpec((cin, cout), lambda i: (0, 0)),
            pl.BlockSpec((1, cout), lambda i: (0, 0)),
        ],
        out_specs=pl.BlockSpec((tile, cout), lambda i: (i, 0)),
        compiler_params=_compiler_params(),
        cost_estimate=cost,
        input_output_aliases={1: 0} if alias_add else {},
    )(xp, addp, w_bd, b_t)


def decoder_pallas(xt, w1t, b1_col, w2_row, b2, *, max_tile=2048):
    cin, n = xt.shape
    hid = w1t.shape[0]
    assert n % LANES == 0, n
    tile = _choose_tile(n, max_tile, mult=LANES)
    grid = n // tile
    cost = pl.CostEstimate(
        flops=2 * n * cin * hid + 4 * n * hid,
        transcendentals=0,
        bytes_accessed=4 * (cin * n + n + hid * cin + hid + hid + 1))
    out = pl.pallas_call(
        _decoder_kernel,
        out_shape=jax.ShapeDtypeStruct((grid, 1, tile), jnp.float32),
        grid=(grid,),
        in_specs=[
            pl.BlockSpec((cin, tile), lambda i: (0, i)),
            pl.BlockSpec((hid, cin), lambda i: (0, 0)),
            pl.BlockSpec((hid, 1), lambda i: (0, 0)),
            pl.BlockSpec((1, hid), lambda i: (0, 0)),
            pl.BlockSpec((1, 1), lambda i: (0, 0)),
        ],
        out_specs=pl.BlockSpec((1, 1, tile), lambda i: (i, 0, 0)),
        compiler_params=_compiler_params(),
        cost_estimate=cost,
    )(xt, w1t, b1_col, w2_row, b2)
    return out.reshape(n)


# --------------------------- FNO spectral branch ---------------------------

def spectral_conv3d(x, layer, modes):
    # x: [B, X, Y, Tp, C] f32
    m1, m2, m3 = modes
    B, Xs, Ys, Tp, C = x.shape
    kz = Tp // 2 + 1
    xf = jnp.fft.rfftn(x, axes=(1, 2, 3))                 # [B, X, Y, kz, C]

    def cmul(a, w):
        return jnp.einsum("bxyzi,xyzio->bxyzo", a, w)

    if layer["sw_full"] is not None:
        # Corners tile the whole (X, Y, :m3) band: single einsum, no zero-fill
        # buffer, no scatter writes.
        band = cmul(xf[:, :, :, :m3, :], layer["sw_full"])
        out = band if m3 == kz else jnp.pad(
            band, ((0, 0), (0, 0), (0, 0), (0, kz - m3), (0, 0)))
    else:
        sw = layer["sw_quads"]                            # [4, m1, m2, m3, C, C]
        out = jnp.zeros((B, Xs, Ys, kz, C), dtype=jnp.complex64)
        out = out.at[:, :m1, :m2, :m3, :].set(cmul(xf[:, :m1, :m2, :m3, :], sw[0]))
        out = out.at[:, -m1:, :m2, :m3, :].set(cmul(xf[:, -m1:, :m2, :m3, :], sw[1]))
        out = out.at[:, :m1, -m2:, :m3, :].set(cmul(xf[:, :m1, -m2:, :m3, :], sw[2]))
        out = out.at[:, -m1:, -m2:, :m3, :].set(cmul(xf[:, -m1:, -m2:, :m3, :], sw[3]))
    return jnp.fft.irfftn(out, s=(Xs, Ys, Tp), axes=(1, 2, 3)).astype(jnp.float32)


# ------------------------------- full forward ------------------------------

def rsnet_2d_forward(params, U0, W, Feature_Xi, *, padding, modes):
    del U0, W  # TODO(synk): consumed by the undefined ParabolicIntegrate_2d
    B, T, Xs, Ys, _ = Feature_Xi.shape
    width = params["fc0_w_grid"].shape[1]
    pack = LANES // width

    xi = Feature_Xi[..., 1:]                              # [B, T, X, Y, F]
    F_ = xi.shape[-1]

    # fc0: fold the grid channels into a precomputed additive term.  The
    # PyTorch get_grid is applied to the [B,T,X,Y,F] tensor, so its
    # "gridx/gridy/gridz" vary along T, X, Y respectively -- exactly the order
    # of fc0_w_grid rows here.
    gt = jnp.linspace(0.0, 1.0, T, dtype=jnp.float32)
    gx = jnp.linspace(0.0, 1.0, Xs, dtype=jnp.float32)
    gy = jnp.linspace(0.0, 1.0, Ys, dtype=jnp.float32)
    wg = params["fc0_w_grid"]                             # [3, width]
    grid_add = (gt[:, None, None, None] * wg[0]
                + gx[None, :, None, None] * wg[1]
                + gy[None, None, :, None] * wg[2])        # [T, X, Y, width]

    x_pk = _pack(xi.reshape(-1, F_), pack)                # [B*T*X*Y/16, F*16]
    a_pk = _pack(grid_add.reshape(-1, width), pack)       # [T*X*Y/16, 128] (no B broadcast)
    r_pk = packed_linear(x_pk, a_pk, params["fc0_w_bd"], params["fc0_b_t"],
                         act=None)
    r = _unpack(r_pk, width).reshape(B, T, Xs, Ys, width)

    # channel-last FNO layout [B, X, Y, Tp, C] (single small transpose)
    r = jnp.transpose(r, (0, 2, 3, 1, 4))                 # [B, X, Y, T, C]
    r = jnp.pad(r, ((0, 0), (0, 0), (0, 0), (0, padding), (0, 0)))
    Tp = T + padding

    n_layers = len(params["fno"])
    xp = _pack(r.reshape(-1, width), pack)                # packed activations
    for li, lp in enumerate(params["fno"]):
        last = li == n_layers - 1
        spec = spectral_conv3d(r, lp, modes)              # XLA FFT branch
        sp = _pack(spec.reshape(-1, width), pack)
        xp = packed_linear(xp, sp, lp["w_bd"], lp["b_t"],
                           act=None if last else "gelu", alias_add=True)
        r = _unpack(xp, width).reshape(B, Xs, Ys, Tp, width)

    # Un-pad T and present the decoder a channel-major (width, N) slab so its
    # input loads are lane-dense; the un-pad slice fuses into this tiny
    # transpose (N*width = a few hundred KB at most here).
    r = r[:, :, :, :T, :]                                 # [B, X, Y, T, C]
    xt = jnp.transpose(r, (4, 0, 1, 2, 3)).reshape(width, -1)
    out = decoder_pallas(xt, params["dec_w1t"], params["dec_b1"],
                         params["dec_w2_row"], params["dec_b2"])
    out = out.reshape(B, Xs, Ys, T)
    return jnp.transpose(out, (0, 3, 1, 2))               # [B, T, X, Y]


# ------------------------------- param init --------------------------------

def _uniform(key, shape, bound):
    return jax.random.uniform(key, shape, jnp.float32, -bound, bound)


def init_params(key, F_, width, L, modes_req, padding, X, Y, T):
    assert LANES % width == 0, "lane packing requires 128 % width == 0"
    pack = LANES // width
    Tp = T + padding
    m1 = min(modes_req[0], X // 2)
    m2 = min(modes_req[1], Y // 2)
    m3 = min(modes_req[2], Tp // 2 + 1)
    full_band = (2 * m1 == X) and (2 * m2 == Y)

    keys = jax.random.split(key, 6 + 3 * L)
    ki = iter(keys)
    p = {}
    eye = jnp.eye(pack, dtype=jnp.float32)

    b0 = (F_ + 3) ** -0.5
    fc0_w = _uniform(next(ki), (F_ + 3, width), b0)
    fc0_b = _uniform(next(ki), (width,), b0)
    p["fc0_w_bd"] = jnp.kron(eye, fc0_w[:F_])             # [F*pack, 128]
    p["fc0_w_grid"] = fc0_w[F_:]                          # [3, width]
    p["fc0_b_t"] = jnp.tile(fc0_b, pack).reshape(1, -1)   # [1, 128]

    # decoder: Linear(width,128) -> ReLU -> Linear(128,1), pre-transposed for
    # natural MXU orientation in the Pallas decoder kernel.
    b1 = width ** -0.5
    dec_w1 = _uniform(next(ki), (width, 128), b1)
    dec_b1 = _uniform(next(ki), (128,), b1)
    p["dec_w1t"] = dec_w1.T                               # [128, width]
    p["dec_b1"] = dec_b1.reshape(128, 1)                  # column
    b2 = 128 ** -0.5
    dec_w2 = _uniform(next(ki), (128, 1), b2)
    dec_b2 = _uniform(next(ki), (1,), b2)
    p["dec_w2_row"] = dec_w2.reshape(1, 128)
    p["dec_b2"] = dec_b2.reshape(1, 1)

    scale = 1.0 / (width * width)
    fno = []
    for _ in range(L):
        kw, kr, kc = next(ki), next(ki), next(ki)
        sw = scale * (jax.random.uniform(kr, (4, width, width, m1, m2, m3))
                      + 1j * jax.random.uniform(kc, (4, width, width, m1, m2, m3)))
        sw = jnp.transpose(sw, (0, 3, 4, 5, 1, 2)).astype(jnp.complex64)
        w = _uniform(kw, (width, width), width ** -0.5)
        layer = {"w_bd": jnp.kron(eye, w),                # [128, 128]
                 "b_t": jnp.zeros((1, width * pack), jnp.float32)}
        if full_band:
            # quadrants tile the whole (X, Y, :m3) band -> one dense weight
            left = jnp.concatenate([sw[0], sw[1]], axis=0)    # x: [0,m1) ++ [X-m1,X)
            right = jnp.concatenate([sw[2], sw[3]], axis=0)
            layer["sw_full"] = jnp.concatenate([left, right], axis=1)  # [X,Y,m3,i,o]
            layer["sw_quads"] = None
        else:
            layer["sw_full"] = None
            layer["sw_quads"] = sw
        fno.append(layer)
    p["fno"] = fno
    return p, (m1, m2, m3)


# ----------------------------------- main -----------------------------------

if __name__ == "__main__":
    B, T, X, Y = 2, 8, 16, 16
    F_graph = 4            # self.F = len(graph) - 1  (graph with 5 keys)
    width, L, padding = 8, 4, 6

    key = jax.random.PRNGKey(0)
    k1, k2, k3, kp = jax.random.split(key, 4)
    U0 = jax.random.normal(k1, (B, X, Y), dtype=jnp.float32)
    W = jax.random.normal(k2, (B, T, X, Y), dtype=jnp.float32)
    Feature_Xi = jax.random.normal(k3, (B, T, X, Y, F_graph + 1), dtype=jnp.float32)

    params, modes = init_params(kp, F_=F_graph, width=width, L=L,
                                modes_req=(16, 16, 10), padding=padding,
                                X=X, Y=Y, T=T)

    fwd = jax.jit(functools.partial(rsnet_2d_forward, padding=padding, modes=modes))
    out = jax.block_until_ready(fwd(params, U0, W, Feature_Xi))

    assert out.shape == (B, T, X, Y), out.shape
    assert bool(jnp.all(jnp.isfinite(out)))
    print("KERNEL_OK")
</pallas_src>

<mosaic_0001>
module attributes {stable_mosaic.version = 11 : i64} {
  func.func @_packed_linear_kernel(%arg0: i32, %arg1: memref<128x64xf32, #tpu.memory_space<vmem>>, %arg2: memref<128x128xf32, #tpu.memory_space<vmem>>, %arg3: memref<64x128xf32, #tpu.memory_space<vmem>>, %arg4: memref<1x128xf32, #tpu.memory_space<vmem>>, %arg5: memref<128x128xf32, #tpu.memory_space<vmem>>) attributes {dimension_semantics = [#tpu.dimension_semantics<parallel>], iteration_bounds = array<i64: 2>, scalar_prefetch = 0 : i64, scratch_operands = 0 : i64, tpu.core_type = #tpu.core_type<tc>, window_params = [{transform_indices = @transform_0, window_bounds = array<i64: 128, 64>}, {transform_indices = @transform_1, window_bounds = array<i64: 128, 128>}, {pipeline_mode = #tpu.pipeline_mode<synchronous>, transform_indices = @transform_2, window_bounds = array<i64: 64, 128>}, {pipeline_mode = #tpu.pipeline_mode<synchronous>, transform_indices = @transform_3, window_bounds = array<i64: 1, 128>}, {transform_indices = @transform_4, window_bounds = array<i64: 128, 128>}]} {
    %c0 = arith.constant 0 : index
    %c0_0 = arith.constant 0 : index
    %0 = vector.load %arg2[%c0, %c0_0] : memref<128x128xf32, #tpu.memory_space<vmem>>, vector<128x128xf32>
    %c0_1 = arith.constant 0 : index
    %c0_2 = arith.constant 0 : index
    %1 = vector.load %arg1[%c0_1, %c0_2] : memref<128x64xf32, #tpu.memory_space<vmem>>, vector<128x64xf32>
    %c0_3 = arith.constant 0 : index
    %c0_4 = arith.constant 0 : index
    %2 = vector.load %arg3[%c0_3, %c0_4] : memref<64x128xf32, #tpu.memory_space<vmem>>, vector<64x128xf32>
    %cst = arith.constant dense<0.000000e+00> : vector<128x128xf32>
    %3 = tpu.matmul %1, %2, %cst {dimension_numbers = #tpu.dot_dimension_numbers<[1], [0], [0], [1], [0, 0, 1, 1], [], []>} : vector<128x64xf32>, vector<64x128xf32>, vector<128x128xf32> -> vector<128x128xf32>
    %4 = arith.addf %0, %3 : vector<128x128xf32>
    %c0_5 = arith.constant 0 : index
    %c0_6 = arith.constant 0 : index
    %5 = vector.load %arg4[%c0_5, %c0_6] : memref<1x128xf32, #tpu.memory_space<vmem>>, vector<1x128xf32>
    %6 = vector.broadcast %5 : vector<1x128xf32> to vector<128x128xf32>
    %7 = arith.addf %4, %6 : vector<128x128xf32>
    %c0_7 = arith.constant 0 : index
    %c0_8 = arith.constant 0 : index
    %8 = vector.load %arg5[%c0_7, %c0_8] : memref<128x128xf32, #tpu.memory_space<vmem>>, vector<128x128xf32>
    tpu.vector_store %arg5[%c0_7, %c0_8], %7 {strides = array<i32>} : memref<128x128xf32, #tpu.memory_space<vmem>>, vector<128x128xf32>,
    return
  }
  func.func @transform_0(%arg0: i32) -> (i32, i32) {
    %c0_i32 = arith.constant 0 : i32
    %c0_i32_0 = arith.constant 0 : i32
    return %arg0, %c0_i32 : i32, i32
  }
  func.func @transform_1(%arg0: i32) -> (i32, i32) {
    %c1_i32 = arith.constant 1 : i32
    %c0_i32 = arith.constant 0 : i32
    %0 = arith.cmpi eq, %c1_i32, %c0_i32 : i32
    %c1_i32_0 = arith.constant 1 : i32
    %1 = arith.select %0, %c1_i32_0, %c1_i32 : i32
    %2 = arith.remsi %arg0, %1 : i32
    %c0_i32_1 = arith.constant 0 : i32
    %3 = arith.cmpi ne, %2, %c0_i32_1 : i32
    %c0_i32_2 = arith.constant 0 : i32
    %4 = arith.cmpi slt, %2, %c0_i32_2 : i32
    %c0_i32_3 = arith.constant 0 : i32
    %5 = arith.cmpi slt, %1, %c0_i32_3 : i32
    %6 = arith.xori %4, %5 : i1
    %7 = arith.andi %6, %3 : i1
    %8 = arith.addi %2, %1 : i32
    %9 = arith.select %7, %8, %2 : i32
    %c0_i32_4 = arith.constant 0 : i32
    %c0_i32_5 = arith.constant 0 : i32
    return %9, %c0_i32_4 : i32, i32
  }
  func.func @transform_2(%arg0: i32) -> (i32, i32) {
    %c0_i32 = arith.constant 0 : i32
    %c0_i32_0 = arith.constant 0 : i32
    %c0_i32_1 = arith.constant 0 : i32
    return %c0_i32, %c0_i32_0 : i32, i32
  }
  func.func @transform_3(%arg0: i32) -> (i32, i32) {
    %c0_i32 = arith.constant 0 : i32
    %c0_i32_0 = arith.constant 0 : i32
    %c0_i32_1 = arith.constant 0 : i32
    return %c0_i32, %c0_i32_0 : i32, i32
  }
  func.func @transform_4(%arg0: i32) -> (i32, i32) {
    %c0_i32 = arith.constant 0 : i32
    %c0_i32_0 = arith.constant 0 : i32
    return %arg0, %c0_i32 : i32, i32
  }
}

module attributes {stable_mosaic.version = 11 : i64} {
  func.func @_packed_linear_kernel(%arg0: i32, %arg1: memref<448x128xf32, #tpu.memory_space<vmem>>, %arg2: memref<448x128xf32, #tpu.memory_space<vmem>>, %arg3: memref<128x128xf32, #tpu.memory_space<vmem>>, %arg4: memref<1x128xf32, #tpu.memory_space<vmem>>, %arg5: memref<448x128xf32, #tpu.memory_space<vmem>>) attributes {dimension_semantics = [#tpu.dimension_semantics<parallel>], iteration_bounds = array<i64: 1>, scalar_prefetch = 0 : i64, scratch_operands = 0 : i64, tpu.core_type = #tpu.core_type<tc>, window_params = [{transform_indices = @transform_0, window_bounds = array<i64: 448, 128>}, {transform_indices = @transform_1, window_bounds = array<i64: 448, 128>}, {pipeline_mode = #tpu.pipeline_mode<synchronous>, transform_indices = @transform_2, window_bounds = array<i64: 128, 128>}, {pipeline_mode = #tpu.pipeline_mode<synchronous>, transform_indices = @transform_3, window_bounds = array<i64: 1, 128>}, {transform_indices = @transform_4, window_bounds = array<i64: 448, 128>}]} {
    %c0 = arith.constant 0 : index
    %c0_0 = arith.constant 0 : index
    %0 = vector.load %arg2[%c0, %c0_0] : memref<448x128xf32, #tpu.memory_space<vmem>>, vector<448x128xf32>
    %c0_1 = arith.constant 0 : index
    %c0_2 = arith.constant 0 : index
    %1 = vector.load %arg1[%c0_1, %c0_2] : memref<448x128xf32, #tpu.memory_space<vmem>>, vector<448x128xf32>
    %c0_3 = arith.constant 0 : index
    %c0_4 = arith.constant 0 : index
    %2 = vector.load %arg3[%c0_3, %c0_4] : memref<128x128xf32, #tpu.memory_space<vmem>>, vector<128x128xf32>
    %cst = arith.constant dense<0.000000e+00> : vector<448x128xf32>
    %3 = tpu.matmul %1, %2, %cst {dimension_numbers = #tpu.dot_dimension_numbers<[1], [0], [0], [1], [0, 0, 1, 1], [], []>} : vector<448x128xf32>, vector<128x128xf32>, vector<448x128xf32> -> vector<448x128xf32>
    %4 = arith.addf %0, %3 : vector<448x128xf32>
    %c0_5 = arith.constant 0 : index
    %c0_6 = arith.constant 0 : index
    %5 = vector.load %arg4[%c0_5, %c0_6] : memref<1x128xf32, #tpu.memory_space<vmem>>, vector<1x128xf32>
    %6 = vector.broadcast %5 : vector<1x128xf32> to vector<448x128xf32>
    %7 = arith.addf %4, %6 : vector<448x128xf32>
    %cst_7 = arith.constant 5.000000e-01 : f32
    %8 = vector.broadcast %cst_7 : f32 to vector<448x128xf32>
    %9 = arith.mulf %8, %7 : vector<448x128xf32>
    %cst_8 = arith.constant 0.707106769 : f32
    %10 = vector.broadcast %cst_8 : f32 to vector<448x128xf32>
    %11 = arith.mulf %7, %10 : vector<448x128xf32>
    %12 = math.erf %11 : vector<448x128xf32>
    %cst_9 = arith.constant 1.000000e+00 : f32
    %13 = vector.broadcast %cst_9 : f32 to vector<448x128xf32>
    %14 = arith.addf %13, %12 : vector<448x128xf32>
    %15 = arith.mulf %9, %14 : vector<448x128xf32>
    %c0_10 = arith.constant 0 : index
    %c0_11 = arith.constant 0 : index
    %16 = vector.load %arg5[%c0_10, %c0_11] : memref<448x128xf32, #tpu.memory_space<vmem>>, vector<448x128xf32>
    tpu.vector_store %arg5[%c0_10, %c0_11], %15 {strides = array<i32>} : memref<448x128xf32, #tpu.memory_space<vmem>>, vector<448x128xf32>,
    return
  }
  func.func @transform_0(%arg0: i32) -> (i32, i32) {
    %c0_i32 = arith.constant 0 : i32
    %c0_i32_0 = arith.constant 0 : i32
    return %arg0, %c0_i32 : i32, i32
  }
  func.func @transform_1(%arg0: i32) -> (i32, i32) {
    %c0_i32 = arith.constant 0 : i32
    %c0_i32_0 = arith.constant 0 : i32
    return %arg0, %c0_i32 : i32, i32
  }
  func.func @transform_2(%arg0: i32) -> (i32, i32) {
    %c0_i32 = arith.constant 0 : i32
    %c0_i32_0 = arith.constant 0 : i32
    %c0_i32_1 = arith.constant 0 : i32
    return %c0_i32, %c0_i32_0 : i32, i32
  }
  func.func @transform_3(%arg0: i32) -> (i32, i32) {
    %c0_i32 = arith.constant 0 : i32
    %c0_i32_0 = arith.constant 0 : i32
    %c0_i32_1 = arith.constant 0 : i32
    return %c0_i32, %c0_i32_0 : i32, i32
  }
  func.func @transform_4(%arg0: i32) -> (i32, i32) {
    %c0_i32 = arith.constant 0 : i32
    %c0_i32_0 = arith.constant 0 : i32
    return %arg0, %c0_i32 : i32, i32
  }
}

module attributes {stable_mosaic.version = 11 : i64} {
  func.func @_packed_linear_kernel(%arg0: i32, %arg1: memref<448x128xf32, #tpu.memory_space<vmem>>, %arg2: memref<448x128xf32, #tpu.memory_space<vmem>>, %arg3: memref<128x128xf32, #tpu.memory_space<vmem>>, %arg4: memref<1x128xf32, #tpu.memory_space<vmem>>, %arg5: memref<448x128xf32, #tpu.memory_space<vmem>>) attributes {dimension_semantics = [#tpu.dimension_semantics<parallel>], iteration_bounds = array<i64: 1>, scalar_prefetch = 0 : i64, scratch_operands = 0 : i64, tpu.core_type = #tpu.core_type<tc>, window_params = [{transform_indices = @transform_0, window_bounds = array<i64: 448, 128>}, {transform_indices = @transform_1, window_bounds = array<i64: 448, 128>}, {pipeline_mode = #tpu.pipeline_mode<synchronous>, transform_indices = @transform_2, window_bounds = array<i64: 128, 128>}, {pipeline_mode = #tpu.pipeline_mode<synchronous>, transform_indices = @transform_3, window_bounds = array<i64: 1, 128>}, {transform_indices = @transform_4, window_bounds = array<i64: 448, 128>}]} {
    %c0 = arith.constant 0 : index
    %c0_0 = arith.constant 0 : index
    %0 = vector.load %arg2[%c0, %c0_0] : memref<448x128xf32, #tpu.memory_space<vmem>>, vector<448x128xf32>
    %c0_1 = arith.constant 0 : index
    %c0_2 = arith.constant 0 : index
    %1 = vector.load %arg1[%c0_1, %c0_2] : memref<448x128xf32, #tpu.memory_space<vmem>>, vector<448x128xf32>
    %c0_3 = arith.constant 0 : index
    %c0_4 = arith.constant 0 : index
    %2 = vector.load %arg3[%c0_3, %c0_4] : memref<128x128xf32, #tpu.memory_space<vmem>>, vector<128x128xf32>
    %cst = arith.constant dense<0.000000e+00> : vector<448x128xf32>
    %3 = tpu.matmul %1, %2, %cst {dimension_numbers = #tpu.dot_dimension_numbers<[1], [0], [0], [1], [0, 0, 1, 1], [], []>} : vector<448x128xf32>, vector<128x128xf32>, vector<448x128xf32> -> vector<448x128xf32>
    %4 = arith.addf %0, %3 : vector<448x128xf32>
    %c0_5 = arith.constant 0 : index
    %c0_6 = arith.constant 0 : index
    %5 = vector.load %arg4[%c0_5, %c0_6] : memref<1x128xf32, #tpu.memory_space<vmem>>, vector<1x128xf32>
    %6 = vector.broadcast %5 : vector<1x128xf32> to vector<448x128xf32>
    %7 = arith.addf %4, %6 : vector<448x128xf32>
    %c0_7 = arith.constant 0 : index
    %c0_8 = arith.constant 0 : index
    %8 = vector.load %arg5[%c0_7, %c0_8] : memref<448x128xf32, #tpu.memory_space<vmem>>, vector<448x128xf32>
    tpu.vector_store %arg5[%c0_7, %c0_8], %7 {strides = array<i32>} : memref<448x128xf32, #tpu.memory_space<vmem>>, vector<448x128xf32>,
    return
  }
  func.func @transform_0(%arg0: i32) -> (i32, i32) {
    %c0_i32 = arith.constant 0 : i32
    %c0_i32_0 = arith.constant 0 : i32
    return %arg0, %c0_i32 : i32, i32
  }
  func.func @transform_1(%arg0: i32) -> (i32, i32) {
    %c0_i32 = arith.constant 0 : i32
    %c0_i32_0 = arith.constant 0 : i32
    return %arg0, %c0_i32 : i32, i32
  }
  func.func @transform_2(%arg0: i32) -> (i32, i32) {
    %c0_i32 = arith.constant 0 : i32
    %c0_i32_0 = arith.constant 0 : i32
    %c0_i32_1 = arith.constant 0 : i32
    return %c0_i32, %c0_i32_0 : i32, i32
  }
  func.func @transform_3(%arg0: i32) -> (i32, i32) {
    %c0_i32 = arith.constant 0 : i32
    %c0_i32_0 = arith.constant 0 : i32
    %c0_i32_1 = arith.constant 0 : i32
    return %c0_i32, %c0_i32_0 : i32, i32
  }
  func.func @transform_4(%arg0: i32) -> (i32, i32) {
    %c0_i32 = arith.constant 0 : i32
    %c0_i32_0 = arith.constant 0 : i32
    return %arg0, %c0_i32 : i32, i32
  }
}

module attributes {stable_mosaic.version = 11 : i64} {
  func.func @_decoder_kernel(%arg0: i32, %arg1: memref<8x2048xf32, #tpu.memory_space<vmem>>, %arg2: memref<128x8xf32, #tpu.memory_space<vmem>>, %arg3: memref<128x1xf32, #tpu.memory_space<vmem>>, %arg4: memref<1x128xf32, #tpu.memory_space<vmem>>, %arg5: memref<1x1xf32, #tpu.memory_space<vmem>>, %arg6: memref<1x1x2048xf32, #tpu.memory_space<vmem>>) attributes {dimension_semantics = [#tpu.dimension_semantics<parallel>], iteration_bounds = array<i64: 2>, scalar_prefetch = 0 : i64, scratch_operands = 0 : i64, tpu.core_type = #tpu.core_type<tc>, window_params = [{transform_indices = @transform_0, window_bounds = array<i64: 8, 2048>}, {pipeline_mode = #tpu.pipeline_mode<synchronous>, transform_indices = @transform_1, window_bounds = array<i64: 128, 8>}, {pipeline_mode = #tpu.pipeline_mode<synchronous>, transform_indices = @transform_2, window_bounds = array<i64: 128, 1>}, {pipeline_mode = #tpu.pipeline_mode<synchronous>, transform_indices = @transform_3, window_bounds = array<i64: 1, 128>}, {pipeline_mode = #tpu.pipeline_mode<synchronous>, transform_indices = @transform_4, window_bounds = array<i64: 1, 1>}, {transform_indices = @transform_5, window_bounds = array<i64: 1, 1, 2048>}]} {
    %c0 = arith.constant 0 : index
    %c0_0 = arith.constant 0 : index
    %0 = vector.load %arg2[%c0, %c0_0] : memref<128x8xf32, #tpu.memory_space<vmem>>, vector<128x8xf32>
    %c0_1 = arith.constant 0 : index
    %c0_2 = arith.constant 0 : index
    %1 = vector.load %arg1[%c0_1, %c0_2] : memref<8x2048xf32, #tpu.memory_space<vmem>>, vector<8x2048xf32>
    %cst = arith.constant dense<0.000000e+00> : vector<128x2048xf32>
    %2 = tpu.matmul %0, %1, %cst {dimension_numbers = #tpu.dot_dimension_numbers<[1], [0], [0], [1], [0, 0, 1, 1], [], []>} : vector<128x8xf32>, vector<8x2048xf32>, vector<128x2048xf32> -> vector<128x2048xf32>
    %c0_3 = arith.constant 0 : index
    %c0_4 = arith.constant 0 : index
    %3 = vector.load %arg3[%c0_3, %c0_4] : memref<128x1xf32, #tpu.memory_space<vmem>>, vector<128x1xf32>
    %4 = vector.broadcast %3 : vector<128x1xf32> to vector<128x2048xf32>
    %5 = arith.addf %2, %4 : vector<128x2048xf32>
    %cst_5 = arith.constant 0.000000e+00 : f32
    %6 = vector.broadcast %cst_5 : f32 to vector<128x2048xf32>
    %7 = arith.maximumf %5, %6 : vector<128x2048xf32>
    %c0_6 = arith.constant 0 : index
    %c0_7 = arith.constant 0 : index
    %8 = vector.load %arg4[%c0_6, %c0_7] : memref<1x128xf32, #tpu.memory_space<vmem>>, vector<1x128xf32>
    %cst_8 = arith.constant dense<0.000000e+00> : vector<1x2048xf32>
    %9 = tpu.matmul %8, %7, %cst_8 {dimension_numbers = #tpu.dot_dimension_numbers<[1], [0], [0], [1], [0, 0, 1, 1], [], []>} : vector<1x128xf32>, vector<128x2048xf32>, vector<1x2048xf32> -> vector<1x2048xf32>
    %c0_9 = arith.constant 0 : index
    %c0_10 = arith.constant 0 : index
    %10 = vector.load %arg5[%c0_9, %c0_10] : memref<1x1xf32, #tpu.memory_space<vmem>>, vector<1x1xf32>
    %11 = vector.broadcast %10 : vector<1x1xf32> to vector<1x2048xf32>
    %12 = arith.addf %9, %11 : vector<1x2048xf32>
    %13 = vector.shape_cast %12 : vector<1x2048xf32> to vector<1x1x2048xf32>
    %c0_11 = arith.constant 0 : index
    %c0_12 = arith.constant 0 : index
    %c0_13 = arith.constant 0 : index
    %14 = vector.load %arg6[%c0_11, %c0_12, %c0_13] : memref<1x1x2048xf32, #tpu.memory_space<vmem>>, vector<1x1x2048xf32>
    tpu.vector_store %arg6[%c0_11, %c0_12, %c0_13], %13 {strides = array<i32>} : memref<1x1x2048xf32, #tpu.memory_space<vmem>>, vector<1x1x2048xf32>,
    return
  }
  func.func @transform_0(%arg0: i32) -> (i32, i32) {
    %c0_i32 = arith.constant 0 : i32
    %c0_i32_0 = arith.constant 0 : i32
    return %c0_i32, %arg0 : i32, i32
  }
  func.func @transform_1(%arg0: i32) -> (i32, i32) {
    %c0_i32 = arith.constant 0 : i32
    %c0_i32_0 = arith.constant 0 : i32
    %c0_i32_1 = arith.constant 0 : i32
    return %c0_i32, %c0_i32_0 : i32, i32
  }
  func.func @transform_2(%arg0: i32) -> (i32, i32) {
    %c0_i32 = arith.constant 0 : i32
    %c0_i32_0 = arith.constant 0 : i32
    %c0_i32_1 = arith.constant 0 : i32
    return %c0_i32, %c0_i32_0 : i32, i32
  }
  func.func @transform_3(%arg0: i32) -> (i32, i32) {
    %c0_i32 = arith.constant 0 : i32
    %c0_i32_0 = arith.constant 0 : i32
    %c0_i32_1 = arith.constant 0 : i32
    return %c0_i32, %c0_i32_0 : i32, i32
  }
  func.func @transform_4(%arg0: i32) -> (i32, i32) {
    %c0_i32 = arith.constant 0 : i32
    %c0_i32_0 = arith.constant 0 : i32
    %c0_i32_1 = arith.constant 0 : i32
    return %c0_i32, %c0_i32_0 : i32, i32
  }
  func.func @transform_5(%arg0: i32) -> (i32, i32, i32) {
    %c0_i32 = arith.constant 0 : i32
    %c0_i32_0 = arith.constant 0 : i32
    %c0_i32_1 = arith.constant 0 : i32
    return %arg0, %c0_i32, %c0_i32_0 : i32, i32, i32
  }
}

</mosaic_0001>

<bundles_post_ra>
// kernel: mul.22
= control target key start
LH: loop header
LB: loop body
LE: loop exit
PB: predicated region body
PF: predicated region fallthrough
CT: control target
= control target key end

     0   :  { %s34_s0 = inlined_call_operand.vmem [shape: f32[128], index: 0, kind: input, shape index: {}]   ;;  %s35_s1 = inlined_call_operand.vmem [shape: f32[128], index: 1, kind: input, shape index: {}]   ;;  %s36_s2 = inlined_call_operand.vmem [shape: f32[128], index: 2, kind: output, shape index: {}]  }
   0x1   :  { %v3_v0 = vld [vmem:[%s34_s0] sm:$0x1] }
   0x2   :  { %v4_v1 = vld [vmem:[%s35_s1] sm:$0x1] }
   0x3   :  { %v7_v2 = vmul.f32 %v4_v1, %v3_v0 }
   0x5   :  { %9 = vst [vmem:[%s36_s2] sm:$0x1] %v7_v2 }

// kernel: rsnet_2d_forward.6
= control target key start
LH: loop header
LB: loop body
LE: loop exit
PB: predicated region body
PF: predicated region fallthrough
CT: control target
= control target key end

     0   :  { %s695_s15 = smov 0   ;;  %s864_s0 = inlined_call_operand.vmem [shape: f32[256,64], index: 0, kind: input, shape index: {}]   ;;  %s865_s1 = inlined_call_operand.vmem [shape: f32[128,128], index: 1, kind: input, shape index: {}]   ;;  %s866_s2 = inlined_call_operand.vmem [shape: f32[64,128], index: 2, kind: input, shape index: {}]   ;;  %s867_s3 = inlined_call_operand.vmem [shape: f32[1,128], index: 3, kind: input, shape index: {}]   ;;  %s868_s4 = inlined_call_operand.vmem [shape: f32[256,128], index: 4, kind: output, shape index: {}]  }
   0x1 LB: > { %s546_s16 = sadd.s32 4294967295, %s668_s15   ;;  %p550_p0 = scmp.ge.s32.totalorder %s668_s15, 1  ;;  %s668_s15 = sphi %s695_s15, %s14_s15  }
   0x2   : > { %p163_p1 = scmp.lt.s32.totalorder %s668_s15, 3 }
   0x4   : > { %p164_p2 = pnand %p550_p0, %p163_p1 }
   0x5   : > { %s551_s21 = sshll.u32 (!%p164_p2), %s546_s16, 4 }
   0x6   : > { %167 = sbr.rel (%p164_p2) target bundleno = 241 (0xf1), region = 36  ;;  %p190_p3 = scmp.lt.s32.totalorder (!%p164_p2), %s551_s21, 31 }
   0xb   : > { %v240_v0 = vld [vmem:[%s866_s2 + $0x38] sm:$0xff]  ;;  %v239_v1 = vld [vmem:[%s866_s2 + $0x30] sm:$0xff]  ;;  %v238_v2 = vld [vmem:[%s866_s2 + $0x28] sm:$0xff]  ;;  %s870_s21 = smov (!%p190_p3, %s551_s21), 31  ;;  %vm241_vm0 = vcmask 523264  }
   0xc   : > { %598 = vmatprep.subr.mxu0 %v240_v0  ;;  %638 = vmatprep.subr.mxu1 %v240_v0  ;;  %v237_v3 = vld [vmem:[%s866_s2 + $0x20] sm:$0xff]  ;;  %v236_v4 = vld [vmem:[%s866_s2 + $0x18] sm:$0xff]  ;;  %v235_v5 = vld [vmem:[%s866_s2 + $0x10] sm:$0xff]  ;;  %s552_s30 = sshll.u32 %s870_s21, 3 }
   0xd   : > { %599 = vmatpush3.msra.mxu0 %v240_v0  ;;  %646 = vmatpush3.msra.mxu1 %v240_v0  ;;  %v234_v6 = vld [vmem:[%s866_s2 + $0x8] sm:$0xff]  ;;  %s732_s9 = scalar_lea.vmem %s864_s0, %s552_s30  ;;  %v233_v7 = vld [vmem:[%s866_s2] sm:$0xff]  ;;  %s791_s26 = scalar_lea.vmem %s868_s4, %s552_s30  ;;  %v204_v35 = vld [vmem:[%s865_s1 + $0x18] sm:$0xff] }
   0xe   : > { %600 = vmatprep.subr.mxu0 %v239_v1  ;;  %639 = vmatprep.subr.mxu1 %v239_v1  ;;  %v217_v8 = vld [vmem:[%s732_s9] sm:$0xff]  ;;  %v218_v10 = vld [vmem:[%s732_s9 + $0x8] sm:$0xff]  ;;  %v219_v12 = vld [vmem:[%s732_s9 + $0x10] sm:$0xff] }
   0xf   : > { %601 = vmatpush3.msra.mxu0 %v239_v1  ;;  %647 = vmatpush3.msra.mxu1 %v239_v1  ;;  %v225_v9 = vld [vmem:[%s732_s9 + $0x40] sm:$0xff]  ;;  %v226_v11 = vld [vmem:[%s732_s9 + $0x48] sm:$0xff]  ;;  %v227_v13 = vld [vmem:[%s732_s9 + $0x50] sm:$0xff] }
  0x10   : > { %602 = vmatprep.subr.mxu0 %v238_v2  ;;  %640 = vmatprep.subr.mxu1 %v238_v2  ;;  %v220_v14 = vld [vmem:[%s732_s9 + $0x18] sm:$0xff]  ;;  %v221_v16 = vld [vmem:[%s732_s9 + $0x20] sm:$0xff]  ;;  %v222_v18 = vld [vmem:[%s732_s9 + $0x28] sm:$0xff] }
  0x11   : > { %603 = vmatpush3.msra.mxu0 %v238_v2  ;;  %648 = vmatpush3.msra.mxu1 %v238_v2  ;;  %v228_v15 = vld [vmem:[%s732_s9 + $0x58] sm:$0xff]  ;;  %v229_v17 = vld [vmem:[%s732_s9 + $0x60] sm:$0xff]  ;;  %v230_v19 = vld [vmem:[%s732_s9 + $0x68] sm:$0xff] }
  0x12   : > { %604 = vmatprep.subr.mxu0 %v237_v3  ;;  %641 = vmatprep.subr.mxu1 %v237_v3  ;;  %v223_v20 = vld [vmem:[%s732_s9 + $0x30] sm:$0xff]  ;;  %v224_v22 = vld [vmem:[%s732_s9 + $0x38] sm:$0xff]  ;;  %v202_v24 = vld [vmem:[%s865_s1 + $0x8] sm:$0xff] }
  0x13   : > { %605 = vmatpush3.msra.mxu0 %v237_v3  ;;  %649 = vmatpush3.msra.mxu1 %v237_v3  ;;  %v231_v21 = vld [vmem:[%s732_s9 + $0x70] sm:$0xff]  ;;  %v232_v23 = vld [vmem:[%s732_s9 + $0x78] sm:$0xff]  ;;  %v210_v25 = vld [vmem:[%s865_s1 + $0x48] sm:$0xff] }
  0x14   : > { %606 = vmatprep.subr.mxu0 %v236_v4  ;;  %642 = vmatprep.subr.mxu1 %v236_v4  ;;  %v778_v27 = vld [vmem:[%s867_s3] ss:$0 sm:$0xff]  ;;  %v212_v36 = vld [vmem:[%s865_s1 + $0x58] sm:$0xff]  ;;  %v203_v43 = vld [vmem:[%s865_s1 + $0x10] sm:$0xff] }
  0x15   : > { %607 = vmatpush3.msra.mxu0 %v236_v4  ;;  %650 = vmatpush3.msra.mxu1 %v236_v4  ;;  %v201_v29 = vld [vmem:[%s865_s1] sm:$0xff]  ;;  %v211_v44 = vld [vmem:[%s865_s1 + $0x50] sm:$0xff]  ;;  %v206_v51 = vld [vmem:[%s865_s1 + $0x28] sm:$0xff] }
  0x16   : > { %608 = vmatprep.subr.mxu0 %v235_v5  ;;  %643 = vmatprep.subr.mxu1 %v235_v5  ;;  %v209_v30 = vld [vmem:[%s865_s1 + $0x40] sm:$0xff]  ;;  %v214_v52 = vld [vmem:[%s865_s1 + $0x68] sm:$0xff]  ;;  %v208_v3 = vld [vmem:[%s865_s1 + $0x38] sm:$0xff] }
  0x17   : > { %609 = vmatpush3.msra.mxu0 %v235_v5  ;;  %651 = vmatpush3.msra.mxu1 %v235_v5  ;;  %v205_v59 = vld [vmem:[%s865_s1 + $0x20] sm:$0xff]  ;;  %v216_v4 = vld [vmem:[%s865_s1 + $0x78] sm:$0xff] }
  0x18   : > { %610 = vmatprep.subr.mxu0 %v234_v6  ;;  %644 = vmatprep.subr.mxu1 %v234_v6  ;;  %v213_v60 = vld [vmem:[%s865_s1 + $0x60] sm:$0xff] }
  0x19   : > { %611 = vmatpush3.msra.mxu0 %v234_v6  ;;  %652 = vmatpush3.msra.mxu1 %v234_v6 }
  0x1a   : > { %612 = vmatprep.subr.mxu0 %v233_v7  ;;  %645 = vmatprep.subr.mxu1 %v233_v7 }
  0x1b   : > { %613 = vmatpush3.msra.mxu0 %v233_v7  ;;  %653 = vmatpush3.msra.mxu1 %v233_v7 }
  0x1c   : > { %614 = vmatprep.mubr.msk.f32.mxu0 %vm241_vm0, %v217_v8  ;;  %626 = vmatprep.mubr.msk.f32.mxu1 %vm241_vm0, %v225_v9 }
  0x1d   : > { %615 = vmatmul.mubr.msk.f32.vlgmr.msra.gmra.mxu0 %vm241_vm0, %v218_v10  ;;  %627 = vmatmul.mubr.msk.f32.vlgmr.msra.gmra.mxu1 %vm241_vm0, %v226_v11  ;;  %v207_v11 = vld [vmem:[%s865_s1 + $0x30] sm:$0xff] }
  0x1e   : > { %617 = vmatprep.mubr.msk.f32.mxu0 %vm241_vm0, %v219_v12  ;;  %629 = vmatprep.mubr.msk.f32.mxu1 %vm241_vm0, %v227_v13  ;;  %v215_v12 = vld [vmem:[%s865_s1 + $0x70] sm:$0xff] }
  0x21   : > { %618 = vmatmul.mubr.msk.f32.gmra.mxu0 %vm241_vm0, %v220_v14  ;;  %630 = vmatmul.mubr.msk.f32.gmra.mxu1 %vm241_vm0, %v228_v15 }
  0x22   : > { %620 = vmatprep.mubr.msk.f32.mxu0 %vm241_vm0, %v221_v16  ;;  %632 = vmatprep.mubr.msk.f32.mxu1 %vm241_vm0, %v229_v17 }
  0x25   : > { %621 = vmatmul.mubr.msk.f32.gmra.mxu0 %vm241_vm0, %v222_v18  ;;  %633 = vmatmul.mubr.msk.f32.gmra.mxu1 %vm241_vm0, %v230_v19 }
  0x26   : > { %623 = vmatprep.mubr.msk.f32.mxu0 %vm241_vm0, %v223_v20  ;;  %635 = vmatprep.mubr.msk.f32.mxu1 %vm241_vm0, %v231_v21 }
  0x29   : > { %624 = vmatmul.mubr.msk.f32.gmra.mxu0 %vm241_vm0, %v224_v22  ;;  %636 = vmatmul.mubr.msk.f32.gmra.mxu1 %vm241_vm0, %v232_v23 }
  0xdd   : > { %v616_v26 = vpop.f32.mrf.mxu0  ;;  %v628_v28 = vpop.f32.mrf.mxu1 }
  0xde   : > { %v436_v31 = vadd.f32 %v616_v26, %v202_v24  ;;  %v444_v32 = vadd.f32 %v628_v28, %v210_v25 }
  0xdf   : > { %v356_v33 = vpop.f32.mrf.mxu0  ;;  %v396_v34 = vpop.f32.mrf.mxu1 }
  0xe0   : > { %v459_v37 = vadd.f32 %v778_v27, %v436_v31  ;;  %v467_v38 = vadd.f32 %v778_v27, %v444_v32  ;;  %v435_v39 = vadd.f32 %v356_v33, %v201_v29  ;;  %v443_v40 = vadd.f32 %v396_v34, %v209_v30 }
  0xe1   : > { %v619_v41 = vpop.f32.mrf.mxu0  ;;  %v631_v42 = vpop.f32.mrf.mxu1 }
  0xe2   : > { %475 = vst [vmem:[%s791_s26 + $0x8] sm:$0xff] %v459_v37  ;;  %483 = vst [vmem:[%s791_s26 + $0x48] sm:$0xff] %v467_v38  ;;  %v458_v45 = vadd.f32 %v778_v27, %v435_v39  ;;  %v466_v46 = vadd.f32 %v778_v27, %v443_v40  ;;  %v438_v47 = vadd.f32 %v619_v41, %v204_v35 }
  0xe3   : > { %v446_v48 = vadd.f32 %v631_v42, %v212_v36  ;;  %v366_v49 = vpop.f32.mrf.mxu0  ;;  %v406_v50 = vpop.f32.mrf.mxu1 }
  0xe4   : > { %474 = vst [vmem:[%s791_s26] sm:$0xff] %v458_v45  ;;  %482 = vst [vmem:[%s791_s26 + $0x40] sm:$0xff] %v466_v46  ;;  %v461_v53 = vadd.f32 %v778_v27, %v438_v47  ;;  %v437_v55 = vadd.f32 %v366_v49, %v203_v43  ;;  %v445_v56 = vadd.f32 %v406_v50, %v211_v44 }
  0xe5   : > { %v469_v54 = vadd.f32 %v778_v27, %v446_v48  ;;  %v622_v57 = vpop.f32.mrf.mxu0  ;;  %v634_v58 = vpop.f32.mrf.mxu1 }
  0xe6   : > { %477 = vst [vmem:[%s791_s26 + $0x18] sm:$0xff] %v461_v53  ;;  %v460_v61 = vadd.f32 %v778_v27, %v437_v55  ;;  %v468_v62 = vadd.f32 %v778_v27, %v445_v56  ;;  %v440_v63 = vadd.f32 %v622_v57, %v206_v51  ;;  %v448_v0 = vadd.f32 %v634_v58, %v214_v52 }
  0xe7   : > { %485 = vst [vmem:[%s791_s26 + $0x58] sm:$0xff] %v469_v54  ;;  %v376_v1 = vpop.f32.mrf.mxu0  ;;  %v416_v2 = vpop.f32.mrf.mxu1 }
  0xe8   : > { %476 = vst [vmem:[%s791_s26 + $0x10] sm:$0xff] %v460_v61  ;;  %484 = vst [vmem:[%s791_s26 + $0x50] sm:$0xff] %v468_v62  ;;  %v463_v5 = vadd.f32 %v778_v27, %v440_v63  ;;  %v471_v6 = vadd.f32 %v778_v27, %v448_v0  ;;  %v439_v7 = vadd.f32 %v376_v1, %v205_v59 }
  0xe9   : > { %v447_v8 = vadd.f32 %v416_v2, %v213_v60  ;;  %v625_v9 = vpop.f32.mrf.mxu0  ;;  %v637_v10 = vpop.f32.mrf.mxu1 }
  0xea   : > { %479 = vst [vmem:[%s791_s26 + $0x28] sm:$0xff] %v463_v5  ;;  %487 = vst [vmem:[%s791_s26 + $0x68] sm:$0xff] %v471_v6  ;;  %v462_v13 = vadd.f32 %v778_v27, %v439_v7  ;;  %v442_v15 = vadd.f32 %v625_v9, %v208_v3  ;;  %v450_v16 = vadd.f32 %v637_v10, %v216_v4 }
  0xeb   : > { %v470_v14 = vadd.f32 %v778_v27, %v447_v8  ;;  %v386_v17 = vpop.f32.mrf.mxu0  ;;  %v426_v18 = vpop.f32.mrf.mxu1 }
  0xec   : > { %478 = vst [vmem:[%s791_s26 + $0x20] sm:$0xff] %v462_v13  ;;  %v465_v19 = vadd.f32 %v778_v27, %v442_v15  ;;  %v473_v20 = vadd.f32 %v778_v27, %v450_v16  ;;  %v441_v21 = vadd.f32 %v386_v17, %v207_v11  ;;  %v449_v22 = vadd.f32 %v426_v18, %v215_v12 }
  0xed   : > { %486 = vst [vmem:[%s791_s26 + $0x60] sm:$0xff] %v470_v14 }
  0xee   : > { %481 = vst [vmem:[%s791_s26 + $0x38] sm:$0xff] %v465_v19  ;;  %489 = vst [vmem:[%s791_s26 + $0x78] sm:$0xff] %v473_v20  ;;  %v464_v23 = vadd.f32 %v778_v27, %v441_v21  ;;  %v472_v24 = vadd.f32 %v778_v27, %v449_v22 }
  0xf0   : > { %480 = vst [vmem:[%s791_s26 + $0x30] sm:$0xff] %v464_v23  ;;  %488 = vst [vmem:[%s791_s26 + $0x70] sm:$0xff] %v472_v24 }
  0xf1 PF: > { %s14_s15 = sadd.s32 1, %s668_s15  }
  0xf2   : > { %p11_p4 = scmp.ge.s32.totalorder %s14_s15, 4  }
  0xf4   :  { %13 = sbr.rel (!%p11_p4) target bundleno = 1 (0x1), region = 66 }

// kernel: custom-call
= control target key start
LH: loop header
LB: loop body
LE: loop exit
PB: predicated region body
PF: predicated region fallthrough
CT: control target
= control target key end

     0   :  { %2 = vsyncpa [#allocation0], 0  ;;  %s47_s0 = inlined_call_operand.hbm [shape: c64[16,16,8,8,8], index: 0, kind: input, shape index: {}]   ;;  %s48_s1 = inlined_call_operand.vmem [shape: f32[16,16,8,8,8], index: 1, kind: output, shape index: {}]  }
   0x1   :  { %s3_s8 = sshll.u32 %s48_s1, 4  ;;  %s4_s8 = int_to_ptr.vmem [resolvable:$true] %s3_s8 }
   0x2   :  { %s17_s9 = scalar_lea.vmem %s4_s8, 131072  ;;  %p22_p1 = scmp.lt.s32.totalorder %s4_s8, %s4_s8 }
   0x3   :  { %p18_p0 = scmp.ne.s32.totalorder %s4_s8, %s17_s9  ;;  %p23_p2 = scmp.lt.s32.totalorder %s17_s9, %s17_s9 }
   0x5   :  { %p24_p3 = por %p23_p2, %p22_p1 }
   0x7   :  { %p25_p4 = pnand %p24_p3, %p18_p0 }
   0x9   :  { %28 = shalt.err (!%p25_p4)  }
   0xa   :  { %6 = dma.hbm_to_vmem [thread:$0]  %s47_s0, 131072, %s4_s8, [#allocation0] }
   0xb   :  { %29 = dma.done.wait [#allocation0], 131072  }
   0xc   :  { %30 = vsyncadd [#allocation0], 4294836224 }
   0xd   :  { %8 = vsyncpa [#allocation0], 1 }

// kernel: custom-call.1
= control target key start
LH: loop header
LB: loop body
LE: loop exit
PB: predicated region body
PF: predicated region fallthrough
CT: control target
= control target key end

     0   :  { %s51_s0 = inlined_call_operand.hbm [shape: c64[16,16,8,8,8], index: 0, kind: input, shape index: {}]   ;;  %s52_s1 = inlined_call_operand.vmem [shape: f32[16,16,8,8,8], index: 1, kind: output, shape index: {}]  }
   0x1   :  { %s2_s8 = scalar_lea.hbm %s51_s0, 131072 }
   0x2   :  { %3 = vsyncpa [#allocation0], 0  ;;  %s4_s11 = sshll.u32 %s52_s1, 4  ;;  %s5_s11 = int_to_ptr.vmem [resolvable:$true] %s4_s11 }
   0x3   :  { %s20_s12 = scalar_lea.vmem %s5_s11, 131072  ;;  %p25_p1 = scmp.lt.s32.totalorder %s5_s11, %s5_s11 }
   0x4   :  { %p21_p0 = scmp.ne.s32.totalorder %s5_s11, %s20_s12  ;;  %p26_p2 = scmp.lt.s32.totalorder %s20_s12, %s20_s12 }
   0x6   :  { %p27_p3 = por %p26_p2, %p25_p1 }
   0x8   :  { %p28_p4 = pnand %p27_p3, %p21_p0 }
   0xa   :  { %31 = shalt.err (!%p28_p4)  }
   0xb   :  { %7 = dma.hbm_to_vmem [thread:$0]  %s2_s8, 131072, %s5_s11, [#allocation0] }
   0xc   :  { %33 = dma.done.wait [#allocation0], 131072  }
   0xd   :  { %34 = vsyncadd [#allocation0], 4294836224 }
   0xe   :  { %9 = vsyncpa [#allocation0], 1 }

// kernel: reverse.8
= control target key start
LH: loop header
LB: loop body
LE: loop exit
PB: predicated region body
PF: predicated region fallthrough
CT: control target
= control target key end

     0   :  { %s2312_s0 = inlined_call_operand.vmem [shape: f32[2,8,16,16,6], index: 0, kind: input, shape index: {}]   ;;  %s2313_s1 = inlined_call_operand.vmem [shape: f32[2,8,16,16,6], index: 1, kind: output, shape index: {}]  }
   0x1   :  { %v768_v0 = vld [vmem:[%s2312_s0 + $0x50] sm:$0xff]  ;;  %v799_v16 = vld [vmem:[%s2312_s0 + $0x40] sm:$0xff] }
   0x2   :  { %v769_v1 = vld [vmem:[%s2312_s0 + $0x350] sm:$0xff]  ;;  %4 = vst [vmem:[%s2313_s1] sm:$0xff] %v768_v0  ;;  %v801_v17 = vld [vmem:[%s2312_s0 + $0x340] sm:$0xff]  ;;  %800 = vst [vmem:[%s2313_s1 + $0x10] sm:$0xff] %v799_v16 }
   0x3   :  { %v771_v2 = vld [vmem:[%s2312_s0 + $0xb0] sm:$0xff]  ;;  %770 = vst [vmem:[%s2313_s1 + $0x300] sm:$0xff] %v769_v1  ;;  %802 = vst [vmem:[%s2313_s1 + $0x310] sm:$0xff] %v801_v17  ;;  %v803_v18 = vld [vmem:[%s2312_s0 + $0xa0] sm:$0xff] }
   0x4   :  { %772 = vst [vmem:[%s2313_s1 + $0x60] sm:$0xff] %v771_v2  ;;  %v773_v3 = vld [vmem:[%s2312_s0 + $0x3b0] sm:$0xff]  ;;  %v805_v19 = vld [vmem:[%s2312_s0 + $0x3a0] sm:$0xff]  ;;  %804 = vst [vmem:[%s2313_s1 + $0x70] sm:$0xff] %v803_v18 }
   0x5   :  { %v775_v4 = vld [vmem:[%s2312_s0 + $0x110] sm:$0xff]  ;;  %774 = vst [vmem:[%s2313_s1 + $0x360] sm:$0xff] %v773_v3  ;;  %v807_v20 = vld [vmem:[%s2312_s0 + $0x100] sm:$0xff]  ;;  %806 = vst [vmem:[%s2313_s1 + $0x370] sm:$0xff] %v805_v19 }
   0x6   :  { %v777_v5 = vld [vmem:[%s2312_s0 + $0x410] sm:$0xff]  ;;  %776 = vst [vmem:[%s2313_s1 + $0xc0] sm:$0xff] %v775_v4  ;;  %808 = vst [vmem:[%s2313_s1 + $0xd0] sm:$0xff] %v807_v20  ;;  %v809_v21 = vld [vmem:[%s2312_s0 + $0x400] sm:$0xff] }
   0x7   :  { %778 = vst [vmem:[%s2313_s1 + $0x3c0] sm:$0xff] %v777_v5  ;;  %v779_v6 = vld [vmem:[%s2312_s0 + $0x170] sm:$0xff]  ;;  %v811_v22 = vld [vmem:[%s2312_s0 + $0x160] sm:$0xff]  ;;  %810 = vst [vmem:[%s2313_s1 + $0x3d0] sm:$0xff] %v809_v21 }
   0x8   :  { %v781_v7 = vld [vmem:[%s2312_s0 + $0x470] sm:$0xff]  ;;  %780 = vst [vmem:[%s2313_s1 + $0x120] sm:$0xff] %v779_v6  ;;  %v813_v23 = vld [vmem:[%s2312_s0 + $0x460] sm:$0xff]  ;;  %812 = vst [vmem:[%s2313_s1 + $0x130] sm:$0xff] %v811_v22 }
   0x9   :  { %v783_v8 = vld [vmem:[%s2312_s0 + $0x1d0] sm:$0xff]  ;;  %782 = vst [vmem:[%s2313_s1 + $0x420] sm:$0xff] %v781_v7  ;;  %814 = vst [vmem:[%s2313_s1 + $0x430] sm:$0xff] %v813_v23  ;;  %v815_v24 = vld [vmem:[%s2312_s0 + $0x1c0] sm:$0xff] }
   0xa   :  { %784 = vst [vmem:[%s2313_s1 + $0x180] sm:$0xff] %v783_v8  ;;  %v785_v9 = vld [vmem:[%s2312_s0 + $0x4d0] sm:$0xff]  ;;  %v817_v25 = vld [vmem:[%s2312_s0 + $0x4c0] sm:$0xff]  ;;  %816 = vst [vmem:[%s2313_s1 + $0x190] sm:$0xff] %v815_v24 }
   0xb   :  { %v787_v10 = vld [vmem:[%s2312_s0 + $0x230] sm:$0xff]  ;;  %786 = vst [vmem:[%s2313_s1 + $0x480] sm:$0xff] %v785_v9  ;;  %v819_v26 = vld [vmem:[%s2312_s0 + $0x220] sm:$0xff]  ;;  %818 = vst [vmem:[%s2313_s1 + $0x490] sm:$0xff] %v817_v25 }
   0xc   :  { %v789_v11 = vld [vmem:[%s2312_s0 + $0x530] sm:$0xff]  ;;  %788 = vst [vmem:[%s2313_s1 + $0x1e0] sm:$0xff] %v787_v10  ;;  %820 = vst [vmem:[%s2313_s1 + $0x1f0] sm:$0xff] %v819_v26  ;;  %v821_v27 = vld [vmem:[%s2312_s0 + $0x520] sm:$0xff] }
   0xd   :  { %790 = vst [vmem:[%s2313_s1 + $0x4e0] sm:$0xff] %v789_v11  ;;  %v791_v12 = vld [vmem:[%s2312_s0 + $0x290] sm:$0xff]  ;;  %v823_v28 = vld [vmem:[%s2312_s0 + $0x280] sm:$0xff]  ;;  %822 = vst [vmem:[%s2313_s1 + $0x4f0] sm:$0xff] %v821_v27 }
   0xe   :  { %v793_v13 = vld [vmem:[%s2312_s0 + $0x590] sm:$0xff]  ;;  %792 = vst [vmem:[%s2313_s1 + $0x240] sm:$0xff] %v791_v12  ;;  %v825_v29 = vld [vmem:[%s2312_s0 + $0x580] sm:$0xff]  ;;  %824 = vst [vmem:[%s2313_s1 + $0x250] sm:$0xff] %v823_v28 }
   0xf   :  { %v795_v14 = vld [vmem:[%s2312_s0 + $0x2f0] sm:$0xff]  ;;  %794 = vst [vmem:[%s2313_s1 + $0x540] sm:$0xff] %v793_v13  ;;  %826 = vst [vmem:[%s2313_s1 + $0x550] sm:$0xff] %v825_v29  ;;  %v827_v30 = vld [vmem:[%s2312_s0 + $0x2e0] sm:$0xff] }
  0x10   :  { %796 = vst [vmem:[%s2313_s1 + $0x2a0] sm:$0xff] %v795_v14  ;;  %v797_v15 = vld [vmem:[%s2312_s0 + $0x5f0] sm:$0xff]  ;;  %v829_v31 = vld [vmem:[%s2312_s0 + $0x5e0] sm:$0xff]  ;;  %828 = vst [vmem:[%s2313_s1 + $0x2b0] sm:$0xff] %v827_v30 }
  0x11   :  { %798 = vst [vmem:[%s2313_s1 + $0x5a0] sm:$0xff] %v797_v15  ;;  %v831_v32 = vld [vmem:[%s2312_s0 + $0x30] sm:$0xff]  ;;  %830 = vst [vmem:[%s2313_s1 + $0x5b0] sm:$0xff] %v829_v31  ;;  %v863_v48 = vld [vmem:[%s2312_s0 + $0x20] sm:$0xff] }
  0x12   :  { %832 = vst [vmem:[%s2313_s1 + $0x20] sm:$0xff] %v831_v32  ;;  %v833_v33 = vld [vmem:[%s2312_s0 + $0x330] sm:$0xff]  ;;  %v865_v49 = vld [vmem:[%s2312_s0 + $0x320] sm:$0xff]  ;;  %864 = vst [vmem:[%s2313_s1 + $0x30] sm:$0xff] %v863_v48 }
  0x13   :  { %v835_v34 = vld [vmem:[%s2312_s0 + $0x90] sm:$0xff]  ;;  %834 = vst [vmem:[%s2313_s1 + $0x320] sm:$0xff] %v833_v33  ;;  %v867_v50 = vld [vmem:[%s2312_s0 + $0x80] sm:$0xff]  ;;  %866 = vst [vmem:[%s2313_s1 + $0x330] sm:$0xff] %v865_v49 }
  0x14   :  { %v837_v35 = vld [vmem:[%s2312_s0 + $0x390] sm:$0xff]  ;;  %836 = vst [vmem:[%s2313_s1 + $0x80] sm:$0xff] %v835_v34  ;;  %868 = vst [vmem:[%s2313_s1 + $0x90] sm:$0xff] %v867_v50  ;;  %v869_v51 = vld [vmem:[%s2312_s0 + $0x380] sm:$0xff] }
  0x15   :  { %838 = vst [vmem:[%s2313_s1 + $0x380] sm:$0xff] %v837_v35  ;;  %v839_v36 = vld [vmem:[%s2312_s0 + $0xf0] sm:$0xff]  ;;  %v871_v52 = vld [vmem:[%s2312_s0 + $0xe0] sm:$0xff]  ;;  %870 = vst [vmem:[%s2313_s1 + $0x390] sm:$0xff] %v869_v51 }
  0x16   :  { %v841_v37 = vld [vmem:[%s2312_s0 + $0x3f0] sm:$0xff]  ;;  %840 = vst [vmem:[%s2313_s1 + $0xe0] sm:$0xff] %v839_v36  ;;  %v873_v53 = vld [vmem:[%s2312_s0 + $0x3e0] sm:$0xff]  ;;  %872 = vst [vmem:[%s2313_s1 + $0xf0] sm:$0xff] %v871_v52 }
  0x17   :  { %v843_v38 = vld [vmem:[%s2312_s0 + $0x150] sm:$0xff]  ;;  %842 = vst [vmem:[%s2313_s1 + $0x3e0] sm:$0xff] %v841_v37  ;;  %874 = vst [vmem:[%s2313_s1 + $0x3f0] sm:$0xff] %v873_v53  ;;  %v875_v54 = vld [vmem:[%s2312_s0 + $0x140] sm:$0xff] }
  0x18   :  { %844 = vst [vmem:[%s2313_s1 + $0x140] sm:$0xff] %v843_v38  ;;  %v845_v39 = vld [vmem:[%s2312_s0 + $0x450] sm:$0xff]  ;;  %v877_v55 = vld [vmem:[%s2312_s0 + $0x440] sm:$0xff]  ;;  %876 = vst [vmem:[%s2313_s1 + $0x150] sm:$0xff] %v875_v54 }
  0x19   :  { %v847_v40 = vld [vmem:[%s2312_s0 + $0x1b0] sm:$0xff]  ;;  %846 = vst [vmem:[%s2313_s1 + $0x440] sm:$0xff] %v845_v39  ;;  %v879_v56 = vld [vmem:[%s2312_s0 + $0x1a0] sm:$0xff]  ;;  %878 = vst [vmem:[%s2313_s1 + $0x450] sm:$0xff] %v877_v55 }
  0x1a   :  { %v849_v41 = vld [vmem:[%s2312_s0 + $0x4b0] sm:$0xff]  ;;  %848 = vst [vmem:[%s2313_s1 + $0x1a0] sm:$0xff] %v847_v40  ;;  %880 = vst [vmem:[%s2313_s1 + $0x1b0] sm:$0xff] %v879_v56  ;;  %v881_v57 = vld [vmem:[%s2312_s0 + $0x4a0] sm:$0xff] }
  0x1b   :  { %850 = vst [vmem:[%s2313_s1 + $0x4a0] sm:$0xff] %v849_v41  ;;  %v851_v42 = vld [vmem:[%s2312_s0 + $0x210] sm:$0xff]  ;;  %v883_v58 = vld [vmem:[%s2312_s0 + $0x200] sm:$0xff]  ;;  %882 = vst [vmem:[%s2313_s1 + $0x4b0] sm:$0xff] %v881_v57 }
  0x1c   :  { %v853_v43 = vld [vmem:[%s2312_s0 + $0x510] sm:$0xff]  ;;  %852 = vst [vmem:[%s2313_s1 + $0x200] sm:$0xff] %v851_v42  ;;  %v885_v59 = vld [vmem:[%s2312_s0 + $0x500] sm:$0xff]  ;;  %884 = vst [vmem:[%s2313_s1 + $0x210] sm:$0xff] %v883_v58 }
  0x1d   :  { %v855_v44 = vld [vmem:[%s2312_s0 + $0x270] sm:$0xff]  ;;  %854 = vst [vmem:[%s2313_s1 + $0x500] sm:$0xff] %v853_v43  ;;  %886 = vst [vmem:[%s2313_s1 + $0x510] sm:$0xff] %v885_v59  ;;  %v887_v60 = vld [vmem:[%s2312_s0 + $0x260] sm:$0xff] }
  0x1e   :  { %856 = vst [vmem:[%s2313_s1 + $0x260] sm:$0xff] %v855_v44  ;;  %v857_v45 = vld [vmem:[%s2312_s0 + $0x570] sm:$0xff]  ;;  %v889_v61 = vld [vmem:[%s2312_s0 + $0x560] sm:$0xff]  ;;  %888 = vst [vmem:[%s2313_s1 + $0x270] sm:$0xff] %v887_v60 }
  0x1f   :  { %v859_v46 = vld [vmem:[%s2312_s0 + $0x2d0] sm:$0xff]  ;;  %858 = vst [vmem:[%s2313_s1 + $0x560] sm:$0xff] %v857_v45  ;;  %v891_v62 = vld [vmem:[%s2312_s0 + $0x2c0] sm:$0xff]  ;;  %890 = vst [vmem:[%s2313_s1 + $0x570] sm:$0xff] %v889_v61 }
  0x20   :  { %v861_v47 = vld [vmem:[%s2312_s0 + $0x5d0] sm:$0xff]  ;;  %860 = vst [vmem:[%s2313_s1 + $0x2c0] sm:$0xff] %v859_v46  ;;  %892 = vst [vmem:[%s2313_s1 + $0x2d0] sm:$0xff] %v891_v62  ;;  %v893_v63 = vld [vmem:[%s2312_s0 + $0x5c0] sm:$0xff] }
  0x21   :  { %862 = vst [vmem:[%s2313_s1 + $0x5c0] sm:$0xff] %v861_v47  ;;  %v895_v0 = vld [vmem:[%s2312_s0 + $0x10] sm:$0xff]  ;;  %894 = vst [vmem:[%s2313_s1 + $0x5d0] sm:$0xff] %v893_v63  ;;  %v321_v16 = vld [vmem:[%s2312_s0] sm:$0xff] }
  0x22   :  { %v897_v1 = vld [vmem:[%s2312_s0 + $0x310] sm:$0xff]  ;;  %896 = vst [vmem:[%s2313_s1 + $0x40] sm:$0xff] %v895_v0  ;;  %927 = vst [vmem:[%s2313_s1 + $0x50] sm:$0xff] %v321_v16  ;;  %v928_v17 = vld [vmem:[%s2312_s0 + $0x300] sm:$0xff] }
  0x23   :  { %898 = vst [vmem:[%s2313_s1 + $0x340] sm:$0xff] %v897_v1  ;;  %v899_v2 = vld [vmem:[%s2312_s0 + $0x70] sm:$0xff]  ;;  %v930_v18 = vld [vmem:[%s2312_s0 + $0x60] sm:$0xff]  ;;  %929 = vst [vmem:[%s2313_s1 + $0x350] sm:$0xff] %v928_v17 }
  0x24   :  { %v901_v3 = vld [vmem:[%s2312_s0 + $0x370] sm:$0xff]  ;;  %900 = vst [vmem:[%s2313_s1 + $0xa0] sm:$0xff] %v899_v2  ;;  %v932_v19 = vld [vmem:[%s2312_s0 + $0x360] sm:$0xff]  ;;  %931 = vst [vmem:[%s2313_s1 + $0xb0] sm:$0xff] %v930_v18 }
  0x25   :  { %v903_v4 = vld [vmem:[%s2312_s0 + $0xd0] sm:$0xff]  ;;  %902 = vst [vmem:[%s2313_s1 + $0x3a0] sm:$0xff] %v901_v3  ;;  %933 = vst [vmem:[%s2313_s1 + $0x3b0] sm:$0xff] %v932_v19  ;;  %v934_v20 = vld [vmem:[%s2312_s0 + $0xc0] sm:$0xff] }
  0x26   :  { %904 = vst [vmem:[%s2313_s1 + $0x100] sm:$0xff] %v903_v4  ;;  %v905_v5 = vld [vmem:[%s2312_s0 + $0x3d0] sm:$0xff]  ;;  %v936_v21 = vld [vmem:[%s2312_s0 + $0x3c0] sm:$0xff]  ;;  %935 = vst [vmem:[%s2313_s1 + $0x110] sm:$0xff] %v934_v20 }
  0x27   :  { %v907_v6 = vld [vmem:[%s2312_s0 + $0x130] sm:$0xff]  ;;  %906 = vst [vmem:[%s2313_s1 + $0x400] sm:$0xff] %v905_v5  ;;  %v938_v22 = vld [vmem:[%s2312_s0 + $0x120] sm:$0xff]  ;;  %937 = vst [vmem:[%s2313_s1 + $0x410] sm:$0xff] %v936_v21 }
  0x28   :  { %v909_v7 = vld [vmem:[%s2312_s0 + $0x430] sm:$0xff]  ;;  %908 = vst [vmem:[%s2313_s1 + $0x160] sm:$0xff] %v907_v6  ;;  %939 = vst [vmem:[%s2313_s1 + $0x170] sm:$0xff] %v938_v22  ;;  %v940_v23 = vld [vmem:[%s2312_s0 + $0x420] sm:$0xff] }
  0x29   :  { %910 = vst [vmem:[%s2313_s1 + $0x460] sm:$0xff] %v909_v7  ;;  %v911_v8 = vld [vmem:[%s2312_s0 + $0x190] sm:$0xff]  ;;  %v942_v24 = vld [vmem:[%s2312_s0 + $0x180] sm:$0xff]  ;;  %941 = vst [vmem:[%s2313_s1 + $0x470] sm:$0xff] %v940_v23 }
  0x2a   :  { %v913_v9 = vld [vmem:[%s2312_s0 + $0x490] sm:$0xff]  ;;  %912 = vst [vmem:[%s2313_s1 + $0x1c0] sm:$0xff] %v911_v8  ;;  %v944_v25 = vld [vmem:[%s2312_s0 + $0x480] sm:$0xff]  ;;  %943 = vst [vmem:[%s2313_s1 + $0x1d0] sm:$0xff] %v942_v24 }
  0x2b   :  { %v915_v10 = vld [vmem:[%s2312_s0 + $0x1f0] sm:$0xff]  ;;  %914 = vst [vmem:[%s2313_s1 + $0x4c0] sm:$0xff] %v913_v9  ;;  %945 = vst [vmem:[%s2313_s1 + $0x4d0] sm:$0xff] %v944_v25  ;;  %v946_v26 = vld [vmem:[%s2312_s0 + $0x1e0] sm:$0xff] }
  0x2c   :  { %916 = vst [vmem:[%s2313_s1 + $0x220] sm:$0xff] %v915_v10  ;;  %v917_v11 = vld [vmem:[%s2312_s0 + $0x4f0] sm:$0xff]  ;;  %v948_v27 = vld [vmem:[%s2312_s0 + $0x4e0] sm:$0xff]  ;;  %947 = vst [vmem:[%s2313_s1 + $0x230] sm:$0xff] %v946_v26 }
  0x2d   :  { %v919_v12 = vld [vmem:[%s2312_s0 + $0x250] sm:$0xff]  ;;  %918 = vst [vmem:[%s2313_s1 + $0x520] sm:$0xff] %v917_v11  ;;  %v950_v28 = vld [vmem:[%s2312_s0 + $0x240] sm:$0xff]  ;;  %949 = vst [vmem:[%s2313_s1 + $0x530] sm:$0xff] %v948_v27 }
  0x2e   :  { %v921_v13 = vld [vmem:[%s2312_s0 + $0x550] sm:$0xff]  ;;  %920 = vst [vmem:[%s2313_s1 + $0x280] sm:$0xff] %v919_v12  ;;  %951 = vst [vmem:[%s2313_s1 + $0x290] sm:$0xff] %v950_v28  ;;  %v952_v29 = vld [vmem:[%s2312_s0 + $0x540] sm:$0xff] }
  0x2f   :  { %922 = vst [vmem:[%s2313_s1 + $0x580] sm:$0xff] %v921_v13  ;;  %v923_v14 = vld [vmem:[%s2312_s0 + $0x2b0] sm:$0xff]  ;;  %v954_v30 = vld [vmem:[%s2312_s0 + $0x2a0] sm:$0xff]  ;;  %953 = vst [vmem:[%s2313_s1 + $0x590] sm:$0xff] %v952_v29 }
  0x30   :  { %v925_v15 = vld [vmem:[%s2312_s0 + $0x5b0] sm:$0xff]  ;;  %924 = vst [vmem:[%s2313_s1 + $0x2e0] sm:$0xff] %v923_v14  ;;  %v956_v31 = vld [vmem:[%s2312_s0 + $0x5a0] sm:$0xff]  ;;  %955 = vst [vmem:[%s2313_s1 + $0x2f0] sm:$0xff] %v954_v30 }
  0x31   :  { %926 = vst [vmem:[%s2313_s1 + $0x5e0] sm:$0xff] %v925_v15  ;;  %957 = vst [vmem:[%s2313_s1 + $0x5f0] sm:$0xff] %v956_v31  ;;  %v958_v32 = vld [vmem:[%s2312_s0 + $0x58] sm:$0xff]  ;;  %v990_v48 = vld [vmem:[%s2312_s0 + $0x48] sm:$0xff] }
  0x32   :  { %v960_v33 = vld [vmem:[%s2312_s0 + $0x358] sm:$0xff]  ;;  %959 = vst [vmem:[%s2313_s1 + $0x8] sm:$0xff] %v958_v32  ;;  %v992_v49 = vld [vmem:[%s2312_s0 + $0x348] sm:$0xff]  ;;  %991 = vst [vmem:[%s2313_s1 + $0x18] sm:$0xff] %v990_v48 }
  0x33   :  { %v962_v34 = vld [vmem:[%s2312_s0 + $0xb8] sm:$0xff]  ;;  %961 = vst [vmem:[%s2313_s1 + $0x308] sm:$0xff] %v960_v33  ;;  %993 = vst [vmem:[%s2313_s1 + $0x318] sm:$0xff] %v992_v49  ;;  %v994_v50 = vld [vmem:[%s2312_s0 + $0xa8] sm:$0xff] }
  0x34   :  { %963 = vst [vmem:[%s2313_s1 + $0x68] sm:$0xff] %v962_v34  ;;  %v964_v35 = vld [vmem:[%s2312_s0 + $0x3b8] sm:$0xff]  ;;  %v996_v51 = vld [vmem:[%s2312_s0 + $0x3a8] sm:$0xff]  ;;  %995 = vst [vmem:[%s2313_s1 + $0x78] sm:$0xff] %v994_v50 }
  0x35   :  { %v966_v36 = vld [vmem:[%s2312_s0 + $0x118] sm:$0xff]  ;;  %965 = vst [vmem:[%s2313_s1 + $0x368] sm:$0xff] %v964_v35  ;;  %v998_v52 = vld [vmem:[%s2312_s0 + $0x108] sm:$0xff]  ;;  %997 = vst [vmem:[%s2313_s1 + $0x378] sm:$0xff] %v996_v51 }
  0x36   :  { %v968_v37 = vld [vmem:[%s2312_s0 + $0x418] sm:$0xff]  ;;  %967 = vst [vmem:[%s2313_s1 + $0xc8] sm:$0xff] %v966_v36  ;;  %999 = vst [vmem:[%s2313_s1 + $0xd8] sm:$0xff] %v998_v52  ;;  %v1000_v53 = vld [vmem:[%s2312_s0 + $0x408] sm:$0xff] }
  0x37   :  { %969 = vst [vmem:[%s2313_s1 + $0x3c8] sm:$0xff] %v968_v37  ;;  %v970_v38 = vld [vmem:[%s2312_s0 + $0x178] sm:$0xff]  ;;  %v1002_v54 = vld [vmem:[%s2312_s0 + $0x168] sm:$0xff]  ;;  %1001 = vst [vmem:[%s2313_s1 + $0x3d8] sm:$0xff] %v1000_v53 }
  0x38   :  { %v972_v39 = vld [vmem:[%s2312_s0 + $0x478] sm:$0xff]  ;;  %971 = vst [vmem:[%s2313_s1 + $0x128] sm:$0xff] %v970_v38  ;;  %v1004_v55 = vld [vmem:[%s2312_s0 + $0x468] sm:$0xff]  ;;  %1003 = vst [vmem:[%s2313_s1 + $0x138] sm:$0xff] %v1002_v54 }
  0x39   :  { %v974_v40 = vld [vmem:[%s2312_s0 + $0x1d8] sm:$0xff]  ;;  %973 = vst [vmem:[%s2313_s1 + $0x428] sm:$0xff] %v972_v39  ;;  %1005 = vst [vmem:[%s2313_s1 + $0x438] sm:$0xff] %v1004_v55  ;;  %v1006_v56 = vld [vmem:[%s2312_s0 + $0x1c8] sm:$0xff] }
  0x3a   :  { %975 = vst [vmem:[%s2313_s1 + $0x188] sm:$0xff] %v974_v40  ;;  %v976_v41 = vld [vmem:[%s2312_s0 + $0x4d8] sm:$0xff]  ;;  %v1008_v57 = vld [vmem:[%s2312_s0 + $0x4c8] sm:$0xff]  ;;  %1007 = vst [vmem:[%s2313_s1 + $0x198] sm:$0xff] %v1006_v56 }
  0x3b   :  { %v978_v42 = vld [vmem:[%s2312_s0 + $0x238] sm:$0xff]  ;;  %977 = vst [vmem:[%s2313_s1 + $0x488] sm:$0xff] %v976_v41  ;;  %v1010_v58 = vld [vmem:[%s2312_s0 + $0x228] sm:$0xff]  ;;  %1009 = vst [vmem:[%s2313_s1 + $0x498] sm:$0xff] %v1008_v57 }
  0x3c   :  { %v980_v43 = vld [vmem:[%s2312_s0 + $0x538] sm:$0xff]  ;;  %979 = vst [vmem:[%s2313_s1 + $0x1e8] sm:$0xff] %v978_v42  ;;  %1011 = vst [vmem:[%s2313_s1 + $0x1f8] sm:$0xff] %v1010_v58  ;;  %v1012_v59 = vld [vmem:[%s2312_s0 + $0x528] sm:$0xff] }
  0x3d   :  { %981 = vst [vmem:[%s2313_s1 + $0x4e8] sm:$0xff] %v980_v43  ;;  %v982_v44 = vld [vmem:[%s2312_s0 + $0x298] sm:$0xff]  ;;  %v1014_v60 = vld [vmem:[%s2312_s0 + $0x288] sm:$0xff]  ;;  %1013 = vst [vmem:[%s2313_s1 + $0x4f8] sm:$0xff] %v1012_v59 }
  0x3e   :  { %v984_v45 = vld [vmem:[%s2312_s0 + $0x598] sm:$0xff]  ;;  %983 = vst [vmem:[%s2313_s1 + $0x248] sm:$0xff] %v982_v44  ;;  %v1016_v61 = vld [vmem:[%s2312_s0 + $0x588] sm:$0xff]  ;;  %1015 = vst [vmem:[%s2313_s1 + $0x258] sm:$0xff] %v1014_v60 }
  0x3f   :  { %v986_v46 = vld [vmem:[%s2312_s0 + $0x2f8] sm:$0xff]  ;;  %985 = vst [vmem:[%s2313_s1 + $0x548] sm:$0xff] %v984_v45  ;;  %1017 = vst [vmem:[%s2313_s1 + $0x558] sm:$0xff] %v1016_v61  ;;  %v1018_v62 = vld [vmem:[%s2312_s0 + $0x2e8] sm:$0xff] }
  0x40   :  { %987 = vst [vmem:[%s2313_s1 + $0x2a8] sm:$0xff] %v986_v46  ;;  %v988_v47 = vld [vmem:[%s2312_s0 + $0x5f8] sm:$0xff]  ;;  %v1020_v63 = vld [vmem:[%s2312_s0 + $0x5e8] sm:$0xff]  ;;  %1019 = vst [vmem:[%s2313_s1 + $0x2b8] sm:$0xff] %v1018_v62 }
  0x41   :  { %989 = vst [vmem:[%s2313_s1 + $0x5a8] sm:$0xff] %v988_v47  ;;  %v1022_v0 = vld [vmem:[%s2312_s0 + $0x38] sm:$0xff]  ;;  %1021 = vst [vmem:[%s2313_s1 + $0x5b8] sm:$0xff] %v1020_v63  ;;  %v1054_v16 = vld [vmem:[%s2312_s0 + $0x28] sm:$0xff] }
  0x42   :  { %1023 = vst [vmem:[%s2313_s1 + $0x28] sm:$0xff] %v1022_v0  ;;  %v1024_v1 = vld [vmem:[%s2312_s0 + $0x338] sm:$0xff]  ;;  %v1056_v17 = vld [vmem:[%s2312_s0 + $0x328] sm:$0xff]  ;;  %1055 = vst [vmem:[%s2313_s1 + $0x38] sm:$0xff] %v1054_v16 }
  0x43   :  { %v1026_v2 = vld [vmem:[%s2312_s0 + $0x98] sm:$0xff]  ;;  %1025 = vst [vmem:[%s2313_s1 + $0x328] sm:$0xff] %v1024_v1  ;;  %v1058_v18 = vld [vmem:[%s2312_s0 + $0x88] sm:$0xff]  ;;  %1057 = vst [vmem:[%s2313_s1 + $0x338] sm:$0xff] %v1056_v17 }
  0x44   :  { %v1028_v3 = vld [vmem:[%s2312_s0 + $0x398] sm:$0xff]  ;;  %1027 = vst [vmem:[%s2313_s1 + $0x88] sm:$0xff] %v1026_v2  ;;  %1059 = vst [vmem:[%s2313_s1 + $0x98] sm:$0xff] %v1058_v18  ;;  %v1060_v19 = vld [vmem:[%s2312_s0 + $0x388] sm:$0xff] }
  0x45   :  { %1029 = vst [vmem:[%s2313_s1 + $0x388] sm:$0xff] %v1028_v3  ;;  %v1030_v4 = vld [vmem:[%s2312_s0 + $0xf8] sm:$0xff]  ;;  %v1062_v20 = vld [vmem:[%s2312_s0 + $0xe8] sm:$0xff]  ;;  %1061 = vst [vmem:[%s2313_s1 + $0x398] sm:$0xff] %v1060_v19 }
  0x46   :  { %v1032_v5 = vld [vmem:[%s2312_s0 + $0x3f8] sm:$0xff]  ;;  %1031 = vst [vmem:[%s2313_s1 + $0xe8] sm:$0xff] %v1030_v4  ;;  %v1064_v21 = vld [vmem:[%s2312_s0 + $0x3e8] sm:$0xff]  ;;  %1063 = vst [vmem:[%s2313_s1 + $0xf8] sm:$0xff] %v1062_v20 }
  0x47   :  { %v1034_v6 = vld [vmem:[%s2312_s0 + $0x158] sm:$0xff]  ;;  %1033 = vst [vmem:[%s2313_s1 + $0x3e8] sm:$0xff] %v1032_v5  ;;  %1065 = vst [vmem:[%s2313_s1 + $0x3f8] sm:$0xff] %v1064_v21  ;;  %v1066_v22 = vld [vmem:[%s2312_s0 + $0x148] sm:$0xff] }
  0x48   :  { %1035 = vst [vmem:[%s2313_s1 + $0x148] sm:$0xff] %v1034_v6  ;;  %v1036_v7 = vld [vmem:[%s2312_s0 + $0x458] sm:$0xff]  ;;  %v1068_v23 = vld [vmem:[%s2312_s0 + $0x448] sm:$0xff]  ;;  %1067 = vst [vmem:[%s2313_s1 + $0x158] sm:$0xff] %v1066_v22 }
  0x49   :  { %v1038_v8 = vld [vmem:[%s2312_s0 + $0x1b8] sm:$0xff]  ;;  %1037 = vst [vmem:[%s2313_s1 + $0x448] sm:$0xff] %v1036_v7  ;;  %v1070_v24 = vld [vmem:[%s2312_s0 + $0x1a8] sm:$0xff]  ;;  %1069 = vst [vmem:[%s2313_s1 + $0x458] sm:$0xff] %v1068_v23 }
  0x4a   :  { %v1040_v9 = vld [vmem:[%s2312_s0 + $0x4b8] sm:$0xff]  ;;  %1039 = vst [vmem:[%s2313_s1 + $0x1a8] sm:$0xff] %v1038_v8  ;;  %1071 = vst [vmem:[%s2313_s1 + $0x1b8] sm:$0xff] %v1070_v24  ;;  %v1072_v25 = vld [vmem:[%s2312_s0 + $0x4a8] sm:$0xff] }
  0x4b   :  { %1041 = vst [vmem:[%s2313_s1 + $0x4a8] sm:$0xff] %v1040_v9  ;;  %v1042_v10 = vld [vmem:[%s2312_s0 + $0x218] sm:$0xff]  ;;  %v1074_v26 = vld [vmem:[%s2312_s0 + $0x208] sm:$0xff]  ;;  %1073 = vst [vmem:[%s2313_s1 + $0x4b8] sm:$0xff] %v1072_v25 }
  0x4c   :  { %v1044_v11 = vld [vmem:[%s2312_s0 + $0x518] sm:$0xff]  ;;  %1043 = vst [vmem:[%s2313_s1 + $0x208] sm:$0xff] %v1042_v10  ;;  %v1076_v27 = vld [vmem:[%s2312_s0 + $0x508] sm:$0xff]  ;;  %1075 = vst [vmem:[%s2313_s1 + $0x218] sm:$0xff] %v1074_v26 }
  0x4d   :  { %v1046_v12 = vld [vmem:[%s2312_s0 + $0x278] sm:$0xff]  ;;  %1045 = vst [vmem:[%s2313_s1 + $0x508] sm:$0xff] %v1044_v11  ;;  %1077 = vst [vmem:[%s2313_s1 + $0x518] sm:$0xff] %v1076_v27  ;;  %v1078_v28 = vld [vmem:[%s2312_s0 + $0x268] sm:$0xff] }
  0x4e   :  { %1047 = vst [vmem:[%s2313_s1 + $0x268] sm:$0xff] %v1046_v12  ;;  %v1048_v13 = vld [vmem:[%s2312_s0 + $0x578] sm:$0xff]  ;;  %v1080_v29 = vld [vmem:[%s2312_s0 + $0x568] sm:$0xff]  ;;  %1079 = vst [vmem:[%s2313_s1 + $0x278] sm:$0xff] %v1078_v28 }
  0x4f   :  { %v1050_v14 = vld [vmem:[%s2312_s0 + $0x2d8] sm:$0xff]  ;;  %1049 = vst [vmem:[%s2313_s1 + $0x568] sm:$0xff] %v1048_v13  ;;  %v1082_v30 = vld [vmem:[%s2312_s0 + $0x2c8] sm:$0xff]  ;;  %1081 = vst [vmem:[%s2313_s1 + $0x578] sm:$0xff] %v1080_v29 }
  0x50   :  { %v1052_v15 = vld [vmem:[%s2312_s0 + $0x5d8] sm:$0xff]  ;;  %1051 = vst [vmem:[%s2313_s1 + $0x2c8] sm:$0xff] %v1050_v14  ;;  %1083 = vst [vmem:[%s2313_s1 + $0x2d8] sm:$0xff] %v1082_v30  ;;  %v1084_v31 = vld [vmem:[%s2312_s0 + $0x5c8] sm:$0xff] }
  0x51   :  { %1053 = vst [vmem:[%s2313_s1 + $0x5c8] sm:$0xff] %v1052_v15  ;;  %v1086_v32 = vld [vmem:[%s2312_s0 + $0x18] sm:$0xff]  ;;  %1085 = vst [vmem:[%s2313_s1 + $0x5d8] sm:$0xff] %v1084_v31  ;;  %v1118_v48 = vld [vmem:[%s2312_s0 + $0x8] sm:$0xff] }
  0x52   :  { %v1088_v33 = vld [vmem:[%s2312_s0 + $0x318] sm:$0xff]  ;;  %1087 = vst [vmem:[%s2313_s1 + $0x48] sm:$0xff] %v1086_v32  ;;  %1119 = vst [vmem:[%s2313_s1 + $0x58] sm:$0xff] %v1118_v48  ;;  %v1120_v49 = vld [vmem:[%s2312_s0 + $0x308] sm:$0xff] }
  0x53   :  { %1089 = vst [vmem:[%s2313_s1 + $0x348] sm:$0xff] %v1088_v33  ;;  %v1090_v34 = vld [vmem:[%s2312_s0 + $0x78] sm:$0xff]  ;;  %v1122_v50 = vld [vmem:[%s2312_s0 + $0x68] sm:$0xff]  ;;  %1121 = vst [vmem:[%s2313_s1 + $0x358] sm:$0xff] %v1120_v49 }
  0x54   :  { %v1092_v35 = vld [vmem:[%s2312_s0 + $0x378] sm:$0xff]  ;;  %1091 = vst [vmem:[%s2313_s1 + $0xa8] sm:$0xff] %v1090_v34  ;;  %v1124_v51 = vld [vmem:[%s2312_s0 + $0x368] sm:$0xff]  ;;  %1123 = vst [vmem:[%s2313_s1 + $0xb8] sm:$0xff] %v1122_v50 }
  0x55   :  { %v1094_v36 = vld [vmem:[%s2312_s0 + $0xd8] sm:$0xff]  ;;  %1093 = vst [vmem:[%s2313_s1 + $0x3a8] sm:$0xff] %v1092_v35  ;;  %1125 = vst [vmem:[%s2313_s1 + $0x3b8] sm:$0xff] %v1124_v51  ;;  %v1126_v52 = vld [vmem:[%s2312_s0 + $0xc8] sm:$0xff] }
  0x56   :  { %1095 = vst [vmem:[%s2313_s1 + $0x108] sm:$0xff] %v1094_v36  ;;  %v1096_v37 = vld [vmem:[%s2312_s0 + $0x3d8] sm:$0xff]  ;;  %v1128_v53 = vld [vmem:[%s2312_s0 + $0x3c8] sm:$0xff]  ;;  %1127 = vst [vmem:[%s2313_s1 + $0x118] sm:$0xff] %v1126_v52 }
  0x57   :  { %v1098_v38 = vld [vmem:[%s2312_s0 + $0x138] sm:$0xff]  ;;  %1097 = vst [vmem:[%s2313_s1 + $0x408] sm:$0xff] %v1096_v37  ;;  %v1130_v54 = vld [vmem:[%s2312_s0 + $0x128] sm:$0xff]  ;;  %1129 = vst [vmem:[%s2313_s1 + $0x418] sm:$0xff] %v1128_v53 }
  0x58   :  { %v1100_v39 = vld [vmem:[%s2312_s0 + $0x438] sm:$0xff]  ;;  %1099 = vst [vmem:[%s2313_s1 + $0x168] sm:$0xff] %v1098_v38  ;;  %1131 = vst [vmem:[%s2313_s1 + $0x178] sm:$0xff] %v1130_v54  ;;  %v1132_v55 = vld [vmem:[%s2312_s0 + $0x428] sm:$0xff] }
  0x59   :  { %1101 = vst [vmem:[%s2313_s1 + $0x468] sm:$0xff] %v1100_v39  ;;  %v1102_v40 = vld [vmem:[%s2312_s0 + $0x198] sm:$0xff]  ;;  %v1134_v56 = vld [vmem:[%s2312_s0 + $0x188] sm:$0xff]  ;;  %1133 = vst [vmem:[%s2313_s1 + $0x478] sm:$0xff] %v1132_v55 }
  0x5a   :  { %v1104_v41 = vld [vmem:[%s2312_s0 + $0x498] sm:$0xff]  ;;  %1103 = vst [vmem:[%s2313_s1 + $0x1c8] sm:$0xff] %v1102_v40  ;;  %v1136_v57 = vld [vmem:[%s2312_s0 + $0x488] sm:$0xff]  ;;  %1135 = vst [vmem:[%s2313_s1 + $0x1d8] sm:$0xff] %v1134_v56 }
  0x5b   :  { %v1106_v42 = vld [vmem:[%s2312_s0 + $0x1f8] sm:$0xff]  ;;  %1105 = vst [vmem:[%s2313_s1 + $0x4c8] sm:$0xff] %v1104_v41  ;;  %1137 = vst [vmem:[%s2313_s1 + $0x4d8] sm:$0xff] %v1136_v57  ;;  %v1138_v58 = vld [vmem:[%s2312_s0 + $0x1e8] sm:$0xff] }
  0x5c   :  { %1107 = vst [vmem:[%s2313_s1 + $0x228] sm:$0xff] %v1106_v42  ;;  %v1108_v43 = vld [vmem:[%s2312_s0 + $0x4f8] sm:$0xff]  ;;  %v1140_v59 = vld [vmem:[%s2312_s0 + $0x4e8] sm:$0xff]  ;;  %1139 = vst [vmem:[%s2313_s1 + $0x238] sm:$0xff] %v1138_v58 }
  0x5d   :  { %v1110_v44 = vld [vmem:[%s2312_s0 + $0x258] sm:$0xff]  ;;  %1109 = vst [vmem:[%s2313_s1 + $0x528] sm:$0xff] %v1108_v43  ;;  %v1142_v60 = vld [vmem:[%s2312_s0 + $0x248] sm:$0xff]  ;;  %1141 = vst [vmem:[%s2313_s1 + $0x538] sm:$0xff] %v1140_v59 }
  0x5e   :  { %v1112_v45 = vld [vmem:[%s2312_s0 + $0x558] sm:$0xff]  ;;  %1111 = vst [vmem:[%s2313_s1 + $0x288] sm:$0xff] %v1110_v44  ;;  %1143 = vst [vmem:[%s2313_s1 + $0x298] sm:$0xff] %v1142_v60  ;;  %v1144_v61 = vld [vmem:[%s2312_s0 + $0x548] sm:$0xff] }
  0x5f   :  { %1113 = vst [vmem:[%s2313_s1 + $0x588] sm:$0xff] %v1112_v45  ;;  %v1114_v46 = vld [vmem:[%s2312_s0 + $0x2b8] sm:$0xff]  ;;  %v1146_v62 = vld [vmem:[%s2312_s0 + $0x2a8] sm:$0xff]  ;;  %1145 = vst [vmem:[%s2313_s1 + $0x598] sm:$0xff] %v1144_v61 }
  0x60   :  { %v1116_v47 = vld [vmem:[%s2312_s0 + $0x5b8] sm:$0xff]  ;;  %1115 = vst [vmem:[%s2313_s1 + $0x2e8] sm:$0xff] %v1114_v46  ;;  %v1148_v63 = vld [vmem:[%s2312_s0 + $0x5a8] sm:$0xff]  ;;  %1147 = vst [vmem:[%s2313_s1 + $0x2f8] sm:$0xff] %v1146_v62 }
  0x61   :  { %1117 = vst [vmem:[%s2313_s1 + $0x5e8] sm:$0xff] %v1116_v47  ;;  %1149 = vst [vmem:[%s2313_s1 + $0x5f8] sm:$0xff] %v1148_v63 }

// kernel: rsnet_2d_forward.7
= control target key start
LH: loop header
LB: loop body
LE: loop exit
PB: predicated region body
PF: predicated region fallthrough
CT: control target
= control target key end

     0   :  { %s2162_s2 = inlined_call_operand.vmem [shape: f32[128,128], index: 2, kind: input, shape index: {}]   ;;  %s2163_s0 = inlined_call_operand.vmem [shape: f32[448,128], index: 0, kind: input, shape index: {}]   ;;  %s2164_s1 = inlined_call_operand.vmem [shape: f32[448,128], index: 1, kind: input, shape index: {}, may-alias: {1,4}]   ;;  %s2165_s3 = inlined_call_operand.vmem [shape: f32[1,128], index: 3, kind: input, shape index: {}]   ;;  %s2166_s4 = inlined_call_operand.vmem [shape: f32[448,128], index: 4, kind: output, shape index: {}, may-alias: {1,4}]  }
   0x1   :  { %v144_v0 = vld [vmem:[%s2162_s2 + $0x78] sm:$0xff]  ;;  %v143_v1 = vld [vmem:[%s2162_s2 + $0x70] sm:$0xff]  ;;  %v142_v2 = vld [vmem:[%s2162_s2 + $0x68] sm:$0xff] }
   0x2   :  { %1022 = vmatprep.subr.mxu0 %v144_v0  ;;  %1138 = vmatprep.subr.mxu1 %v144_v0  ;;  %v141_v3 = vld [vmem:[%s2162_s2 + $0x60] sm:$0xff]  ;;  %v140_v4 = vld [vmem:[%s2162_s2 + $0x58] sm:$0xff]  ;;  %v139_v5 = vld [vmem:[%s2162_s2 + $0x50] sm:$0xff] }
   0x3   :  { %1023 = vmatpush3.msra.mxu0 %v144_v0  ;;  %1154 = vmatpush3.msra.mxu1 %v144_v0  ;;  %v138_v6 = vld [vmem:[%s2162_s2 + $0x48] sm:$0xff]  ;;  %v137_v7 = vld [vmem:[%s2162_s2 + $0x40] sm:$0xff]  ;;  %v136_v8 = vld [vmem:[%s2162_s2 + $0x38] sm:$0xff] }
   0x4   :  { %1024 = vmatprep.subr.mxu0 %v143_v1  ;;  %1139 = vmatprep.subr.mxu1 %v143_v1  ;;  %v135_v9 = vld [vmem:[%s2162_s2 + $0x30] sm:$0xff]  ;;  %v134_v10 = vld [vmem:[%s2162_s2 + $0x28] sm:$0xff]  ;;  %v133_v11 = vld [vmem:[%s2162_s2 + $0x20] sm:$0xff] }
   0x5   :  { %1025 = vmatpush3.msra.mxu0 %v143_v1  ;;  %1155 = vmatpush3.msra.mxu1 %v143_v1  ;;  %v132_v12 = vld [vmem:[%s2162_s2 + $0x18] sm:$0xff]  ;;  %v131_v13 = vld [vmem:[%s2162_s2 + $0x10] sm:$0xff]  ;;  %v130_v14 = vld [vmem:[%s2162_s2 + $0x8] sm:$0xff] }
   0x6   :  { %1026 = vmatprep.subr.mxu0 %v142_v2  ;;  %1140 = vmatprep.subr.mxu1 %v142_v2  ;;  %v129_v15 = vld [vmem:[%s2162_s2] sm:$0xff]  ;;  %v74_v18 = vld [vmem:[%s2163_s0 + $0x8] sm:$0xff]  ;;  %v75_v20 = vld [vmem:[%s2163_s0 + $0x10] sm:$0xff] }
   0x7   :  { %1027 = vmatpush3.msra.mxu0 %v142_v2  ;;  %1156 = vmatpush3.msra.mxu1 %v142_v2  ;;  %v73_v16 = vld [vmem:[%s2163_s0] sm:$0xff]  ;;  %v102_v19 = vld [vmem:[%s2163_s0 + $0xe8] sm:$0xff]  ;;  %v103_v21 = vld [vmem:[%s2163_s0 + $0xf0] sm:$0xff] }
   0x8   :  { %1028 = vmatprep.subr.mxu0 %v141_v3  ;;  %1141 = vmatprep.subr.mxu1 %v141_v3  ;;  %v101_v17 = vld [vmem:[%s2163_s0 + $0xe0] sm:$0xff]  ;;  %v76_v22 = vld [vmem:[%s2163_s0 + $0x18] sm:$0xff]  ;;  %v78_v26 = vld [vmem:[%s2163_s0 + $0x28] sm:$0xff] }
   0x9   :  { %1029 = vmatpush3.msra.mxu0 %v141_v3  ;;  %1157 = vmatpush3.msra.mxu1 %v141_v3  ;;  %v104_v23 = vld [vmem:[%s2163_s0 + $0xf8] sm:$0xff]  ;;  %v77_v24 = vld [vmem:[%s2163_s0 + $0x20] sm:$0xff]  ;;  %v106_v27 = vld [vmem:[%s2163_s0 + $0x108] sm:$0xff] }
   0xa   :  { %1030 = vmatprep.subr.mxu0 %v140_v4  ;;  %1142 = vmatprep.subr.mxu1 %v140_v4  ;;  %v105_v25 = vld [vmem:[%s2163_s0 + $0x100] sm:$0xff]  ;;  %v79_v28 = vld [vmem:[%s2163_s0 + $0x30] sm:$0xff]  ;;  %v80_v30 = vld [vmem:[%s2163_s0 + $0x38] sm:$0xff] }
   0xb   :  { %1031 = vmatpush3.msra.mxu0 %v140_v4  ;;  %1158 = vmatpush3.msra.mxu1 %v140_v4  ;;  %v107_v29 = vld [vmem:[%s2163_s0 + $0x110] sm:$0xff]  ;;  %v108_v31 = vld [vmem:[%s2163_s0 + $0x118] sm:$0xff]  ;;  %v81_v32 = vld [vmem:[%s2163_s0 + $0x40] sm:$0xff] }
   0xc   :  { %1032 = vmatprep.subr.mxu0 %v139_v5  ;;  %1143 = vmatprep.subr.mxu1 %v139_v5  ;;  %v109_v33 = vld [vmem:[%s2163_s0 + $0x120] sm:$0xff]  ;;  %v82_v34 = vld [vmem:[%s2163_s0 + $0x48] sm:$0xff]  ;;  %v83_v36 = vld [vmem:[%s2163_s0 + $0x50] sm:$0xff] }
   0xd   :  { %1033 = vmatpush3.msra.mxu0 %v139_v5  ;;  %1159 = vmatpush3.msra.mxu1 %v139_v5  ;;  %v110_v35 = vld [vmem:[%s2163_s0 + $0x128] sm:$0xff]  ;;  %v111_v37 = vld [vmem:[%s2163_s0 + $0x130] sm:$0xff]  ;;  %v84_v38 = vld [vmem:[%s2163_s0 + $0x58] sm:$0xff] }
   0xe   :  { %1034 = vmatprep.subr.mxu0 %v138_v6  ;;  %1144 = vmatprep.subr.mxu1 %v138_v6  ;;  %v112_v39 = vld [vmem:[%s2163_s0 + $0x138] sm:$0xff]  ;;  %v85_v40 = vld [vmem:[%s2163_s0 + $0x60] sm:$0xff]  ;;  %v86_v42 = vld [vmem:[%s2163_s0 + $0x68] sm:$0xff] }
   0xf   :  { %1035 = vmatpush3.msra.mxu0 %v138_v6  ;;  %1160 = vmatpush3.msra.mxu1 %v138_v6  ;;  %v113_v41 = vld [vmem:[%s2163_s0 + $0x140] sm:$0xff]  ;;  %v114_v43 = vld [vmem:[%s2163_s0 + $0x148] sm:$0xff]  ;;  %v87_v44 = vld [vmem:[%s2163_s0 + $0x70] sm:$0xff] }
  0x10   :  { %1036 = vmatprep.subr.mxu0 %v137_v7  ;;  %1145 = vmatprep.subr.mxu1 %v137_v7  ;;  %v115_v45 = vld [vmem:[%s2163_s0 + $0x150] sm:$0xff]  ;;  %v88_v46 = vld [vmem:[%s2163_s0 + $0x78] sm:$0xff]  ;;  %v89_v48 = vld [vmem:[%s2163_s0 + $0x80] sm:$0xff] }
  0x11   :  { %1037 = vmatpush3.msra.mxu0 %v137_v7  ;;  %1161 = vmatpush3.msra.mxu1 %v137_v7  ;;  %v116_v47 = vld [vmem:[%s2163_s0 + $0x158] sm:$0xff]  ;;  %v117_v49 = vld [vmem:[%s2163_s0 + $0x160] sm:$0xff]  ;;  %v90_v50 = vld [vmem:[%s2163_s0 + $0x88] sm:$0xff] }
  0x12   :  { %1038 = vmatprep.subr.mxu0 %v136_v8  ;;  %1146 = vmatprep.subr.mxu1 %v136_v8  ;;  %v118_v51 = vld [vmem:[%s2163_s0 + $0x168] sm:$0xff]  ;;  %v91_v52 = vld [vmem:[%s2163_s0 + $0x90] sm:$0xff]  ;;  %v92_v54 = vld [vmem:[%s2163_s0 + $0x98] sm:$0xff] }
  0x13   :  { %1039 = vmatpush3.msra.mxu0 %v136_v8  ;;  %1162 = vmatpush3.msra.mxu1 %v136_v8  ;;  %v119_v53 = vld [vmem:[%s2163_s0 + $0x170] sm:$0xff]  ;;  %v120_v55 = vld [vmem:[%s2163_s0 + $0x178] sm:$0xff]  ;;  %v93_v56 = vld [vmem:[%s2163_s0 + $0xa0] sm:$0xff] }
  0x14   :  { %1040 = vmatprep.subr.mxu0 %v135_v9  ;;  %1147 = vmatprep.subr.mxu1 %v135_v9  ;;  %v121_v57 = vld [vmem:[%s2163_s0 + $0x180] sm:$0xff]  ;;  %v94_v58 = vld [vmem:[%s2163_s0 + $0xa8] sm:$0xff]  ;;  %v95_v60 = vld [vmem:[%s2163_s0 + $0xb0] sm:$0xff] }
  0x15   :  { %1041 = vmatpush3.msra.mxu0 %v135_v9  ;;  %1163 = vmatpush3.msra.mxu1 %v135_v9  ;;  %v122_v59 = vld [vmem:[%s2163_s0 + $0x188] sm:$0xff]  ;;  %v123_v61 = vld [vmem:[%s2163_s0 + $0x190] sm:$0xff]  ;;  %v96_v62 = vld [vmem:[%s2163_s0 + $0xb8] sm:$0xff] }
  0x16   :  { %1042 = vmatprep.subr.mxu0 %v134_v10  ;;  %1148 = vmatprep.subr.mxu1 %v134_v10  ;;  %v124_v63 = vld [vmem:[%s2163_s0 + $0x198] sm:$0xff]  ;;  %v97_v0 = vld [vmem:[%s2163_s0 + $0xc0] sm:$0xff]  ;;  %v98_v2 = vld [vmem:[%s2163_s0 + $0xc8] sm:$0xff] }
  0x17   :  { %1043 = vmatpush3.msra.mxu0 %v134_v10  ;;  %1164 = vmatpush3.msra.mxu1 %v134_v10  ;;  %v125_v1 = vld [vmem:[%s2163_s0 + $0x1a0] sm:$0xff]  ;;  %v126_v3 = vld [vmem:[%s2163_s0 + $0x1a8] sm:$0xff]  ;;  %v99_v4 = vld [vmem:[%s2163_s0 + $0xd0] sm:$0xff] }
  0x18   :  { %1044 = vmatprep.subr.mxu0 %v133_v11  ;;  %1149 = vmatprep.subr.mxu1 %v133_v11  ;;  %v127_v5 = vld [vmem:[%s2163_s0 + $0x1b0] sm:$0xff]  ;;  %v100_v6 = vld [vmem:[%s2163_s0 + $0xd8] sm:$0xff]  ;;  %v18_v8 = vld [vmem:[%s2164_s1 + $0x8] sm:$0xff] }
  0x19   :  { %1045 = vmatpush3.msra.mxu0 %v133_v11  ;;  %1165 = vmatpush3.msra.mxu1 %v133_v11  ;;  %v128_v7 = vld [vmem:[%s2163_s0 + $0x1b8] sm:$0xff]  ;;  %v46_v9 = vld [vmem:[%s2164_s1 + $0xe8] sm:$0xff]  ;;  %v1533_v11 = vld [vmem:[%s2165_s3] ss:$0 sm:$0xff] }
  0x1a   :  { %1046 = vmatprep.subr.mxu0 %v132_v12  ;;  %1150 = vmatprep.subr.mxu1 %v132_v12 }
  0x1b   :  { %1047 = vmatpush3.msra.mxu0 %v132_v12  ;;  %1166 = vmatpush3.msra.mxu1 %v132_v12 }
  0x1c   :  { %1048 = vmatprep.subr.mxu0 %v131_v13  ;;  %1151 = vmatprep.subr.mxu1 %v131_v13 }
  0x1d   :  { %1049 = vmatpush3.msra.mxu0 %v131_v13  ;;  %1167 = vmatpush3.msra.mxu1 %v131_v13  ;;  %v17_v13 = vld [vmem:[%s2164_s1] sm:$0xff] }
  0x1e   :  { %1050 = vmatprep.subr.mxu0 %v130_v14  ;;  %1152 = vmatprep.subr.mxu1 %v130_v14 }
  0x1f   :  { %1051 = vmatpush3.msra.mxu0 %v130_v14  ;;  %1168 = vmatpush3.msra.mxu1 %v130_v14  ;;  %v45_v14 = vld [vmem:[%s2164_s1 + $0xe0] sm:$0xff] }
  0x20   :  { %1052 = vmatprep.subr.mxu0 %v129_v15  ;;  %1153 = vmatprep.subr.mxu1 %v129_v15 }
  0x21   :  { %1053 = vmatpush3.msra.mxu0 %v129_v15  ;;  %1169 = vmatpush3.msra.mxu1 %v129_v15 }
  0x22   :  { %1054 = vmatprep.mubr.f32.mxu0 %v73_v16  ;;  %1096 = vmatprep.mubr.f32.mxu1 %v101_v17 }
  0x23   :  { %1055 = vmatmul.mubr.f32.vlgmr.msra.gmra.mxu0 %v74_v18  ;;  %1097 = vmatmul.mubr.f32.vlgmr.msra.gmra.mxu1 %v102_v19 }
  0x24   :  { %1057 = vmatprep.mubr.f32.mxu0 %v75_v20  ;;  %1099 = vmatprep.mubr.f32.mxu1 %v103_v21 }
  0x27   :  { %1058 = vmatmul.mubr.f32.gmra.mxu0 %v76_v22  ;;  %1100 = vmatmul.mubr.f32.gmra.mxu1 %v104_v23  ;;  %v20_v23 = vld [vmem:[%s2164_s1 + $0x18] sm:$0xff] }
  0x28   :  { %1060 = vmatprep.mubr.f32.mxu0 %v77_v24  ;;  %1102 = vmatprep.mubr.f32.mxu1 %v105_v25  ;;  %v48_v24 = vld [vmem:[%s2164_s1 + $0xf8] sm:$0xff] }
  0x2b   :  { %1061 = vmatmul.mubr.f32.gmra.mxu0 %v78_v26  ;;  %1103 = vmatmul.mubr.f32.gmra.mxu1 %v106_v27  ;;  %v19_v27 = vld [vmem:[%s2164_s1 + $0x10] sm:$0xff] }
  0x2c   :  { %1063 = vmatprep.mubr.f32.mxu0 %v79_v28  ;;  %1105 = vmatprep.mubr.f32.mxu1 %v107_v29  ;;  %v47_v28 = vld [vmem:[%s2164_s1 + $0xf0] sm:$0xff] }
  0x2f   :  { %1064 = vmatmul.mubr.f32.gmra.mxu0 %v80_v30  ;;  %1106 = vmatmul.mubr.f32.gmra.mxu1 %v108_v31 }
  0x30   :  { %1066 = vmatprep.mubr.f32.mxu0 %v81_v32  ;;  %1108 = vmatprep.mubr.f32.mxu1 %v109_v33 }
  0x33   :  { %1067 = vmatmul.mubr.f32.gmra.mxu0 %v82_v34  ;;  %1109 = vmatmul.mubr.f32.gmra.mxu1 %v110_v35 }
  0x34   :  { %1069 = vmatprep.mubr.f32.mxu0 %v83_v36  ;;  %1111 = vmatprep.mubr.f32.mxu1 %v111_v37 }
  0x37   :  { %1070 = vmatmul.mubr.f32.gmra.mxu0 %v84_v38  ;;  %1112 = vmatmul.mubr.f32.gmra.mxu1 %v112_v39  ;;  %v22_v39 = vld [vmem:[%s2164_s1 + $0x28] sm:$0xff] }
  0x38   :  { %1072 = vmatprep.mubr.f32.mxu0 %v85_v40  ;;  %1114 = vmatprep.mubr.f32.mxu1 %v113_v41  ;;  %v50_v40 = vld [vmem:[%s2164_s1 + $0x108] sm:$0xff] }
  0x3b   :  { %1073 = vmatmul.mubr.f32.gmra.mxu0 %v86_v42  ;;  %1115 = vmatmul.mubr.f32.gmra.mxu1 %v114_v43 }
  0x3c   :  { %1075 = vmatprep.mubr.f32.mxu0 %v87_v44  ;;  %1117 = vmatprep.mubr.f32.mxu1 %v115_v45 }
  0x3f   :  { %1076 = vmatmul.mubr.f32.gmra.mxu0 %v88_v46  ;;  %1118 = vmatmul.mubr.f32.gmra.mxu1 %v116_v47 }
  0x40   :  { %1078 = vmatprep.mubr.f32.mxu0 %v89_v48  ;;  %1120 = vmatprep.mubr.f32.mxu1 %v117_v49 }
  0x43   :  { %1079 = vmatmul.mubr.f32.gmra.mxu0 %v90_v50  ;;  %1121 = vmatmul.mubr.f32.gmra.mxu1 %v118_v51 }
  0x44   :  { %1081 = vmatprep.mubr.f32.mxu0 %v91_v52  ;;  %1123 = vmatprep.mubr.f32.mxu1 %v119_v53 }
  0x47   :  { %1082 = vmatmul.mubr.f32.gmra.mxu0 %v92_v54  ;;  %1124 = vmatmul.mubr.f32.gmra.mxu1 %v120_v55  ;;  %v21_v54 = vld [vmem:[%s2164_s1 + $0x20] sm:$0xff] }
  0x48   :  { %1084 = vmatprep.mubr.f32.mxu0 %v93_v56  ;;  %1126 = vmatprep.mubr.f32.mxu1 %v121_v57  ;;  %v49_v55 = vld [vmem:[%s2164_s1 + $0x100] sm:$0xff]  ;;  %v24_v56 = vld [vmem:[%s2164_s1 + $0x38] sm:$0xff] }
  0x4b   :  { %1085 = vmatmul.mubr.f32.gmra.mxu0 %v94_v58  ;;  %1127 = vmatmul.mubr.f32.gmra.mxu1 %v122_v59 }
  0x4c   :  { %1087 = vmatprep.mubr.f32.mxu0 %v95_v60  ;;  %1129 = vmatprep.mubr.f32.mxu1 %v123_v61 }
  0x4f   :  { %1088 = vmatmul.mubr.f32.gmra.mxu0 %v96_v62  ;;  %1130 = vmatmul.mubr.f32.gmra.mxu1 %v124_v63 }
  0x50   :  { %1090 = vmatprep.mubr.f32.mxu0 %v97_v0  ;;  %1132 = vmatprep.mubr.f32.mxu1 %v125_v1 }
  0x53   :  { %1091 = vmatmul.mubr.f32.gmra.mxu0 %v98_v2  ;;  %1133 = vmatmul.mubr.f32.gmra.mxu1 %v126_v3 }
  0x54   :  { %1093 = vmatprep.mubr.f32.mxu0 %v99_v4  ;;  %1135 = vmatprep.mubr.f32.mxu1 %v127_v5  ;;  %v52_v4 = vld [vmem:[%s2164_s1 + $0x118] sm:$0xff]  ;;  %v23_v5 = vld [vmem:[%s2164_s1 + $0x30] sm:$0xff] }
  0x57   :  { %1094 = vmatmul.mubr.f32.gmra.mxu0 %v100_v6  ;;  %1136 = vmatmul.mubr.f32.gmra.mxu1 %v128_v7 }
  0xe3   :  { %v1056_v10 = vpop.f32.mrf.mxu0  ;;  %v1098_v12 = vpop.f32.mrf.mxu1 }
  0xe4   :  { %v491_v15 = vadd.f32 %v1056_v10, %v18_v8  ;;  %v519_v16 = vadd.f32 %v1098_v12, %v46_v9 }
  0xe5   :  { %v211_v17 = vpop.f32.mrf.mxu0  ;;  %v351_v18 = vpop.f32.mrf.mxu1 }
  0xe6   :  { %v554_v19 = vadd.f32 %v1533_v11, %v491_v15  ;;  %v582_v20 = vadd.f32 %v1533_v11, %v519_v16  ;;  %v490_v21 = vadd.f32 %v211_v17, %v17_v13  ;;  %v518_v22 = vadd.f32 %v351_v18, %v45_v14 }
  0xe7   :  { %v1059_v25 = vpop.f32.mrf.mxu0  ;;  %v1101_v26 = vpop.f32.mrf.mxu1 }
  0xe8   :  { %v666_v29 = vmul.f32 0.70710677, %v554_v19  ;;  %v694_v30 = vmul.f32 0.70710677, %v582_v20  ;;  %v553_v31 = vadd.f32 %v1533_v11, %v490_v21  ;;  %v581_v32 = vadd.f32 %v1533_v11, %v518_v22  ;;  %v26_v21 = vld [vmem:[%s2164_s1 + $0x48] sm:$0xff] }
  0xe9   :  { %v493_v33 = vadd.f32 %v1059_v25, %v20_v23  ;;  %v521_v34 = vadd.f32 %v1101_v26, %v48_v24  ;;  %v221_v35 = vpop.f32.mrf.mxu0  ;;  %v361_v36 = vpop.f32.mrf.mxu1  ;;  %v1580_v57 = vmul.f32 0.5, %v554_v19  ;;  %v638_v8 = vmul.f32 0.5, %v582_v20  ;;  %v51_v20 = vld [vmem:[%s2164_s1 + $0x110] sm:$0xff] }
  0xea   :  { %1170 = verf.f32 %v666_v29  ;;  %v492_v37 = vadd.f32 %v221_v35, %v19_v27  ;;  %v520_v38 = vadd.f32 %v361_v36, %v47_v28  ;;  %v665_v41 = vmul.f32 0.70710677, %v553_v31 }
  0xeb   :  { %1172 = verf.f32 %v694_v30  ;;  %v1062_v42 = vpop.f32.mrf.mxu0  ;;  %v1104_v43 = vpop.f32.mrf.mxu1  ;;  %v693_v44 = vmul.f32 0.70710677, %v581_v32  ;;  %v556_v45 = vadd.f32 %v1533_v11, %v493_v33  ;;  %v584_v46 = vadd.f32 %v1533_v11, %v521_v34 }
  0xec   :  { %v1566_v47 = vadd.f32 %v1533_v11, %v492_v37  ;;  %1174 = verf.f32 %v665_v41  ;;  %v1569_v48 = vadd.f32 %v1533_v11, %v520_v38  ;;  %v495_v49 = vadd.f32 %v1062_v42, %v22_v39  ;;  %v54_v41 = vld [vmem:[%s2164_s1 + $0x128] sm:$0xff] }
  0xed   :  { %v523_v50 = vadd.f32 %v1104_v43, %v50_v40  ;;  %v231_v51 = vpop.f32.mrf.mxu0  ;;  %v371_v52 = vpop.f32.mrf.mxu1  ;;  %1176 = verf.f32 %v693_v44  ;;  %v668_v53 = vmul.f32 0.70710677, %v556_v45  ;;  %v696_v58 = vmul.f32 0.70710677, %v584_v46 }
  0xee   :  { %v667_v59 = vmul.f32 0.70710677, %v1566_v47  ;;  %v695_v62 = vmul.f32 0.70710677, %v1569_v48  ;;  %v1585_v63 = vadd.f32 %v1533_v11, %v495_v49  ;;  %v494_v1 = vadd.f32 %v231_v51, %v21_v54 }
  0xef   :  { %v1065_v60 = vpop.f32.mrf.mxu0  ;;  %v1107_v61 = vpop.f32.mrf.mxu1  ;;  %1178 = verf.f32 %v668_v53  ;;  %v1588_v0 = vadd.f32 %v1533_v11, %v523_v50  ;;  %v522_v2 = vadd.f32 %v371_v52, %v49_v55  ;;  %v1596_v9 = vmul.f32 0.5, %v553_v31  ;;  %v53_v55 = vld [vmem:[%s2164_s1 + $0x120] sm:$0xff] }
  0xf0   :  { %1180 = verf.f32 %v696_v58  ;;  %v497_v3 = vadd.f32 %v1065_v60, %v24_v56  ;;  %v670_v10 = vmul.f32 0.70710677, %v1585_v63  ;;  %v1601_v13 = vadd.f32 %v1533_v11, %v494_v1 }
  0xf1   :  { %v241_v6 = vpop.f32.mrf.mxu0  ;;  %v381_v7 = vpop.f32.mrf.mxu1  ;;  %1182 = verf.f32 %v667_v59  ;;  %v698_v12 = vmul.f32 0.70710677, %v1588_v0  ;;  %v1604_v14 = vadd.f32 %v1533_v11, %v522_v2  ;;  %v525_v18 = vadd.f32 %v1107_v61, %v52_v4 }
  0xf2   :  { %1184 = verf.f32 %v695_v62  ;;  %v1607_v17 = vadd.f32 %v1533_v11, %v497_v3  ;;  %v496_v19 = vadd.f32 %v241_v6, %v23_v5  ;;  %v637_v22 = vmul.f32 0.5, %v581_v32 }
  0xf3   :  { %v1068_v15 = vpop.f32.mrf.mxu0  ;;  %v1110_v16 = vpop.f32.mrf.mxu1  ;;  %1186 = verf.f32 %v670_v10  ;;  %v1615_v23 = vmul.f32 0.5, %v556_v45  ;;  %v669_v24 = vmul.f32 0.70710677, %v1601_v13  ;;  %v1618_v27 = vmul.f32 0.5, %v584_v46 }
  0xf4   :  { %1188 = verf.f32 %v698_v12  ;;  %v697_v28 = vmul.f32 0.70710677, %v1604_v14  ;;  %v672_v29 = vmul.f32 0.70710677, %v1607_v17  ;;  %v1623_v30 = vadd.f32 %v1533_v11, %v525_v18 }
  0xf5   :  { %v251_v25 = vpop.f32.mrf.mxu0  ;;  %v391_v26 = vpop.f32.mrf.mxu1  ;;  %1190 = verf.f32 %v669_v24  ;;  %v1626_v32 = vadd.f32 %v1533_v11, %v496_v19  ;;  %v524_v33 = vadd.f32 %v381_v7, %v51_v20  ;;  %v499_v34 = vadd.f32 %v1068_v15, %v26_v21 }
  0xf6   :  { %v1633_v39 = vmul.f32 0.5, %v1566_v47  ;;  %1192 = verf.f32 %v697_v28  ;;  %v700_v40 = vmul.f32 0.70710677, %v1623_v30  ;;  %v1640_v43 = vmul.f32 0.5, %v1569_v48  ;;  %v25_v48 = vld [vmem:[%s2164_s1 + $0x40] sm:$0xff] }
  0xf7   :  { %v1171_v31 = vpop.eup %1170  ;;  %v1628_v35 = vpop.f32.mrf.mxu0  ;;  %1194 = verf.f32 %v672_v29  ;;  %v671_v44 = vmul.f32 0.70710677, %v1626_v32  ;;  %v1647_v49 = vadd.f32 %v1533_v11, %v524_v33  ;;  %v1650_v50 = vadd.f32 %v1533_v11, %v499_v34 }
  0xf8   :  { %v1630_v36 = vpop.f32.mrf.mxu1  ;;  %v1173_v37 = vpop.eup %1172  ;;  %v778_v38 = vadd.f32 1.0, %v1171_v31  ;;  %1196 = verf.f32 %v700_v40  ;;  %v527_v54 = vadd.f32 %v1110_v16, %v54_v41  ;;  %v614_v58 = vmul.f32 0.5, %v1585_v63 }
  0xf9   :  { %v806_v42 = vadd.f32 1.0, %v1173_v37  ;;  %v1643_v45 = vpop.f32.mrf.mxu0  ;;  %v1175_v46 = vpop.eup %1174  ;;  %1198 = verf.f32 %v671_v44  ;;  %v642_v59 = vmul.f32 0.5, %v1588_v0  ;;  %v699_v60 = vmul.f32 0.70710677, %v1647_v49 }
  0xfa   :  { %v834_v47 = vmul.f32 %v778_v38, %v1580_v57  ;;  %v1177_v51 = vpop.eup %1176  ;;  %v777_v53 = vadd.f32 1.0, %v1175_v46  ;;  %v1658_v56 = vpop.f32.mrf.mxu1  ;;  %v674_v2 = vmul.f32 0.70710677, %v1650_v50  ;;  %v1674_v3 = vadd.f32 %v1533_v11, %v527_v54 }
  0xfb   :  { %v862_v52 = vmul.f32 %v806_v42, %v638_v8  ;;  %v805_v57 = vadd.f32 1.0, %v1177_v51  ;;  %v1666_v61 = vpop.f32.mrf.mxu0  ;;  %v498_v4 = vadd.f32 %v251_v25, %v25_v48  ;;  %1200 = verf.f32 %v699_v60 }
  0xfc   :  { %890 = vst [vmem:[%s2166_s4 + $0x8] sm:$0xff] %v834_v47  ;;  %v1179_v62 = vpop.eup %1178  ;;  %v833_v1 = vmul.f32 %v777_v53, %v1596_v9  ;;  %v526_v6 = vadd.f32 %v391_v26, %v53_v55  ;;  %v613_v10 = vmul.f32 0.5, %v1601_v13  ;;  %1202 = verf.f32 %v674_v2  ;;  %v1684_v15 = vpop.f32.mrf.mxu1 }
  0xfd   :  { %918 = vst [vmem:[%s2166_s4 + $0xe8] sm:$0xff] %v862_v52  ;;  %v1181_v63 = vpop.eup %1180  ;;  %v861_v5 = vmul.f32 %v805_v57, %v637_v22  ;;  %v780_v0 = vadd.f32 1.0, %v1179_v62  ;;  %v702_v12 = vmul.f32 0.70710677, %v1674_v3  ;;  %v1691_v20 = vadd.f32 %v1533_v11, %v498_v4  ;;  %v1696_v13 = vpop.f32.mrf.mxu0 }
  0xfe   :  { %v1183_v8 = vpop.eup %1182  ;;  %v808_v9 = vadd.f32 1.0, %v1181_v63  ;;  %v1694_v21 = vadd.f32 %v1533_v11, %v526_v6  ;;  %v641_v33 = vmul.f32 0.5, %v1604_v14  ;;  %v616_v38 = vmul.f32 0.5, %v1607_v17  ;;  %v1718_v40 = vpop.f32.mrf.mxu1 }
  0xff   :  { %v1185_v16 = vpop.eup %1184  ;;  %v836_v18 = vmul.f32 %v780_v0, %v1615_v23  ;;  %v779_v19 = vadd.f32 1.0, %v1183_v8  ;;  %1204 = verf.f32 %v702_v12  ;;  %v644_v53 = vmul.f32 0.5, %v1623_v30 }
 0x100   :  { %v1187_v22 = vpop.eup %1186  ;;  %v864_v24 = vmul.f32 %v808_v9, %v1618_v27  ;;  %v807_v25 = vadd.f32 1.0, %v1185_v16  ;;  %v673_v27 = vmul.f32 0.70710677, %v1691_v20  ;;  %v1754_v62 = vpop.f32.mrf.mxu1  ;;  %v615_v63 = vmul.f32 0.5, %v1626_v32 }
 0x101   :  { %v1189_v28 = vpop.eup %1188  ;;  %v835_v29 = vmul.f32 %v779_v19, %v1633_v39  ;;  %v782_v31 = vadd.f32 1.0, %v1187_v22  ;;  %v701_v39 = vmul.f32 0.70710677, %v1694_v21  ;;  %v643_v8 = vmul.f32 0.5, %v1647_v49 }
 0x102   :  { %v810_v37 = vadd.f32 1.0, %v1189_v28  ;;  %v1191_v14 = vpop.eup %1190  ;;  %1206 = verf.f32 %v673_v27  ;;  %v618_v28 = vmul.f32 0.5, %v1650_v50 }
 0x103   :  { %v838_v41 = vmul.f32 %v782_v31, %v614_v58  ;;  %v1193_v46 = vpop.eup %1192  ;;  %v781_v48 = vadd.f32 1.0, %v1191_v14  ;;  %1208 = verf.f32 %v701_v39  ;;  %v646_v39 = vmul.f32 0.5, %v1674_v3 }
 0x104   :  { %v28_v7 = vld [vmem:[%s2164_s1 + $0x58] sm:$0xff]  ;;  %v866_v47 = vmul.f32 %v810_v37, %v642_v59  ;;  %v1195_v52 = vpop.eup %1194 }
 0x105   :  { %889 = vst [vmem:[%s2166_s4] sm:$0xff] %v833_v1  ;;  %917 = vst [vmem:[%s2166_s4 + $0xe0] sm:$0xff] %v861_v5  ;;  %v501_v26 = vadd.f32 %v1628_v35, %v28_v7  ;;  %v863_v35 = vmul.f32 %v807_v25, %v1640_v43  ;;  %v1730_v43 = vpop.f32.mrf.mxu0  ;;  %v1197_v57 = vpop.eup %1196  ;;  %v837_v58 = vmul.f32 %v781_v48, %v613_v10 }
 0x106   :  { %v1199_v1 = vpop.eup %1198  ;;  %v812_v4 = vadd.f32 1.0, %v1197_v57 }
 0x107   :  { %v1724_v42 = vadd.f32 %v1533_v11, %v501_v26  ;;  %v281_v0 = vpop.f32.mrf.mxu0  ;;  %v783_v7 = vadd.f32 1.0, %v1199_v1 }
 0x108   :  { %v868_v9 = vmul.f32 %v812_v4, %v644_v53 }
 0x109   :  { %v676_v54 = vmul.f32 0.70710677, %v1724_v42  ;;  %v839_v49 = vmul.f32 %v783_v7, %v615_v63  ;;  %v620_v4 = vmul.f32 0.5, %v1724_v42 }
 0x10b   :  { %1210 = verf.f32 %v676_v54 }
 0x10c   :  { %v56_v23 = vld [vmem:[%s2164_s1 + $0x138] sm:$0xff] }
 0x10d   :  { %892 = vst [vmem:[%s2166_s4 + $0x18] sm:$0xff] %v836_v18  ;;  %v529_v44 = vadd.f32 %v1630_v36, %v56_v23  ;;  %v809_v36 = vadd.f32 1.0, %v1193_v46  ;;  %v1201_v18 = vpop.eup %1200 }
 0x10e   :  { %v1203_v26 = vpop.eup %1202  ;;  %v811_v23 = vadd.f32 1.0, %v1201_v18 }
 0x10f   :  { %v1742_v55 = vadd.f32 %v1533_v11, %v529_v44  ;;  %v865_v2 = vmul.f32 %v809_v36, %v641_v33  ;;  %v1205_v50 = vpop.eup %1204 }
 0x110   :  { %v814_v14 = vadd.f32 1.0, %v1205_v50  ;;  %v1207_v48 = vpop.eup %1206 }
 0x111   :  { %v704_v32 = vmul.f32 0.70710677, %v1742_v55  ;;  %v1209_v53 = vpop.eup %1208 }
 0x113   :  { %1212 = verf.f32 %v704_v32 }
 0x114   :  { %v27_v34 = vld [vmem:[%s2164_s1 + $0x50] sm:$0xff] }
 0x115   :  { %920 = vst [vmem:[%s2166_s4 + $0xf8] sm:$0xff] %v864_v24  ;;  %891 = vst [vmem:[%s2166_s4 + $0x10] sm:$0xff] %v835_v29  ;;  %v500_v51 = vadd.f32 %v1643_v45, %v27_v34  ;;  %v784_v45 = vadd.f32 1.0, %v1195_v52  ;;  %v786_v29 = vadd.f32 1.0, %v1203_v26  ;;  %v867_v34 = vmul.f32 %v811_v23, %v643_v8 }
 0x117   :  { %v1748_v59 = vadd.f32 %v1533_v11, %v500_v51  ;;  %v840_v6 = vmul.f32 %v784_v45, %v616_v38  ;;  %v842_v38 = vmul.f32 %v786_v29, %v618_v28  ;;  %v870_v51 = vmul.f32 %v814_v14, %v646_v39 }
 0x118   :  { %v645_v45 = vmul.f32 0.5, %v1694_v21 }
 0x119   :  { %v675_v10 = vmul.f32 0.70710677, %v1748_v59 }
 0x11b   :  { %1214 = verf.f32 %v675_v10 }
 0x11c   :  { %v55_v17 = vld [vmem:[%s2164_s1 + $0x130] sm:$0xff] }
 0x11d   :  { %919 = vst [vmem:[%s2166_s4 + $0xf0] sm:$0xff] %v863_v35  ;;  %894 = vst [vmem:[%s2166_s4 + $0x28] sm:$0xff] %v838_v41  ;;  %v528_v60 = vadd.f32 %v1658_v56, %v55_v17 }
 0x11e   :  { %922 = vst [vmem:[%s2166_s4 + $0x108] sm:$0xff] %v866_v47 }
 0x11f   :  { %v1773_v12 = vadd.f32 %v1533_v11, %v528_v60  ;;  %v813_v60 = vadd.f32 1.0, %v1209_v53 }
 0x121   :  { %v869_v21 = vmul.f32 %v813_v60, %v645_v45  ;;  %v647_v29 = vmul.f32 0.5, %v1773_v12 }
 0x125   :  { %v30_v30 = vld [vmem:[%s2164_s1 + $0x68] sm:$0xff]  ;;  %v29_v56 = vld [vmem:[%s2164_s1 + $0x60] sm:$0xff] }
 0x126   :  { %v58_v5 = vld [vmem:[%s2164_s1 + $0x148] sm:$0xff]  ;;  %v503_v16 = vadd.f32 %v1666_v61, %v30_v30  ;;  %v502_v22 = vadd.f32 %v1696_v13, %v29_v56  ;;  %v421_v61 = vpop.f32.mrf.mxu1  ;;  %v1792_v13 = vpop.f32.mrf.mxu0 }
 0x127   :  { %893 = vst [vmem:[%s2166_s4 + $0x20] sm:$0xff] %v837_v58  ;;  %921 = vst [vmem:[%s2166_s4 + $0x100] sm:$0xff] %v865_v2  ;;  %v531_v19 = vadd.f32 %v1684_v15, %v58_v5  ;;  %v703_v15 = vmul.f32 0.70710677, %v1773_v12 }
 0x128   :  { %896 = vst [vmem:[%s2166_s4 + $0x38] sm:$0xff] %v840_v6  ;;  %v1798_v31 = vadd.f32 %v1533_v11, %v503_v16  ;;  %v1804_v27 = vadd.f32 %v1533_v11, %v502_v22  ;;  %v1122_v46 = vpop.f32.mrf.mxu1  ;;  %v291_v47 = vpop.f32.mrf.mxu0  ;;  %v619_v16 = vmul.f32 0.5, %v1748_v59 }
 0x129   :  { %v1801_v33 = vadd.f32 %v1533_v11, %v531_v19  ;;  %1216 = verf.f32 %v703_v15 }
 0x12a   :  { %v678_v41 = vmul.f32 0.70710677, %v1798_v31  ;;  %v431_v1 = vpop.f32.mrf.mxu1  ;;  %v1083_v56 = vpop.f32.mrf.mxu0 }
 0x12b   :  { %v706_v3 = vmul.f32 0.70710677, %v1801_v33 }
 0x12c   :  { %1218 = verf.f32 %v678_v41  ;;  %v1125_v22 = vpop.f32.mrf.mxu1  ;;  %v301_v23 = vpop.f32.mrf.mxu0 }
 0x12d   :  { %1220 = verf.f32 %v706_v3 }
 0x12e   :  { %v441_v41 = vpop.f32.mrf.mxu1 }
 0x12f   :  { %v57_v24 = vld [vmem:[%s2164_s1 + $0x140] sm:$0xff]  ;;  %v32_v25 = vld [vmem:[%s2164_s1 + $0x78] sm:$0xff] }
 0x130   :  { %924 = vst [vmem:[%s2166_s4 + $0x118] sm:$0xff] %v868_v9  ;;  %895 = vst [vmem:[%s2166_s4 + $0x30] sm:$0xff] %v839_v49  ;;  %v530_v35 = vadd.f32 %v1718_v40, %v57_v24  ;;  %v505_v37 = vadd.f32 %v1730_v43, %v32_v25  ;;  %v617_v40 = vmul.f32 0.5, %v1691_v20  ;;  %v677_v43 = vmul.f32 0.70710677, %v1804_v27 }
 0x131   :  { %v785_v20 = vadd.f32 1.0, %v1207_v48  ;;  %v648_v9 = vmul.f32 0.5, %v1742_v55  ;;  %v650_v48 = vmul.f32 0.5, %v1801_v33 }
 0x132   :  { %v1826_v52 = vadd.f32 %v1533_v11, %v530_v35  ;;  %v1829_v36 = vadd.f32 %v1533_v11, %v505_v37  ;;  %1222 = verf.f32 %v677_v43 }
 0x133   :  { %v841_v2 = vmul.f32 %v785_v20, %v617_v40 }
 0x134   :  { %v705_v30 = vmul.f32 0.70710677, %v1826_v52 }
 0x136   :  { %1224 = verf.f32 %v705_v30  ;;  %v1128_v30 = vpop.f32.mrf.mxu1 }
 0x137   :  { %v60_v44 = vld [vmem:[%s2164_s1 + $0x158] sm:$0xff]  ;;  %v31_v17 = vld [vmem:[%s2164_s1 + $0x70] sm:$0xff] }
 0x138   :  { %923 = vst [vmem:[%s2166_s4 + $0x110] sm:$0xff] %v867_v34  ;;  %898 = vst [vmem:[%s2166_s4 + $0x48] sm:$0xff] %v842_v38  ;;  %v533_v54 = vadd.f32 %v1754_v62, %v60_v44  ;;  %v504_v57 = vadd.f32 %v281_v0, %v31_v17  ;;  %v680_v62 = vmul.f32 0.70710677, %v1829_v36  ;;  %v1211_v0 = vpop.eup %1210 }
 0x139   :  { %v788_v32 = vadd.f32 1.0, %v1211_v0  ;;  %v1213_v24 = vpop.eup %1212 }
 0x13a   :  { %v1843_v63 = vadd.f32 %v1533_v11, %v533_v54  ;;  %v1849_v6 = vadd.f32 %v1533_v11, %v504_v57  ;;  %1226 = verf.f32 %v680_v62  ;;  %v1215_v28 = vpop.eup %1214  ;;  %v816_v15 = vadd.f32 1.0, %v1213_v24  ;;  %v451_v24 = vpop.f32.mrf.mxu1 }
 0x13b   :  { %v844_v25 = vmul.f32 %v788_v32, %v620_v4  ;;  %v787_v50 = vadd.f32 1.0, %v1215_v28  ;;  %v1217_v38 = vpop.eup %1216  ;;  %v649_v4 = vmul.f32 0.5, %v1826_v52 }
 0x13c   :  { %v708_v10 = vmul.f32 0.70710677, %v1843_v63  ;;  %v679_v18 = vmul.f32 0.70710677, %v1849_v6  ;;  %v872_v39 = vmul.f32 %v816_v15, %v648_v9  ;;  %v815_v17 = vadd.f32 1.0, %v1217_v38  ;;  %v1219_v20 = vpop.eup %1218 }
 0x13d   :  { %v843_v44 = vmul.f32 %v787_v50, %v619_v16  ;;  %v1221_v33 = vpop.eup %1220  ;;  %v790_v45 = vadd.f32 1.0, %v1219_v20 }
 0x13e   :  { %1228 = verf.f32 %v708_v10  ;;  %v871_v54 = vmul.f32 %v815_v17, %v647_v29  ;;  %v1131_v17 = vpop.f32.mrf.mxu1 }
 0x13f   :  { %v59_v58 = vld [vmem:[%s2164_s1 + $0x150] sm:$0xff]  ;;  %1230 = verf.f32 %v679_v18 }
 0x140   :  { %926 = vst [vmem:[%s2166_s4 + $0x128] sm:$0xff] %v870_v51  ;;  %v532_v7 = vadd.f32 %v421_v61, %v59_v58  ;;  %v621_v51 = vmul.f32 0.5, %v1804_v27 }
 0x142   :  { %v1868_v49 = vadd.f32 %v1533_v11, %v532_v7  ;;  %v624_v7 = vmul.f32 0.5, %v1829_v36 }
 0x147   :  { %v34_v5 = vld [vmem:[%s2164_s1 + $0x88] sm:$0xff]  ;;  %v33_v8 = vld [vmem:[%s2164_s1 + $0x80] sm:$0xff] }
 0x148   :  { %v62_v42 = vld [vmem:[%s2164_s1 + $0x168] sm:$0xff]  ;;  %v507_v19 = vadd.f32 %v1792_v13, %v34_v5  ;;  %v506_v61 = vadd.f32 %v291_v47, %v33_v8  ;;  %v707_v13 = vmul.f32 0.70710677, %v1868_v49  ;;  %v1086_v47 = vpop.f32.mrf.mxu0 }
 0x149   :  { %897 = vst [vmem:[%s2166_s4 + $0x40] sm:$0xff] %v841_v2  ;;  %925 = vst [vmem:[%s2166_s4 + $0x120] sm:$0xff] %v869_v21  ;;  %v535_v55 = vadd.f32 %v1122_v46, %v62_v42  ;;  %v622_v46 = vmul.f32 0.5, %v1798_v31  ;;  %v818_v2 = vadd.f32 1.0, %v1221_v33 }
 0x14a   :  { %v1883_v34 = vadd.f32 %v1533_v11, %v507_v19  ;;  %v1889_v37 = vadd.f32 %v1533_v11, %v506_v61  ;;  %1232 = verf.f32 %v707_v13  ;;  %v623_v61 = vmul.f32 0.5, %v1849_v6 }
 0x14b   :  { %v1886_v35 = vadd.f32 %v1533_v11, %v535_v55  ;;  %v846_v0 = vmul.f32 %v790_v45, %v622_v46  ;;  %v874_v32 = vmul.f32 %v818_v2, %v650_v48  ;;  %v652_v55 = vmul.f32 0.5, %v1843_v63 }
 0x14c   :  { %v682_v40 = vmul.f32 0.70710677, %v1883_v34  ;;  %v681_v53 = vmul.f32 0.70710677, %v1889_v37  ;;  %v626_v33 = vmul.f32 0.5, %v1883_v34  ;;  %v461_v34 = vpop.f32.mrf.mxu1 }
 0x14d   :  { %v710_v31 = vmul.f32 0.70710677, %v1886_v35  ;;  %v654_v45 = vmul.f32 0.5, %v1886_v35 }
 0x14e   :  { %1234 = verf.f32 %v682_v40 }
 0x14f   :  { %1236 = verf.f32 %v710_v31 }
 0x150   :  { %v61_v26 = vld [vmem:[%s2164_s1 + $0x160] sm:$0xff]  ;;  %v36_v59 = vld [vmem:[%s2164_s1 + $0x98] sm:$0xff]  ;;  %1238 = verf.f32 %v681_v53 }
 0x151   :  { %900 = vst [vmem:[%s2166_s4 + $0x58] sm:$0xff] %v844_v25  ;;  %v534_v12 = vadd.f32 %v431_v1, %v61_v26  ;;  %v509_v14 = vadd.f32 %v1083_v56, %v36_v59  ;;  %v1223_v1 = vpop.eup %1222  ;;  %v311_v56 = vpop.f32.mrf.mxu0 }
 0x152   :  { %v789_v21 = vadd.f32 1.0, %v1223_v1  ;;  %v1225_v8 = vpop.eup %1224 }
 0x153   :  { %v1910_v57 = vadd.f32 %v1533_v11, %v534_v12  ;;  %v1913_v58 = vadd.f32 %v1533_v11, %v509_v14  ;;  %v1227_v16 = vpop.eup %1226  ;;  %v817_v18 = vadd.f32 1.0, %v1225_v8  ;;  %v1089_v59 = vpop.f32.mrf.mxu0  ;;  %v625_v8 = vmul.f32 0.5, %v1889_v37 }
 0x154   :  { %v845_v36 = vmul.f32 %v789_v21, %v621_v51  ;;  %v792_v25 = vadd.f32 1.0, %v1227_v16 }
 0x155   :  { %v709_v62 = vmul.f32 0.70710677, %v1910_v57  ;;  %v684_v42 = vmul.f32 0.70710677, %v1913_v58  ;;  %v873_v28 = vmul.f32 %v817_v18, %v649_v4  ;;  %v321_v48 = vpop.f32.mrf.mxu0 }
 0x156   :  { %v848_v50 = vmul.f32 %v792_v25, %v624_v7 }
 0x157   :  { %1240 = verf.f32 %v709_v62  ;;  %v1092_v21 = vpop.f32.mrf.mxu0 }
 0x158   :  { %v64_v3 = vld [vmem:[%s2164_s1 + $0x178] sm:$0xff]  ;;  %v35_v43 = vld [vmem:[%s2164_s1 + $0x90] sm:$0xff]  ;;  %1242 = verf.f32 %v684_v42 }
 0x159   :  { %928 = vst [vmem:[%s2166_s4 + $0x138] sm:$0xff] %v872_v39  ;;  %899 = vst [vmem:[%s2166_s4 + $0x50] sm:$0xff] %v843_v44  ;;  %v537_v27 = vadd.f32 %v1125_v22, %v64_v3  ;;  %v508_v60 = vadd.f32 %v301_v23, %v35_v43  ;;  %v1229_v23 = vpop.eup %1228 }
 0x15a   :  { %927 = vst [vmem:[%s2166_s4 + $0x130] sm:$0xff] %v871_v54  ;;  %v1231_v6 = vpop.eup %1230  ;;  %v820_v38 = vadd.f32 1.0, %v1229_v23 }
 0x15b   :  { %v1926_v9 = vadd.f32 %v1533_v11, %v537_v27  ;;  %v1929_v52 = vadd.f32 %v1533_v11, %v508_v60  ;;  %v791_v14 = vadd.f32 1.0, %v1231_v6  ;;  %v1233_v46 = vpop.eup %1232 }
 0x15c   :  { %v876_v40 = vmul.f32 %v820_v38, %v652_v55  ;;  %v819_v31 = vadd.f32 1.0, %v1233_v46  ;;  %v1134_v55 = vpop.f32.mrf.mxu1 }
 0x15d   :  { %v712_v26 = vmul.f32 0.70710677, %v1926_v9  ;;  %v683_v15 = vmul.f32 0.70710677, %v1929_v52  ;;  %v847_v51 = vmul.f32 %v791_v14, %v623_v61  ;;  %v656_v6 = vmul.f32 0.5, %v1926_v9 }
 0x15f   :  { %1244 = verf.f32 %v712_v26 }
 0x160   :  { %1246 = verf.f32 %v683_v15  ;;  %v331_v15 = vpop.f32.mrf.mxu0 }
 0x161   :  { %v63_v5 = vld [vmem:[%s2164_s1 + $0x170] sm:$0xff]  ;;  %v38_v10 = vld [vmem:[%s2164_s1 + $0xa8] sm:$0xff] }
 0x162   :  { %902 = vst [vmem:[%s2166_s4 + $0x68] sm:$0xff] %v846_v0  ;;  %v536_v19 = vadd.f32 %v441_v41, %v63_v5  ;;  %v511_v13 = vadd.f32 %v1086_v47, %v38_v10  ;;  %v651_v41 = vmul.f32 0.5, %v1868_v49 }
 0x164   :  { %v1951_v29 = vadd.f32 %v1533_v11, %v536_v19  ;;  %v1968_v3 = vadd.f32 %v1533_v11, %v511_v13  ;;  %v875_v1 = vmul.f32 %v819_v31, %v651_v41  ;;  %v628_v13 = vmul.f32 0.5, %v1913_v58 }
 0x166   :  { %v711_v44 = vmul.f32 0.70710677, %v1951_v29  ;;  %v686_v27 = vmul.f32 0.70710677, %v1968_v3 }
 0x168   :  { %1248 = verf.f32 %v711_v44 }
 0x169   :  { %v66_v22 = vld [vmem:[%s2164_s1 + $0x188] sm:$0xff]  ;;  %1250 = verf.f32 %v686_v27 }
 0x16a   :  { %930 = vst [vmem:[%s2166_s4 + $0x148] sm:$0xff] %v874_v32  ;;  %901 = vst [vmem:[%s2166_s4 + $0x60] sm:$0xff] %v845_v36  ;;  %v539_v39 = vadd.f32 %v1128_v30, %v66_v22  ;;  %v1235_v30 = vpop.eup %1234  ;;  %v653_v36 = vmul.f32 0.5, %v1910_v57 }
 0x16b   :  { %v1237_v5 = vpop.eup %1236  ;;  %v794_v35 = vadd.f32 1.0, %v1235_v30 }
 0x16c   :  { %v1971_v43 = vadd.f32 %v1533_v11, %v539_v39  ;;  %v1239_v7 = vpop.eup %1238  ;;  %v822_v42 = vadd.f32 1.0, %v1237_v5 }
 0x16d   :  { %v850_v10 = vmul.f32 %v794_v35, %v626_v33  ;;  %v793_v16 = vadd.f32 1.0, %v1239_v7  ;;  %v1241_v19 = vpop.eup %1240 }
 0x16e   :  { %v714_v60 = vmul.f32 0.70710677, %v1971_v43  ;;  %v878_v22 = vmul.f32 %v822_v42, %v654_v45  ;;  %v1243_v37 = vpop.eup %1242  ;;  %v821_v26 = vadd.f32 1.0, %v1241_v19 }
 0x16f   :  { %v849_v61 = vmul.f32 %v793_v16, %v625_v8  ;;  %v1245_v41 = vpop.eup %1244 }
 0x170   :  { %1252 = verf.f32 %v714_v60  ;;  %v877_v39 = vmul.f32 %v821_v26, %v653_v36 }
 0x171   :  { %v37_v63 = vld [vmem:[%s2164_s1 + $0xa0] sm:$0xff] }
 0x172   :  { %v65_v12 = vld [vmem:[%s2164_s1 + $0x180] sm:$0xff]  ;;  %v510_v47 = vadd.f32 %v311_v56, %v37_v63  ;;  %v796_v63 = vadd.f32 1.0, %v1243_v37 }
 0x173   :  { %929 = vst [vmem:[%s2166_s4 + $0x140] sm:$0xff] %v873_v28  ;;  %904 = vst [vmem:[%s2166_s4 + $0x78] sm:$0xff] %v848_v50  ;;  %v538_v53 = vadd.f32 %v451_v24, %v65_v12  ;;  %v627_v12 = vmul.f32 0.5, %v1929_v52  ;;  %v824_v52 = vadd.f32 1.0, %v1245_v41 }
 0x174   :  { %v1993_v2 = vadd.f32 %v1533_v11, %v510_v47  ;;  %v852_v44 = vmul.f32 %v796_v63, %v628_v13  ;;  %v1247_v47 = vpop.eup %1246 }
 0x175   :  { %v1996_v4 = vadd.f32 %v1533_v11, %v538_v53  ;;  %v795_v31 = vadd.f32 1.0, %v1247_v47  ;;  %v880_v33 = vmul.f32 %v824_v52, %v656_v6 }
 0x176   :  { %v685_v32 = vmul.f32 0.70710677, %v1993_v2 }
 0x177   :  { %v713_v18 = vmul.f32 0.70710677, %v1996_v4 }
 0x178   :  { %1254 = verf.f32 %v685_v32 }
 0x179   :  { %1256 = verf.f32 %v713_v18 }
 0x17a   :  { %v40_v49 = vld [vmem:[%s2164_s1 + $0xb8] sm:$0xff]  ;;  %v39_v54 = vld [vmem:[%s2164_s1 + $0xb0] sm:$0xff] }
 0x17b   :  { %v68_v20 = vld [vmem:[%s2164_s1 + $0x198] sm:$0xff]  ;;  %v513_v62 = vadd.f32 %v1089_v59, %v40_v49  ;;  %v512_v0 = vadd.f32 %v321_v48, %v39_v54  ;;  %v1249_v54 = vpop.eup %1248 }
 0x17c   :  { %932 = vst [vmem:[%s2166_s4 + $0x158] sm:$0xff] %v876_v40  ;;  %903 = vst [vmem:[%s2166_s4 + $0x70] sm:$0xff] %v847_v51  ;;  %v541_v56 = vadd.f32 %v1131_v17, %v68_v20  ;;  %v471_v40 = vpop.f32.mrf.mxu1  ;;  %v1095_v51 = vpop.f32.mrf.mxu0 }
 0x17d   :  { %931 = vst [vmem:[%s2166_s4 + $0x150] sm:$0xff] %v875_v1  ;;  %v2006_v24 = vadd.f32 %v1533_v11, %v513_v62  ;;  %906 = vst [vmem:[%s2166_s4 + $0x88] sm:$0xff] %v850_v10  ;;  %v2015_v57 = vadd.f32 %v1533_v11, %v512_v0  ;;  %v851_v1 = vmul.f32 %v795_v31, %v627_v12  ;;  %v655_v62 = vmul.f32 0.5, %v1951_v29  ;;  %v1251_v8 = vpop.eup %1250 }
 0x17e   :  { %v2009_v25 = vadd.f32 %v1533_v11, %v541_v56  ;;  %v1137_v56 = vpop.f32.mrf.mxu1  ;;  %v630_v0 = vmul.f32 0.5, %v1968_v3  ;;  %v658_v29 = vmul.f32 0.5, %v1971_v43  ;;  %v341_v42 = vpop.f32.mrf.mxu0  ;;  %v629_v10 = vmul.f32 0.5, %v1993_v2  ;;  %v1282_v43 = vld [vmem:[%s2165_s3] ss:$0 sm:$0xff] }
 0x17f   :  { %v688_v50 = vmul.f32 0.70710677, %v2006_v24  ;;  %v687_v58 = vmul.f32 0.70710677, %v2015_v57  ;;  %v1253_v36 = vpop.eup %1252  ;;  %v798_v3 = vadd.f32 1.0, %v1251_v8  ;;  %v631_v31 = vmul.f32 0.5, %v2015_v57 }
 0x180   :  { %v716_v14 = vmul.f32 0.70710677, %v2009_v25 }
 0x181   :  { %1258 = verf.f32 %v688_v50 }
 0x182   :  { %1260 = verf.f32 %v716_v14 }
 0x183   :  { %1262 = verf.f32 %v687_v58 }
 0x184   :  { %v67_v59 = vld [vmem:[%s2164_s1 + $0x190] sm:$0xff]  ;;  %v42_v23 = vld [vmem:[%s2164_s1 + $0xc8] sm:$0xff] }
 0x185   :  { %v70_v28 = vld [vmem:[%s2164_s1 + $0x1a8] sm:$0xff]  ;;  %v540_v9 = vadd.f32 %v461_v34, %v67_v59  ;;  %v515_v17 = vadd.f32 %v1092_v21, %v42_v23  ;;  %v823_v34 = vadd.f32 1.0, %v1249_v54  ;;  %v1255_v26 = vpop.eup %1254  ;;  %v854_v59 = vmul.f32 %v798_v3, %v630_v0 }
 0x186   :  { %934 = vst [vmem:[%s2166_s4 + $0x168] sm:$0xff] %v878_v22  ;;  %v543_v49 = vadd.f32 %v1134_v55, %v70_v28  ;;  %v826_v22 = vadd.f32 1.0, %v1253_v36  ;;  %v657_v23 = vmul.f32 0.5, %v1996_v4  ;;  %v797_v63 = vadd.f32 1.0, %v1255_v26 }
 0x187   :  { %v2051_v53 = vadd.f32 %v1533_v11, %v540_v9  ;;  %v2054_v20 = vadd.f32 %v1533_v11, %v515_v17  ;;  %v879_v32 = vmul.f32 %v823_v34, %v655_v62 }
 0x188   :  { %v2057_v45 = vadd.f32 %v1533_v11, %v543_v49  ;;  %v882_v13 = vmul.f32 %v826_v22, %v658_v29  ;;  %v853_v4 = vmul.f32 %v797_v63, %v629_v10  ;;  %v660_v49 = vmul.f32 0.5, %v2009_v25 }
 0x189   :  { %v715_v5 = vmul.f32 0.70710677, %v2051_v53  ;;  %v690_v21 = vmul.f32 0.70710677, %v2054_v20  ;;  %v659_v57 = vmul.f32 0.5, %v2051_v53  ;;  %v634_v34 = vmul.f32 0.5, %v2054_v20 }
 0x18a   :  { %v718_v7 = vmul.f32 0.70710677, %v2057_v45 }
 0x18b   :  { %1264 = verf.f32 %v715_v5 }
 0x18c   :  { %1266 = verf.f32 %v690_v21 }
 0x18d   :  { %v41_v38 = vld [vmem:[%s2164_s1 + $0xc0] sm:$0xff]  ;;  %1268 = verf.f32 %v718_v7 }
 0x18e   :  { %905 = vst [vmem:[%s2166_s4 + $0x80] sm:$0xff] %v849_v61  ;;  %v514_v48 = vadd.f32 %v331_v15, %v41_v38  ;;  %v481_v61 = vpop.f32.mrf.mxu1  ;;  %v1257_v15 = vpop.eup %1256 }
 0x18f   :  { %v825_v38 = vadd.f32 1.0, %v1257_v15  ;;  %v1259_v58 = vpop.eup %1258 }
 0x190   :  { %v2060_v27 = vadd.f32 %v1533_v11, %v514_v48  ;;  %v1261_v17 = vpop.eup %1260 }
 0x191   :  { %v881_v41 = vmul.f32 %v825_v38, %v657_v23  ;;  %v1263_v52 = vpop.eup %1262  ;;  %v828_v48 = vadd.f32 1.0, %v1261_v17 }
 0x192   :  { %v689_v16 = vmul.f32 0.70710677, %v2060_v27  ;;  %v799_v54 = vadd.f32 1.0, %v1263_v52  ;;  %v633_v21 = vmul.f32 0.5, %v2060_v27 }
 0x194   :  { %1270 = verf.f32 %v689_v16 }
 0x195   :  { %v69_v46 = vld [vmem:[%s2164_s1 + $0x1a0] sm:$0xff] }
 0x196   :  { %933 = vst [vmem:[%s2166_s4 + $0x160] sm:$0xff] %v877_v39  ;;  %908 = vst [vmem:[%s2166_s4 + $0x98] sm:$0xff] %v852_v44  ;;  %v542_v60 = vadd.f32 %v471_v40, %v69_v46  ;;  %v632_v46 = vmul.f32 0.5, %v2006_v24  ;;  %v800_v40 = vadd.f32 1.0, %v1259_v58  ;;  %v855_v24 = vmul.f32 %v799_v54, %v631_v31 }
 0x198   :  { %v2088_v18 = vadd.f32 %v1282_v43, %v542_v60 }
 0x19a   :  { %v717_v28 = vmul.f32 0.70710677, %v2088_v18  ;;  %v661_v8 = vmul.f32 0.5, %v2088_v18 }
 0x19c   :  { %1272 = verf.f32 %v717_v28 }
 0x19d   :  { %v44_v30 = vld [vmem:[%s2164_s1 + $0xd8] sm:$0xff]  ;;  %v43_v11 = vld [vmem:[%s2164_s1 + $0xd0] sm:$0xff] }
 0x19e   :  { %v72_v35 = vld [vmem:[%s2164_s1 + $0x1b8] sm:$0xff]  ;;  %v517_v19 = vadd.f32 %v1095_v51, %v44_v30  ;;  %v516_v55 = vadd.f32 %v341_v42, %v43_v11  ;;  %v856_v51 = vmul.f32 %v800_v40, %v632_v46  ;;  %v1265_v30 = vpop.eup %1264  ;;  %v662_v11 = vmul.f32 0.5, %v2057_v45 }
 0x19f   :  { %936 = vst [vmem:[%s2166_s4 + $0x178] sm:$0xff] %v880_v33  ;;  %907 = vst [vmem:[%s2166_s4 + $0x90] sm:$0xff] %v851_v1  ;;  %v545_v2 = vadd.f32 %v1137_v56, %v72_v35  ;;  %v884_v33 = vmul.f32 %v828_v48, %v660_v49  ;;  %v1267_v25 = vpop.eup %1266  ;;  %v827_v1 = vadd.f32 1.0, %v1265_v30 }
 0x1a0   :  { %935 = vst [vmem:[%s2166_s4 + $0x170] sm:$0xff] %v879_v32  ;;  %v580_v6 = vadd.f32 %v1282_v43, %v517_v19  ;;  %v2103_v39 = vadd.f32 %v1282_v43, %v516_v55  ;;  %v1269_v62 = vpop.eup %1268  ;;  %v802_v5 = vadd.f32 1.0, %v1267_v25 }
 0x1a1   :  { %v2098_v50 = vadd.f32 %v1282_v43, %v545_v2  ;;  %v1271_v35 = vpop.eup %1270  ;;  %v883_v56 = vmul.f32 %v827_v1, %v659_v57  ;;  %v830_v0 = vadd.f32 1.0, %v1269_v62 }
 0x1a2   :  { %v692_v14 = vmul.f32 0.70710677, %v580_v6  ;;  %v691_v9 = vmul.f32 0.70710677, %v2103_v39  ;;  %v858_v29 = vmul.f32 %v802_v5, %v634_v34  ;;  %v801_v7 = vadd.f32 1.0, %v1271_v35 }
 0x1a3   :  { %v720_v44 = vmul.f32 0.70710677, %v2098_v50  ;;  %v886_v53 = vmul.f32 %v830_v0, %v662_v11  ;;  %v636_v16 = vmul.f32 0.5, %v580_v6  ;;  %v635_v22 = vmul.f32 0.5, %v2103_v39 }
 0x1a4   :  { %1274 = verf.f32 %v692_v14  ;;  %v857_v20 = vmul.f32 %v801_v7, %v633_v21 }
 0x1a5   :  { %1276 = verf.f32 %v720_v44 }
 0x1a6   :  { %1278 = verf.f32 %v691_v9 }
 0x1a7   :  { %v71_v37 = vld [vmem:[%s2164_s1 + $0x1b0] sm:$0xff] }
 0x1a8   :  { %910 = vst [vmem:[%s2166_s4 + $0xa8] sm:$0xff] %v854_v59  ;;  %v544_v12 = vadd.f32 %v481_v61, %v71_v37  ;;  %938 = vst [vmem:[%s2166_s4 + $0x188] sm:$0xff] %v882_v13 }
 0x1a9   :  { %909 = vst [vmem:[%s2166_s4 + $0xa0] sm:$0xff] %v853_v4  ;;  %937 = vst [vmem:[%s2166_s4 + $0x180] sm:$0xff] %v881_v41  ;;  %v1273_v42 = vpop.eup %1272 }
 0x1aa   :  { %v607_v47 = vadd.f32 %v1282_v43, %v544_v12  ;;  %912 = vst [vmem:[%s2166_s4 + $0xb8] sm:$0xff] %v856_v51  ;;  %940 = vst [vmem:[%s2166_s4 + $0x198] sm:$0xff] %v884_v33  ;;  %v829_v32 = vadd.f32 1.0, %v1273_v42  ;;  %v664_v43 = vmul.f32 0.5, %v2098_v50 }
 0x1ab   :  { %911 = vst [vmem:[%s2166_s4 + $0xb0] sm:$0xff] %v855_v24  ;;  %939 = vst [vmem:[%s2166_s4 + $0x190] sm:$0xff] %v883_v56 }
 0x1ac   :  { %v719_v60 = vmul.f32 0.70710677, %v607_v47  ;;  %914 = vst [vmem:[%s2166_s4 + $0xc8] sm:$0xff] %v858_v29  ;;  %942 = vst [vmem:[%s2166_s4 + $0x1a8] sm:$0xff] %v886_v53  ;;  %v885_v27 = vmul.f32 %v829_v32, %v661_v8  ;;  %v663_v26 = vmul.f32 0.5, %v607_v47 }
 0x1ad   :  { %913 = vst [vmem:[%s2166_s4 + $0xc0] sm:$0xff] %v857_v20 }
 0x1ae   :  { %1280 = verf.f32 %v719_v60  ;;  %941 = vst [vmem:[%s2166_s4 + $0x1a0] sm:$0xff] %v885_v27 }
 0x1b1   :  { %v1275_v45 = vpop.eup %1274 }
 0x1b2   :  { %v1277_v10 = vpop.eup %1276  ;;  %v804_v36 = vadd.f32 1.0, %v1275_v45 }
 0x1b3   :  { %v1279_v3 = vpop.eup %1278  ;;  %v832_v18 = vadd.f32 1.0, %v1277_v10 }
 0x1b4   :  { %v860_v19 = vmul.f32 %v804_v36, %v636_v16  ;;  %v803_v2 = vadd.f32 1.0, %v1279_v3 }
 0x1b5   :  { %v888_v55 = vmul.f32 %v832_v18, %v664_v43 }
 0x1b6   :  { %916 = vst [vmem:[%s2166_s4 + $0xd8] sm:$0xff] %v860_v19  ;;  %v859_v61 = vmul.f32 %v803_v2, %v635_v22 }
 0x1b7   :  { %944 = vst [vmem:[%s2166_s4 + $0x1b8] sm:$0xff] %v888_v55 }
 0x1b8   :  { %915 = vst [vmem:[%s2166_s4 + $0xd0] sm:$0xff] %v859_v61 }
 0x1bb   :  { %v1281_v37 = vpop.eup %1280 }
 0x1bc   :  { %v831_v59 = vadd.f32 1.0, %v1281_v37 }
 0x1be   :  { %v887_v23 = vmul.f32 %v831_v59, %v663_v26 }
 0x1c0   :  { %943 = vst [vmem:[%s2166_s4 + $0x1b0] sm:$0xff] %v887_v23 }

// kernel: rsnet_2d_forward.10
= control target key start
LH: loop header
LB: loop body
LE: loop exit
PB: predicated region body
PF: predicated region fallthrough
CT: control target
= control target key end

     0   :  { %s1528_s2 = inlined_call_operand.vmem [shape: f32[128,128], index: 2, kind: input, shape index: {}]   ;;  %s1529_s0 = inlined_call_operand.vmem [shape: f32[448,128], index: 0, kind: input, shape index: {}]   ;;  %s1530_s1 = inlined_call_operand.vmem [shape: f32[448,128], index: 1, kind: input, shape index: {}, may-alias: {1,4}]   ;;  %s1531_s3 = inlined_call_operand.vmem [shape: f32[1,128], index: 3, kind: input, shape index: {}]   ;;  %s1532_s4 = inlined_call_operand.vmem [shape: f32[448,128], index: 4, kind: output, shape index: {}, may-alias: {1,4}]  }
   0x1   :  { %v144_v0 = vld [vmem:[%s1528_s2 + $0x78] sm:$0xff]  ;;  %v143_v1 = vld [vmem:[%s1528_s2 + $0x70] sm:$0xff]  ;;  %v142_v2 = vld [vmem:[%s1528_s2 + $0x68] sm:$0xff] }
   0x2   :  { %742 = vmatprep.subr.mxu0 %v144_v0  ;;  %858 = vmatprep.subr.mxu1 %v144_v0  ;;  %v141_v3 = vld [vmem:[%s1528_s2 + $0x60] sm:$0xff]  ;;  %v140_v4 = vld [vmem:[%s1528_s2 + $0x58] sm:$0xff]  ;;  %v139_v5 = vld [vmem:[%s1528_s2 + $0x50] sm:$0xff] }
   0x3   :  { %743 = vmatpush3.msra.mxu0 %v144_v0  ;;  %874 = vmatpush3.msra.mxu1 %v144_v0  ;;  %v138_v6 = vld [vmem:[%s1528_s2 + $0x48] sm:$0xff]  ;;  %v137_v7 = vld [vmem:[%s1528_s2 + $0x40] sm:$0xff]  ;;  %v136_v8 = vld [vmem:[%s1528_s2 + $0x38] sm:$0xff] }
   0x4   :  { %744 = vmatprep.subr.mxu0 %v143_v1  ;;  %859 = vmatprep.subr.mxu1 %v143_v1  ;;  %v135_v9 = vld [vmem:[%s1528_s2 + $0x30] sm:$0xff]  ;;  %v134_v10 = vld [vmem:[%s1528_s2 + $0x28] sm:$0xff]  ;;  %v133_v11 = vld [vmem:[%s1528_s2 + $0x20] sm:$0xff] }
   0x5   :  { %745 = vmatpush3.msra.mxu0 %v143_v1  ;;  %875 = vmatpush3.msra.mxu1 %v143_v1  ;;  %v132_v12 = vld [vmem:[%s1528_s2 + $0x18] sm:$0xff]  ;;  %v131_v13 = vld [vmem:[%s1528_s2 + $0x10] sm:$0xff]  ;;  %v130_v14 = vld [vmem:[%s1528_s2 + $0x8] sm:$0xff] }
   0x6   :  { %746 = vmatprep.subr.mxu0 %v142_v2  ;;  %860 = vmatprep.subr.mxu1 %v142_v2  ;;  %v129_v15 = vld [vmem:[%s1528_s2] sm:$0xff]  ;;  %v74_v18 = vld [vmem:[%s1529_s0 + $0x8] sm:$0xff]  ;;  %v75_v20 = vld [vmem:[%s1529_s0 + $0x10] sm:$0xff] }
   0x7   :  { %747 = vmatpush3.msra.mxu0 %v142_v2  ;;  %876 = vmatpush3.msra.mxu1 %v142_v2  ;;  %v73_v16 = vld [vmem:[%s1529_s0] sm:$0xff]  ;;  %v102_v19 = vld [vmem:[%s1529_s0 + $0xe8] sm:$0xff]  ;;  %v103_v21 = vld [vmem:[%s1529_s0 + $0xf0] sm:$0xff] }
   0x8   :  { %748 = vmatprep.subr.mxu0 %v141_v3  ;;  %861 = vmatprep.subr.mxu1 %v141_v3  ;;  %v101_v17 = vld [vmem:[%s1529_s0 + $0xe0] sm:$0xff]  ;;  %v76_v22 = vld [vmem:[%s1529_s0 + $0x18] sm:$0xff]  ;;  %v78_v26 = vld [vmem:[%s1529_s0 + $0x28] sm:$0xff] }
   0x9   :  { %749 = vmatpush3.msra.mxu0 %v141_v3  ;;  %877 = vmatpush3.msra.mxu1 %v141_v3  ;;  %v104_v23 = vld [vmem:[%s1529_s0 + $0xf8] sm:$0xff]  ;;  %v77_v24 = vld [vmem:[%s1529_s0 + $0x20] sm:$0xff]  ;;  %v106_v27 = vld [vmem:[%s1529_s0 + $0x108] sm:$0xff] }
   0xa   :  { %750 = vmatprep.subr.mxu0 %v140_v4  ;;  %862 = vmatprep.subr.mxu1 %v140_v4  ;;  %v105_v25 = vld [vmem:[%s1529_s0 + $0x100] sm:$0xff]  ;;  %v79_v28 = vld [vmem:[%s1529_s0 + $0x30] sm:$0xff]  ;;  %v80_v30 = vld [vmem:[%s1529_s0 + $0x38] sm:$0xff] }
   0xb   :  { %751 = vmatpush3.msra.mxu0 %v140_v4  ;;  %878 = vmatpush3.msra.mxu1 %v140_v4  ;;  %v107_v29 = vld [vmem:[%s1529_s0 + $0x110] sm:$0xff]  ;;  %v108_v31 = vld [vmem:[%s1529_s0 + $0x118] sm:$0xff]  ;;  %v81_v32 = vld [vmem:[%s1529_s0 + $0x40] sm:$0xff] }
   0xc   :  { %752 = vmatprep.subr.mxu0 %v139_v5  ;;  %863 = vmatprep.subr.mxu1 %v139_v5  ;;  %v109_v33 = vld [vmem:[%s1529_s0 + $0x120] sm:$0xff]  ;;  %v82_v34 = vld [vmem:[%s1529_s0 + $0x48] sm:$0xff]  ;;  %v83_v36 = vld [vmem:[%s1529_s0 + $0x50] sm:$0xff] }
   0xd   :  { %753 = vmatpush3.msra.mxu0 %v139_v5  ;;  %879 = vmatpush3.msra.mxu1 %v139_v5  ;;  %v110_v35 = vld [vmem:[%s1529_s0 + $0x128] sm:$0xff]  ;;  %v111_v37 = vld [vmem:[%s1529_s0 + $0x130] sm:$0xff]  ;;  %v84_v38 = vld [vmem:[%s1529_s0 + $0x58] sm:$0xff] }
   0xe   :  { %754 = vmatprep.subr.mxu0 %v138_v6  ;;  %864 = vmatprep.subr.mxu1 %v138_v6  ;;  %v112_v39 = vld [vmem:[%s1529_s0 + $0x138] sm:$0xff]  ;;  %v85_v40 = vld [vmem:[%s1529_s0 + $0x60] sm:$0xff]  ;;  %v86_v42 = vld [vmem:[%s1529_s0 + $0x68] sm:$0xff] }
   0xf   :  { %755 = vmatpush3.msra.mxu0 %v138_v6  ;;  %880 = vmatpush3.msra.mxu1 %v138_v6  ;;  %v113_v41 = vld [vmem:[%s1529_s0 + $0x140] sm:$0xff]  ;;  %v114_v43 = vld [vmem:[%s1529_s0 + $0x148] sm:$0xff]  ;;  %v87_v44 = vld [vmem:[%s1529_s0 + $0x70] sm:$0xff] }
  0x10   :  { %756 = vmatprep.subr.mxu0 %v137_v7  ;;  %865 = vmatprep.subr.mxu1 %v137_v7  ;;  %v115_v45 = vld [vmem:[%s1529_s0 + $0x150] sm:$0xff]  ;;  %v88_v46 = vld [vmem:[%s1529_s0 + $0x78] sm:$0xff]  ;;  %v89_v48 = vld [vmem:[%s1529_s0 + $0x80] sm:$0xff] }
  0x11   :  { %757 = vmatpush3.msra.mxu0 %v137_v7  ;;  %881 = vmatpush3.msra.mxu1 %v137_v7  ;;  %v116_v47 = vld [vmem:[%s1529_s0 + $0x158] sm:$0xff]  ;;  %v117_v49 = vld [vmem:[%s1529_s0 + $0x160] sm:$0xff]  ;;  %v90_v50 = vld [vmem:[%s1529_s0 + $0x88] sm:$0xff] }
  0x12   :  { %758 = vmatprep.subr.mxu0 %v136_v8  ;;  %866 = vmatprep.subr.mxu1 %v136_v8  ;;  %v118_v51 = vld [vmem:[%s1529_s0 + $0x168] sm:$0xff]  ;;  %v91_v52 = vld [vmem:[%s1529_s0 + $0x90] sm:$0xff]  ;;  %v92_v54 = vld [vmem:[%s1529_s0 + $0x98] sm:$0xff] }
  0x13   :  { %759 = vmatpush3.msra.mxu0 %v136_v8  ;;  %882 = vmatpush3.msra.mxu1 %v136_v8  ;;  %v119_v53 = vld [vmem:[%s1529_s0 + $0x170] sm:$0xff]  ;;  %v120_v55 = vld [vmem:[%s1529_s0 + $0x178] sm:$0xff]  ;;  %v93_v56 = vld [vmem:[%s1529_s0 + $0xa0] sm:$0xff] }
  0x14   :  { %760 = vmatprep.subr.mxu0 %v135_v9  ;;  %867 = vmatprep.subr.mxu1 %v135_v9  ;;  %v121_v57 = vld [vmem:[%s1529_s0 + $0x180] sm:$0xff]  ;;  %v94_v58 = vld [vmem:[%s1529_s0 + $0xa8] sm:$0xff]  ;;  %v95_v60 = vld [vmem:[%s1529_s0 + $0xb0] sm:$0xff] }
  0x15   :  { %761 = vmatpush3.msra.mxu0 %v135_v9  ;;  %883 = vmatpush3.msra.mxu1 %v135_v9  ;;  %v122_v59 = vld [vmem:[%s1529_s0 + $0x188] sm:$0xff]  ;;  %v123_v61 = vld [vmem:[%s1529_s0 + $0x190] sm:$0xff]  ;;  %v96_v62 = vld [vmem:[%s1529_s0 + $0xb8] sm:$0xff] }
  0x16   :  { %762 = vmatprep.subr.mxu0 %v134_v10  ;;  %868 = vmatprep.subr.mxu1 %v134_v10  ;;  %v124_v63 = vld [vmem:[%s1529_s0 + $0x198] sm:$0xff]  ;;  %v97_v0 = vld [vmem:[%s1529_s0 + $0xc0] sm:$0xff]  ;;  %v98_v2 = vld [vmem:[%s1529_s0 + $0xc8] sm:$0xff] }
  0x17   :  { %763 = vmatpush3.msra.mxu0 %v134_v10  ;;  %884 = vmatpush3.msra.mxu1 %v134_v10  ;;  %v125_v1 = vld [vmem:[%s1529_s0 + $0x1a0] sm:$0xff]  ;;  %v126_v3 = vld [vmem:[%s1529_s0 + $0x1a8] sm:$0xff]  ;;  %v99_v4 = vld [vmem:[%s1529_s0 + $0xd0] sm:$0xff] }
  0x18   :  { %764 = vmatprep.subr.mxu0 %v133_v11  ;;  %869 = vmatprep.subr.mxu1 %v133_v11  ;;  %v127_v5 = vld [vmem:[%s1529_s0 + $0x1b0] sm:$0xff]  ;;  %v100_v6 = vld [vmem:[%s1529_s0 + $0xd8] sm:$0xff]  ;;  %v18_v8 = vld [vmem:[%s1530_s1 + $0x8] sm:$0xff] }
  0x19   :  { %765 = vmatpush3.msra.mxu0 %v133_v11  ;;  %885 = vmatpush3.msra.mxu1 %v133_v11  ;;  %v128_v7 = vld [vmem:[%s1529_s0 + $0x1b8] sm:$0xff]  ;;  %v46_v9 = vld [vmem:[%s1530_s1 + $0xe8] sm:$0xff]  ;;  %v1140_v11 = vld [vmem:[%s1531_s3] ss:$0 sm:$0xff] }
  0x1a   :  { %766 = vmatprep.subr.mxu0 %v132_v12  ;;  %870 = vmatprep.subr.mxu1 %v132_v12 }
  0x1b   :  { %767 = vmatpush3.msra.mxu0 %v132_v12  ;;  %886 = vmatpush3.msra.mxu1 %v132_v12 }
  0x1c   :  { %768 = vmatprep.subr.mxu0 %v131_v13  ;;  %871 = vmatprep.subr.mxu1 %v131_v13 }
  0x1d   :  { %769 = vmatpush3.msra.mxu0 %v131_v13  ;;  %887 = vmatpush3.msra.mxu1 %v131_v13  ;;  %v17_v13 = vld [vmem:[%s1530_s1] sm:$0xff] }
  0x1e   :  { %770 = vmatprep.subr.mxu0 %v130_v14  ;;  %872 = vmatprep.subr.mxu1 %v130_v14 }
  0x1f   :  { %771 = vmatpush3.msra.mxu0 %v130_v14  ;;  %888 = vmatpush3.msra.mxu1 %v130_v14  ;;  %v45_v14 = vld [vmem:[%s1530_s1 + $0xe0] sm:$0xff] }
  0x20   :  { %772 = vmatprep.subr.mxu0 %v129_v15  ;;  %873 = vmatprep.subr.mxu1 %v129_v15 }
  0x21   :  { %773 = vmatpush3.msra.mxu0 %v129_v15  ;;  %889 = vmatpush3.msra.mxu1 %v129_v15 }
  0x22   :  { %774 = vmatprep.mubr.f32.mxu0 %v73_v16  ;;  %816 = vmatprep.mubr.f32.mxu1 %v101_v17 }
  0x23   :  { %775 = vmatmul.mubr.f32.vlgmr.msra.gmra.mxu0 %v74_v18  ;;  %817 = vmatmul.mubr.f32.vlgmr.msra.gmra.mxu1 %v102_v19  ;;  %v20_v19 = vld [vmem:[%s1530_s1 + $0x18] sm:$0xff] }
  0x24   :  { %777 = vmatprep.mubr.f32.mxu0 %v75_v20  ;;  %819 = vmatprep.mubr.f32.mxu1 %v103_v21  ;;  %v48_v20 = vld [vmem:[%s1530_s1 + $0xf8] sm:$0xff] }
  0x27   :  { %778 = vmatmul.mubr.f32.gmra.mxu0 %v76_v22  ;;  %820 = vmatmul.mubr.f32.gmra.mxu1 %v104_v23 }
  0x28   :  { %780 = vmatprep.mubr.f32.mxu0 %v77_v24  ;;  %822 = vmatprep.mubr.f32.mxu1 %v105_v25 }
  0x2b   :  { %781 = vmatmul.mubr.f32.gmra.mxu0 %v78_v26  ;;  %823 = vmatmul.mubr.f32.gmra.mxu1 %v106_v27  ;;  %v19_v27 = vld [vmem:[%s1530_s1 + $0x10] sm:$0xff] }
  0x2c   :  { %783 = vmatprep.mubr.f32.mxu0 %v79_v28  ;;  %825 = vmatprep.mubr.f32.mxu1 %v107_v29  ;;  %v47_v28 = vld [vmem:[%s1530_s1 + $0xf0] sm:$0xff] }
  0x2f   :  { %784 = vmatmul.mubr.f32.gmra.mxu0 %v80_v30  ;;  %826 = vmatmul.mubr.f32.gmra.mxu1 %v108_v31 }
  0x30   :  { %786 = vmatprep.mubr.f32.mxu0 %v81_v32  ;;  %828 = vmatprep.mubr.f32.mxu1 %v109_v33 }
  0x33   :  { %787 = vmatmul.mubr.f32.gmra.mxu0 %v82_v34  ;;  %829 = vmatmul.mubr.f32.gmra.mxu1 %v110_v35 }
  0x34   :  { %789 = vmatprep.mubr.f32.mxu0 %v83_v36  ;;  %831 = vmatprep.mubr.f32.mxu1 %v111_v37 }
  0x37   :  { %790 = vmatmul.mubr.f32.gmra.mxu0 %v84_v38  ;;  %832 = vmatmul.mubr.f32.gmra.mxu1 %v112_v39 }
  0x38   :  { %792 = vmatprep.mubr.f32.mxu0 %v85_v40  ;;  %834 = vmatprep.mubr.f32.mxu1 %v113_v41 }
  0x3b   :  { %793 = vmatmul.mubr.f32.gmra.mxu0 %v86_v42  ;;  %835 = vmatmul.mubr.f32.gmra.mxu1 %v114_v43 }
  0x3c   :  { %795 = vmatprep.mubr.f32.mxu0 %v87_v44  ;;  %837 = vmatprep.mubr.f32.mxu1 %v115_v45 }
  0x3f   :  { %796 = vmatmul.mubr.f32.gmra.mxu0 %v88_v46  ;;  %838 = vmatmul.mubr.f32.gmra.mxu1 %v116_v47 }
  0x40   :  { %798 = vmatprep.mubr.f32.mxu0 %v89_v48  ;;  %840 = vmatprep.mubr.f32.mxu1 %v117_v49 }
  0x43   :  { %799 = vmatmul.mubr.f32.gmra.mxu0 %v90_v50  ;;  %841 = vmatmul.mubr.f32.gmra.mxu1 %v118_v51 }
  0x44   :  { %801 = vmatprep.mubr.f32.mxu0 %v91_v52  ;;  %843 = vmatprep.mubr.f32.mxu1 %v119_v53 }
  0x47   :  { %802 = vmatmul.mubr.f32.gmra.mxu0 %v92_v54  ;;  %844 = vmatmul.mubr.f32.gmra.mxu1 %v120_v55 }
  0x48   :  { %804 = vmatprep.mubr.f32.mxu0 %v93_v56  ;;  %846 = vmatprep.mubr.f32.mxu1 %v121_v57 }
  0x4b   :  { %805 = vmatmul.mubr.f32.gmra.mxu0 %v94_v58  ;;  %847 = vmatmul.mubr.f32.gmra.mxu1 %v122_v59 }
  0x4c   :  { %807 = vmatprep.mubr.f32.mxu0 %v95_v60  ;;  %849 = vmatprep.mubr.f32.mxu1 %v123_v61 }
  0x4f   :  { %808 = vmatmul.mubr.f32.gmra.mxu0 %v96_v62  ;;  %850 = vmatmul.mubr.f32.gmra.mxu1 %v124_v63 }
  0x50   :  { %810 = vmatprep.mubr.f32.mxu0 %v97_v0  ;;  %852 = vmatprep.mubr.f32.mxu1 %v125_v1 }
  0x53   :  { %811 = vmatmul.mubr.f32.gmra.mxu0 %v98_v2  ;;  %853 = vmatmul.mubr.f32.gmra.mxu1 %v126_v3 }
  0x54   :  { %813 = vmatprep.mubr.f32.mxu0 %v99_v4  ;;  %855 = vmatprep.mubr.f32.mxu1 %v127_v5 }
  0x57   :  { %814 = vmatmul.mubr.f32.gmra.mxu0 %v100_v6  ;;  %856 = vmatmul.mubr.f32.gmra.mxu1 %v128_v7 }
  0xe3   :  { %v776_v10 = vpop.f32.mrf.mxu0  ;;  %v818_v12 = vpop.f32.mrf.mxu1 }
  0xe4   :  { %v491_v15 = vadd.f32 %v776_v10, %v18_v8  ;;  %v519_v16 = vadd.f32 %v818_v12, %v46_v9 }
  0xe5   :  { %v211_v17 = vpop.f32.mrf.mxu0  ;;  %v351_v18 = vpop.f32.mrf.mxu1 }
  0xe6   :  { %v554_v21 = vadd.f32 %v1140_v11, %v491_v15  ;;  %v582_v22 = vadd.f32 %v1140_v11, %v519_v16  ;;  %v490_v23 = vadd.f32 %v211_v17, %v17_v13  ;;  %v518_v24 = vadd.f32 %v351_v18, %v45_v14 }
  0xe7   :  { %v779_v25 = vpop.f32.mrf.mxu0  ;;  %v821_v26 = vpop.f32.mrf.mxu1 }
  0xe8   :  { %610 = vst [vmem:[%s1532_s4 + $0x8] sm:$0xff] %v554_v21  ;;  %638 = vst [vmem:[%s1532_s4 + $0xe8] sm:$0xff] %v582_v22  ;;  %v553_v29 = vadd.f32 %v1140_v11, %v490_v23  ;;  %v581_v30 = vadd.f32 %v1140_v11, %v518_v24  ;;  %v493_v31 = vadd.f32 %v779_v25, %v20_v19 }
  0xe9   :  { %v521_v32 = vadd.f32 %v821_v26, %v48_v20  ;;  %v221_v33 = vpop.f32.mrf.mxu0  ;;  %v361_v34 = vpop.f32.mrf.mxu1 }
  0xea   :  { %v556_v37 = vadd.f32 %v1140_v11, %v493_v31  ;;  %v492_v39 = vadd.f32 %v221_v33, %v19_v27  ;;  %v520_v40 = vadd.f32 %v361_v34, %v47_v28 }
  0xeb   :  { %v584_v38 = vadd.f32 %v1140_v11, %v521_v32  ;;  %v782_v41 = vpop.f32.mrf.mxu0  ;;  %v824_v42 = vpop.f32.mrf.mxu1 }
  0xec   :  { %v555_v45 = vadd.f32 %v1140_v11, %v492_v39  ;;  %v583_v46 = vadd.f32 %v1140_v11, %v520_v40 }
  0xed   :  { %v231_v49 = vpop.f32.mrf.mxu0  ;;  %v371_v50 = vpop.f32.mrf.mxu1 }
  0xef   :  { %v22_v35 = vld [vmem:[%s1530_s1 + $0x28] sm:$0xff]  ;;  %v785_v57 = vpop.f32.mrf.mxu0  ;;  %v827_v58 = vpop.f32.mrf.mxu1 }
  0xf0   :  { %v50_v36 = vld [vmem:[%s1530_s1 + $0x108] sm:$0xff]  ;;  %v495_v47 = vadd.f32 %v782_v41, %v22_v35 }
  0xf1   :  { %609 = vst [vmem:[%s1532_s4] sm:$0xff] %v553_v29  ;;  %637 = vst [vmem:[%s1532_s4 + $0xe0] sm:$0xff] %v581_v30  ;;  %v523_v48 = vadd.f32 %v824_v42, %v50_v36  ;;  %v241_v1 = vpop.f32.mrf.mxu0  ;;  %v381_v2 = vpop.f32.mrf.mxu1 }
  0xf2   :  { %v558_v53 = vadd.f32 %v1140_v11, %v495_v47 }
  0xf3   :  { %v586_v54 = vadd.f32 %v1140_v11, %v523_v48  ;;  %v788_v9 = vpop.f32.mrf.mxu0  ;;  %v830_v10 = vpop.f32.mrf.mxu1 }
  0xf5   :  { %v251_v18 = vpop.f32.mrf.mxu0  ;;  %v391_v19 = vpop.f32.mrf.mxu1 }
  0xf7   :  { %v791_v26 = vpop.f32.mrf.mxu0  ;;  %v833_v27 = vpop.f32.mrf.mxu1 }
  0xf8   :  { %v21_v43 = vld [vmem:[%s1530_s1 + $0x20] sm:$0xff] }
  0xf9   :  { %v49_v44 = vld [vmem:[%s1530_s1 + $0x100] sm:$0xff]  ;;  %v494_v55 = vadd.f32 %v231_v49, %v21_v43  ;;  %v261_v34 = vpop.f32.mrf.mxu0  ;;  %v401_v35 = vpop.f32.mrf.mxu1 }
  0xfa   :  { %612 = vst [vmem:[%s1532_s4 + $0x18] sm:$0xff] %v556_v37  ;;  %640 = vst [vmem:[%s1532_s4 + $0xf8] sm:$0xff] %v584_v38  ;;  %v522_v56 = vadd.f32 %v371_v50, %v49_v44 }
  0xfb   :  { %v557_v61 = vadd.f32 %v1140_v11, %v494_v55  ;;  %v794_v42 = vpop.f32.mrf.mxu0  ;;  %v836_v43 = vpop.f32.mrf.mxu1 }
  0xfc   :  { %v585_v62 = vadd.f32 %v1140_v11, %v522_v56 }
  0xfd   :  { %v271_v50 = vpop.f32.mrf.mxu0 }
 0x101   :  { %v24_v51 = vld [vmem:[%s1530_s1 + $0x38] sm:$0xff] }
 0x102   :  { %v52_v52 = vld [vmem:[%s1530_s1 + $0x118] sm:$0xff]  ;;  %v497_v63 = vadd.f32 %v785_v57, %v24_v51  ;;  %v411_v51 = vpop.f32.mrf.mxu1 }
 0x103   :  { %611 = vst [vmem:[%s1532_s4 + $0x10] sm:$0xff] %v555_v45  ;;  %639 = vst [vmem:[%s1532_s4 + $0xf0] sm:$0xff] %v583_v46  ;;  %v525_v0 = vadd.f32 %v827_v58, %v52_v52  ;;  %v797_v58 = vpop.f32.mrf.mxu0 }
 0x104   :  { %v560_v5 = vadd.f32 %v1140_v11, %v497_v63 }
 0x105   :  { %v588_v6 = vadd.f32 %v1140_v11, %v525_v0 }
 0x10a   :  { %v23_v59 = vld [vmem:[%s1530_s1 + $0x30] sm:$0xff] }
 0x10b   :  { %v51_v60 = vld [vmem:[%s1530_s1 + $0x110] sm:$0xff]  ;;  %v496_v7 = vadd.f32 %v241_v1, %v23_v59  ;;  %v839_v59 = vpop.f32.mrf.mxu1 }
 0x10c   :  { %614 = vst [vmem:[%s1532_s4 + $0x28] sm:$0xff] %v558_v53  ;;  %642 = vst [vmem:[%s1532_s4 + $0x108] sm:$0xff] %v586_v54  ;;  %v524_v8 = vadd.f32 %v381_v2, %v51_v60  ;;  %v281_v2 = vpop.f32.mrf.mxu0 }
 0x10d   :  { %v559_v14 = vadd.f32 %v1140_v11, %v496_v7 }
 0x10e   :  { %v587_v15 = vadd.f32 %v1140_v11, %v524_v8 }
 0x113   :  { %v26_v3 = vld [vmem:[%s1530_s1 + $0x48] sm:$0xff] }
 0x114   :  { %v54_v4 = vld [vmem:[%s1530_s1 + $0x128] sm:$0xff]  ;;  %v499_v16 = vadd.f32 %v788_v9, %v26_v3  ;;  %v421_v3 = vpop.f32.mrf.mxu1 }
 0x115   :  { %613 = vst [vmem:[%s1532_s4 + $0x20] sm:$0xff] %v557_v61  ;;  %641 = vst [vmem:[%s1532_s4 + $0x100] sm:$0xff] %v585_v62  ;;  %v527_v17 = vadd.f32 %v830_v10, %v54_v4  ;;  %v800_v10 = vpop.f32.mrf.mxu0 }
 0x116   :  { %v562_v22 = vadd.f32 %v1140_v11, %v499_v16 }
 0x117   :  { %v590_v23 = vadd.f32 %v1140_v11, %v527_v17 }
 0x11c   :  { %v25_v12 = vld [vmem:[%s1530_s1 + $0x40] sm:$0xff] }
 0x11d   :  { %v53_v13 = vld [vmem:[%s1530_s1 + $0x120] sm:$0xff]  ;;  %v498_v24 = vadd.f32 %v251_v18, %v25_v12  ;;  %v842_v12 = vpop.f32.mrf.mxu1 }
 0x11e   :  { %616 = vst [vmem:[%s1532_s4 + $0x38] sm:$0xff] %v560_v5  ;;  %644 = vst [vmem:[%s1532_s4 + $0x118] sm:$0xff] %v588_v6  ;;  %v526_v25 = vadd.f32 %v391_v19, %v53_v13  ;;  %v291_v19 = vpop.f32.mrf.mxu0 }
 0x11f   :  { %v561_v30 = vadd.f32 %v1140_v11, %v498_v24 }
 0x120   :  { %v589_v31 = vadd.f32 %v1140_v11, %v526_v25 }
 0x125   :  { %v28_v20 = vld [vmem:[%s1530_s1 + $0x58] sm:$0xff] }
 0x126   :  { %v56_v21 = vld [vmem:[%s1530_s1 + $0x138] sm:$0xff]  ;;  %v501_v32 = vadd.f32 %v791_v26, %v28_v20  ;;  %v431_v20 = vpop.f32.mrf.mxu1 }
 0x127   :  { %615 = vst [vmem:[%s1532_s4 + $0x30] sm:$0xff] %v559_v14  ;;  %643 = vst [vmem:[%s1532_s4 + $0x110] sm:$0xff] %v587_v15  ;;  %v529_v33 = vadd.f32 %v833_v27, %v56_v21  ;;  %v803_v27 = vpop.f32.mrf.mxu0 }
 0x128   :  { %v564_v38 = vadd.f32 %v1140_v11, %v501_v32 }
 0x129   :  { %v592_v39 = vadd.f32 %v1140_v11, %v529_v33 }
 0x12e   :  { %v27_v28 = vld [vmem:[%s1530_s1 + $0x50] sm:$0xff] }
 0x12f   :  { %v55_v29 = vld [vmem:[%s1530_s1 + $0x130] sm:$0xff]  ;;  %v500_v40 = vadd.f32 %v261_v34, %v27_v28  ;;  %v845_v28 = vpop.f32.mrf.mxu1 }
 0x130   :  { %618 = vst [vmem:[%s1532_s4 + $0x48] sm:$0xff] %v562_v22  ;;  %646 = vst [vmem:[%s1532_s4 + $0x128] sm:$0xff] %v590_v23  ;;  %v528_v41 = vadd.f32 %v401_v35, %v55_v29  ;;  %v301_v35 = vpop.f32.mrf.mxu0 }
 0x131   :  { %v563_v46 = vadd.f32 %v1140_v11, %v500_v40 }
 0x132   :  { %v591_v47 = vadd.f32 %v1140_v11, %v528_v41 }
 0x137   :  { %v30_v36 = vld [vmem:[%s1530_s1 + $0x68] sm:$0xff] }
 0x138   :  { %v58_v37 = vld [vmem:[%s1530_s1 + $0x148] sm:$0xff]  ;;  %v503_v48 = vadd.f32 %v794_v42, %v30_v36  ;;  %v441_v36 = vpop.f32.mrf.mxu1 }
 0x139   :  { %617 = vst [vmem:[%s1532_s4 + $0x40] sm:$0xff] %v561_v30  ;;  %645 = vst [vmem:[%s1532_s4 + $0x120] sm:$0xff] %v589_v31  ;;  %v531_v49 = vadd.f32 %v836_v43, %v58_v37  ;;  %v806_v43 = vpop.f32.mrf.mxu0 }
 0x13a   :  { %v566_v54 = vadd.f32 %v1140_v11, %v503_v48 }
 0x13b   :  { %v594_v55 = vadd.f32 %v1140_v11, %v531_v49 }
 0x140   :  { %v29_v44 = vld [vmem:[%s1530_s1 + $0x60] sm:$0xff] }
 0x141   :  { %v57_v45 = vld [vmem:[%s1530_s1 + $0x140] sm:$0xff]  ;;  %v502_v56 = vadd.f32 %v271_v50, %v29_v44  ;;  %v848_v44 = vpop.f32.mrf.mxu1 }
 0x142   :  { %620 = vst [vmem:[%s1532_s4 + $0x58] sm:$0xff] %v564_v38  ;;  %648 = vst [vmem:[%s1532_s4 + $0x138] sm:$0xff] %v592_v39  ;;  %v530_v57 = vadd.f32 %v411_v51, %v57_v45  ;;  %v311_v51 = vpop.f32.mrf.mxu0 }
 0x143   :  { %v565_v62 = vadd.f32 %v1140_v11, %v502_v56 }
 0x144   :  { %v593_v63 = vadd.f32 %v1140_v11, %v530_v57 }
 0x149   :  { %v32_v52 = vld [vmem:[%s1530_s1 + $0x78] sm:$0xff] }
 0x14a   :  { %v60_v53 = vld [vmem:[%s1530_s1 + $0x158] sm:$0xff]  ;;  %v505_v0 = vadd.f32 %v797_v58, %v32_v52  ;;  %v451_v52 = vpop.f32.mrf.mxu1 }
 0x14b   :  { %619 = vst [vmem:[%s1532_s4 + $0x50] sm:$0xff] %v563_v46  ;;  %647 = vst [vmem:[%s1532_s4 + $0x130] sm:$0xff] %v591_v47  ;;  %v533_v1 = vadd.f32 %v839_v59, %v60_v53  ;;  %v809_v59 = vpop.f32.mrf.mxu0 }
 0x14c   :  { %v568_v6 = vadd.f32 %v1140_v11, %v505_v0 }
 0x14d   :  { %v596_v7 = vadd.f32 %v1140_v11, %v533_v1 }
 0x152   :  { %v31_v60 = vld [vmem:[%s1530_s1 + $0x70] sm:$0xff] }
 0x153   :  { %v59_v61 = vld [vmem:[%s1530_s1 + $0x150] sm:$0xff]  ;;  %v504_v8 = vadd.f32 %v281_v2, %v31_v60  ;;  %v851_v60 = vpop.f32.mrf.mxu1 }
 0x154   :  { %622 = vst [vmem:[%s1532_s4 + $0x68] sm:$0xff] %v566_v54  ;;  %650 = vst [vmem:[%s1532_s4 + $0x148] sm:$0xff] %v594_v55  ;;  %v532_v9 = vadd.f32 %v421_v3, %v59_v61  ;;  %v321_v3 = vpop.f32.mrf.mxu0 }
 0x155   :  { %v567_v15 = vadd.f32 %v1140_v11, %v504_v8 }
 0x156   :  { %v595_v16 = vadd.f32 %v1140_v11, %v532_v9 }
 0x15b   :  { %v34_v4 = vld [vmem:[%s1530_s1 + $0x88] sm:$0xff] }
 0x15c   :  { %v62_v5 = vld [vmem:[%s1530_s1 + $0x168] sm:$0xff]  ;;  %v507_v17 = vadd.f32 %v800_v10, %v34_v4  ;;  %v461_v4 = vpop.f32.mrf.mxu1 }
 0x15d   :  { %621 = vst [vmem:[%s1532_s4 + $0x60] sm:$0xff] %v565_v62  ;;  %649 = vst [vmem:[%s1532_s4 + $0x140] sm:$0xff] %v593_v63  ;;  %v535_v18 = vadd.f32 %v842_v12, %v62_v5  ;;  %v812_v12 = vpop.f32.mrf.mxu0 }
 0x15e   :  { %v570_v23 = vadd.f32 %v1140_v11, %v507_v17 }
 0x15f   :  { %v598_v24 = vadd.f32 %v1140_v11, %v535_v18 }
 0x164   :  { %v33_v13 = vld [vmem:[%s1530_s1 + $0x80] sm:$0xff] }
 0x165   :  { %v61_v14 = vld [vmem:[%s1530_s1 + $0x160] sm:$0xff]  ;;  %v506_v25 = vadd.f32 %v291_v19, %v33_v13  ;;  %v854_v13 = vpop.f32.mrf.mxu1 }
 0x166   :  { %624 = vst [vmem:[%s1532_s4 + $0x78] sm:$0xff] %v568_v6  ;;  %652 = vst [vmem:[%s1532_s4 + $0x158] sm:$0xff] %v596_v7  ;;  %v534_v26 = vadd.f32 %v431_v20, %v61_v14  ;;  %v331_v20 = vpop.f32.mrf.mxu0 }
 0x167   :  { %v569_v31 = vadd.f32 %v1140_v11, %v506_v25 }
 0x168   :  { %v597_v32 = vadd.f32 %v1140_v11, %v534_v26 }
 0x16d   :  { %v36_v21 = vld [vmem:[%s1530_s1 + $0x98] sm:$0xff] }
 0x16e   :  { %v64_v22 = vld [vmem:[%s1530_s1 + $0x178] sm:$0xff]  ;;  %v509_v33 = vadd.f32 %v803_v27, %v36_v21  ;;  %v471_v21 = vpop.f32.mrf.mxu1 }
 0x16f   :  { %623 = vst [vmem:[%s1532_s4 + $0x70] sm:$0xff] %v567_v15  ;;  %651 = vst [vmem:[%s1532_s4 + $0x150] sm:$0xff] %v595_v16  ;;  %v537_v34 = vadd.f32 %v845_v28, %v64_v22  ;;  %v815_v28 = vpop.f32.mrf.mxu0 }
 0x170   :  { %v572_v39 = vadd.f32 %v1140_v11, %v509_v33 }
 0x171   :  { %v600_v40 = vadd.f32 %v1140_v11, %v537_v34 }
 0x176   :  { %v35_v29 = vld [vmem:[%s1530_s1 + $0x90] sm:$0xff] }
 0x177   :  { %v63_v30 = vld [vmem:[%s1530_s1 + $0x170] sm:$0xff]  ;;  %v508_v41 = vadd.f32 %v301_v35, %v35_v29  ;;  %v857_v29 = vpop.f32.mrf.mxu1 }
 0x178   :  { %626 = vst [vmem:[%s1532_s4 + $0x88] sm:$0xff] %v570_v23  ;;  %654 = vst [vmem:[%s1532_s4 + $0x168] sm:$0xff] %v598_v24  ;;  %v536_v42 = vadd.f32 %v441_v36, %v63_v30  ;;  %v341_v36 = vpop.f32.mrf.mxu0 }
 0x179   :  { %v571_v47 = vadd.f32 %v1140_v11, %v508_v41 }
 0x17a   :  { %v599_v48 = vadd.f32 %v1140_v11, %v536_v42 }
 0x17f   :  { %v38_v37 = vld [vmem:[%s1530_s1 + $0xa8] sm:$0xff] }
 0x180   :  { %v66_v38 = vld [vmem:[%s1530_s1 + $0x188] sm:$0xff]  ;;  %v511_v49 = vadd.f32 %v806_v43, %v38_v37  ;;  %v481_v37 = vpop.f32.mrf.mxu1 }
 0x181   :  { %625 = vst [vmem:[%s1532_s4 + $0x80] sm:$0xff] %v569_v31  ;;  %653 = vst [vmem:[%s1532_s4 + $0x160] sm:$0xff] %v597_v32  ;;  %v539_v50 = vadd.f32 %v848_v44, %v66_v38 }
 0x182   :  { %v574_v55 = vadd.f32 %v1140_v11, %v511_v49 }
 0x183   :  { %v602_v56 = vadd.f32 %v1140_v11, %v539_v50 }
 0x188   :  { %v37_v45 = vld [vmem:[%s1530_s1 + $0xa0] sm:$0xff] }
 0x189   :  { %v65_v46 = vld [vmem:[%s1530_s1 + $0x180] sm:$0xff]  ;;  %v510_v57 = vadd.f32 %v311_v51, %v37_v45 }
 0x18a   :  { %628 = vst [vmem:[%s1532_s4 + $0x98] sm:$0xff] %v572_v39  ;;  %656 = vst [vmem:[%s1532_s4 + $0x178] sm:$0xff] %v600_v40  ;;  %v538_v58 = vadd.f32 %v451_v52, %v65_v46 }
 0x18b   :  { %v573_v63 = vadd.f32 %v1140_v11, %v510_v57 }
 0x18c   :  { %v601_v0 = vadd.f32 %v1140_v11, %v538_v58 }
 0x191   :  { %v40_v53 = vld [vmem:[%s1530_s1 + $0xb8] sm:$0xff] }
 0x192   :  { %v68_v54 = vld [vmem:[%s1530_s1 + $0x198] sm:$0xff]  ;;  %v513_v1 = vadd.f32 %v809_v59, %v40_v53 }
 0x193   :  { %627 = vst [vmem:[%s1532_s4 + $0x90] sm:$0xff] %v571_v47  ;;  %655 = vst [vmem:[%s1532_s4 + $0x170] sm:$0xff] %v599_v48  ;;  %v541_v2 = vadd.f32 %v851_v60, %v68_v54 }
 0x194   :  { %v576_v7 = vadd.f32 %v1140_v11, %v513_v1 }
 0x195   :  { %v604_v8 = vadd.f32 %v1140_v11, %v541_v2 }
 0x19a   :  { %v39_v61 = vld [vmem:[%s1530_s1 + $0xb0] sm:$0xff] }
 0x19b   :  { %v67_v62 = vld [vmem:[%s1530_s1 + $0x190] sm:$0xff]  ;;  %v512_v9 = vadd.f32 %v321_v3, %v39_v61 }
 0x19c   :  { %630 = vst [vmem:[%s1532_s4 + $0xa8] sm:$0xff] %v574_v55  ;;  %658 = vst [vmem:[%s1532_s4 + $0x188] sm:$0xff] %v602_v56  ;;  %v540_v10 = vadd.f32 %v461_v4, %v67_v62 }
 0x19d   :  { %v575_v16 = vadd.f32 %v1140_v11, %v512_v9 }
 0x19e   :  { %v603_v17 = vadd.f32 %v1140_v11, %v540_v10 }
 0x1a3   :  { %v42_v5 = vld [vmem:[%s1530_s1 + $0xc8] sm:$0xff] }
 0x1a4   :  { %v70_v6 = vld [vmem:[%s1530_s1 + $0x1a8] sm:$0xff]  ;;  %v515_v18 = vadd.f32 %v812_v12, %v42_v5 }
 0x1a5   :  { %629 = vst [vmem:[%s1532_s4 + $0xa0] sm:$0xff] %v573_v63  ;;  %657 = vst [vmem:[%s1532_s4 + $0x180] sm:$0xff] %v601_v0  ;;  %v543_v19 = vadd.f32 %v854_v13, %v70_v6 }
 0x1a6   :  { %v578_v24 = vadd.f32 %v1140_v11, %v515_v18 }
 0x1a7   :  { %v606_v25 = vadd.f32 %v1140_v11, %v543_v19 }
 0x1ac   :  { %v41_v14 = vld [vmem:[%s1530_s1 + $0xc0] sm:$0xff] }
 0x1ad   :  { %v69_v15 = vld [vmem:[%s1530_s1 + $0x1a0] sm:$0xff]  ;;  %v514_v26 = vadd.f32 %v331_v20, %v41_v14 }
 0x1ae   :  { %632 = vst [vmem:[%s1532_s4 + $0xb8] sm:$0xff] %v576_v7  ;;  %660 = vst [vmem:[%s1532_s4 + $0x198] sm:$0xff] %v604_v8  ;;  %v542_v27 = vadd.f32 %v471_v21, %v69_v15 }
 0x1af   :  { %v577_v32 = vadd.f32 %v1140_v11, %v514_v26 }
 0x1b0   :  { %v605_v33 = vadd.f32 %v1140_v11, %v542_v27 }
 0x1b5   :  { %v44_v22 = vld [vmem:[%s1530_s1 + $0xd8] sm:$0xff] }
 0x1b6   :  { %v72_v23 = vld [vmem:[%s1530_s1 + $0x1b8] sm:$0xff]  ;;  %v517_v34 = vadd.f32 %v815_v28, %v44_v22 }
 0x1b7   :  { %631 = vst [vmem:[%s1532_s4 + $0xb0] sm:$0xff] %v575_v16  ;;  %659 = vst [vmem:[%s1532_s4 + $0x190] sm:$0xff] %v603_v17  ;;  %v545_v35 = vadd.f32 %v857_v29, %v72_v23 }
 0x1b8   :  { %v580_v38 = vadd.f32 %v1140_v11, %v517_v34 }
 0x1b9   :  { %v608_v39 = vadd.f32 %v1140_v11, %v545_v35 }
 0x1be   :  { %v43_v30 = vld [vmem:[%s1530_s1 + $0xd0] sm:$0xff] }
 0x1bf   :  { %v71_v31 = vld [vmem:[%s1530_s1 + $0x1b0] sm:$0xff]  ;;  %v516_v40 = vadd.f32 %v341_v36, %v43_v30 }
 0x1c0   :  { %634 = vst [vmem:[%s1532_s4 + $0xc8] sm:$0xff] %v578_v24  ;;  %662 = vst [vmem:[%s1532_s4 + $0x1a8] sm:$0xff] %v606_v25  ;;  %v544_v41 = vadd.f32 %v481_v37, %v71_v31 }
 0x1c1   :  { %633 = vst [vmem:[%s1532_s4 + $0xc0] sm:$0xff] %v577_v32  ;;  %661 = vst [vmem:[%s1532_s4 + $0x1a0] sm:$0xff] %v605_v33  ;;  %v579_v42 = vadd.f32 %v1140_v11, %v516_v40 }
 0x1c2   :  { %636 = vst [vmem:[%s1532_s4 + $0xd8] sm:$0xff] %v580_v38  ;;  %664 = vst [vmem:[%s1532_s4 + $0x1b8] sm:$0xff] %v608_v39  ;;  %v607_v43 = vadd.f32 %v1140_v11, %v544_v41 }
 0x1c3   :  { %635 = vst [vmem:[%s1532_s4 + $0xd0] sm:$0xff] %v579_v42 }
 0x1c4   :  { %663 = vst [vmem:[%s1532_s4 + $0x1b0] sm:$0xff] %v607_v43 }

// kernel: rsnet_2d_forward.11
= control target key start
LH: loop header
LB: loop body
LE: loop exit
PB: predicated region body
PF: predicated region fallthrough
CT: control target
= control target key end

     0   :  { %s2894_s20 = smov 0   ;;  %s4304_s0 = inlined_call_operand.vmem [shape: f32[8,4096], index: 0, kind: input, shape index: {}]   ;;  %s4305_s1 = inlined_call_operand.vmem [shape: f32[128,8], index: 1, kind: input, shape index: {}]   ;;  %s4306_s2 = inlined_call_operand.vmem [shape: f32[128,1], index: 2, kind: input, shape index: {}]   ;;  %s4307_s3 = inlined_call_operand.vmem [shape: f32[1,128], index: 3, kind: input, shape index: {}]   ;;  %s4308_s4 = inlined_call_operand.<no memory space> [shape: f32[1,1], index: 4, kind: input, shape index: {}]   ;;  %s4309_s5 = inlined_call_operand.vmem [shape: f32[2,1,2048], index: 5, kind: output, shape index: {}]  }
   0x1   :  { %v10_v0 = vstv %s4308_s4 }
   0x2   :  { %11 = vst [vmem:[#allocation2] sm:$0x1] %v10_v0 }
   0x3 LB: > { %s2900_s21 = sadd.s32 4294967295, %s2856_s20   ;;  %p2702_p0 = scmp.ge.s32.totalorder %s2856_s20, 1  ;;  %s2856_s20 = sphi %s2894_s20, %s17_s20  }
   0x4   : > { %p190_p1 = scmp.lt.s32.totalorder %s2856_s20, 3 }
   0x6   : > { %p191_p2 = pnand %p2702_p0, %p190_p1 }
   0x8   : > { %194 = sbr.rel (%p191_p2) target bundleno = 713 (0x2c9), region = 40 }
   0xd   : > { %s2703_s22 = sshll.u32 %s2900_s21, 4  ;;  %v4310_v1 = vmov 0.0   ;;  %v2859_v2 = vmov 0   ;;  %v272_v3 = vld [vmem:[%s4306_s2 + $0x68] sm:$0xff]  ;;  %v274_v4 = vld [vmem:[%s4306_s2 + $0x78] sm:$0xff]  ;;  %v2921_v5 = vld [vmem:[%s4305_s1] sm:$0xff] }
   0xe   : > { %p218_p3 = scmp.lt.s32.totalorder %s2703_s22, 31  ;;  %468 = vmatprep.mubr.f32.mxu0 %v4310_v1  ;;  %629 = vmatprep.mubr.f32.mxu1 %v4310_v1  ;;  %vm355_vm0 = vcmask 64512   ;;  %v2938_v14 = vld [vmem:[%s4305_s1 + $0x8] sm:$0xff]  ;;  %v271_v15 = vld [vmem:[%s4306_s2 + $0x60] sm:$0xff]  ;;  %v273_v16 = vld [vmem:[%s4306_s2 + $0x70] sm:$0xff]  ;;  %p223_p4 = scmp.lt.s32.totalorder %s2900_s21, 1 }
   0xf   : > { %2848 = vset.pattern.permute.xlu1 %v2859_v2  ;;  %2847 = vset.pattern.permute.xlu0 %v2859_v2  ;;  %v2959_v19 = vld [vmem:[%s4305_s1 + $0x10] sm:$0xff]  ;;  %v270_v21 = vld [vmem:[%s4306_s2 + $0x58] sm:$0xff]  ;;  %v267_v23 = vld [vmem:[%s4306_s2 + $0x40] sm:$0xff] }
  0x10   : > { %s4554_s22 = smov (!%p218_p3, %s2703_s22), 31  ;;  %342 = vperm.xlu1 %2848, %v272_v3   ;;  %352 = vperm.xlu0 %2847, %v274_v4   ;;  %v269_v20 = vld [vmem:[%s4306_s2 + $0x50] sm:$0xff]  ;;  %v2976_v22 = vld [vmem:[%s4305_s1 + $0x18] sm:$0xff]  ;;  %v268_v24 = vld [vmem:[%s4306_s2 + $0x48] sm:$0xff]  ;;  %s4556_s21 = smov (!%p223_p4, %s2900_s21), 1 }
  0x11   : > { %s2704_s26 = sshll.u32 %s4554_s22, 3  ;;  %v2993_v25 = vld [vmem:[%s4305_s1 + $0x20] sm:$0xff]  ;;  %v265_v26 = vld [vmem:[%s4306_s2 + $0x30] sm:$0xff]  ;;  %v266_v27 = vld [vmem:[%s4306_s2 + $0x38] sm:$0xff]  ;;  %s2705_s23 = sshll.u32 %s4556_s21, 4 }
  0x12   : > { %s2916_s29 = scalar_lea.vmem %s4304_s0, %s2704_s26  ;;  %v3010_v28 = vld [vmem:[%s4305_s1 + $0x28] sm:$0xff]  ;;  %v263_v29 = vld [vmem:[%s4306_s2 + $0x20] sm:$0xff]  ;;  %v3027_v31 = vld [vmem:[%s4305_s1 + $0x30] sm:$0xff]  ;;  %s4297_s26 = scalar_lea.vmem %s4309_s5, %s2705_s23 }
  0x13   : > { %v244_v6 = vld [vmem:[%s2916_s29 + $0x8] sm:$0xff]  ;;  %v246_v7 = vld [vmem:[%s2916_s29 + $0x18] sm:$0xff]  ;;  %v243_v8 = vld [vmem:[%s2916_s29] sm:$0xff] }
  0x14   : > { %434 = vmatprep.subr.mxu0 %v244_v6  ;;  %595 = vmatprep.subr.mxu1 %v246_v7  ;;  %v245_v9 = vld [vmem:[%s2916_s29 + $0x10] sm:$0xff]  ;;  %v248_v10 = vld [vmem:[%s2916_s29 + $0x28] sm:$0xff]  ;;  %v250_v11 = vld [vmem:[%s2916_s29 + $0x38] sm:$0xff] }
  0x15   : > { %435 = vmatpush1.msra.mxu0 %v243_v8  ;;  %596 = vmatpush1.msra.mxu1 %v245_v9  ;;  %v247_v12 = vld [vmem:[%s2916_s29 + $0x20] sm:$0xff]  ;;  %v249_v13 = vld [vmem:[%s2916_s29 + $0x30] sm:$0xff]  ;;  %v252_v17 = vld [vmem:[%s2916_s29 + $0x48] sm:$0xff] }
  0x16   : > { %2706 = vmatmul.mubr.msk.f32.vlgmr.msra.gmra.mxu0 %vm355_vm0, %v2921_v5  ;;  %2722 = vmatmul.mubr.msk.f32.vlgmr.msra.gmra.mxu1 %vm355_vm0, %v2921_v5  ;;  %v254_v18 = vld [vmem:[%s2916_s29 + $0x58] sm:$0xff]  ;;  %v264_v30 = vld [vmem:[%s4306_s2 + $0x28] sm:$0xff]  ;;  %v261_v32 = vld [vmem:[%s4306_s2 + $0x10] sm:$0xff] }
  0x17   : > { %756 = vmatprep.subr.mxu0 %v248_v10  ;;  %917 = vmatprep.subr.mxu1 %v250_v11  ;;  %v262_v33 = vld [vmem:[%s4306_s2 + $0x18] sm:$0xff]  ;;  %v259_v35 = vld [vmem:[%s4306_s2] sm:$0xff]  ;;  %v260_v36 = vld [vmem:[%s4306_s2 + $0x8] sm:$0xff] }
  0x18   : > { %757 = vmatpush1.msra.mxu0 %v247_v12  ;;  %918 = vmatpush1.msra.mxu1 %v249_v13  ;;  %v3044_v34 = vld [vmem:[%s4305_s1 + $0x38] sm:$0xff]  ;;  %v3061_v37 = vld [vmem:[%s4305_s1 + $0x40] sm:$0xff]  ;;  %v3072_v38 = vld [vmem:[%s4305_s1 + $0x48] sm:$0xff] }
  0x19   : > { %474 = vmatprep.mubr.f32.mxu0 %v4310_v1  ;;  %635 = vmatprep.mubr.f32.mxu1 %v4310_v1  ;;  %v3083_v39 = vld [vmem:[%s4305_s1 + $0x50] sm:$0xff]  ;;  %v3094_v40 = vld [vmem:[%s4305_s1 + $0x58] sm:$0xff]  ;;  %v3105_v41 = vld [vmem:[%s4305_s1 + $0x60] sm:$0xff] }
  0x1a   : > { %2707 = vmatmul.mubr.msk.f32.gmra.mxu0 %vm355_vm0, %v2938_v14  ;;  %2723 = vmatmul.mubr.msk.f32.gmra.mxu1 %vm355_vm0, %v2938_v14  ;;  %v3116_v42 = vld [vmem:[%s4305_s1 + $0x68] sm:$0xff]  ;;  %v3127_v43 = vld [vmem:[%s4305_s1 + $0x70] sm:$0xff]  ;;  %v3138_v44 = vld [vmem:[%s4305_s1 + $0x78] sm:$0xff] }
  0x1b   : > { %480 = vmatprep.mubr.f32.mxu0 %v4310_v1  ;;  %641 = vmatprep.mubr.f32.mxu1 %v4310_v1  ;;  %v251_v45 = vld [vmem:[%s2916_s29 + $0x40] sm:$0xff]  ;;  %v253_v46 = vld [vmem:[%s2916_s29 + $0x50] sm:$0xff]  ;;  %v256_v47 = vld [vmem:[%s2916_s29 + $0x68] sm:$0xff] }
  0x1c   : > { %337 = vperm.xlu1 %2848, %v271_v15   ;;  %347 = vperm.xlu0 %2847, %v273_v16   ;;  %v258_v48 = vld [vmem:[%s2916_s29 + $0x78] sm:$0xff]  ;;  %v1949_v49 = vld [vmem:[#allocation2] sm:$0x1]  ;;  %v257_v51 = vld [vmem:[%s2916_s29 + $0x70] sm:$0xff] }
  0x1d   : > { %1078 = vmatprep.subr.mxu0 %v252_v17  ;;  %1239 = vmatprep.subr.mxu1 %v254_v18  ;;  %v255_v50 = vld [vmem:[%s2916_s29 + $0x60] sm:$0xff] }
  0x1e   : > { %2708 = vmatmul.mubr.msk.f32.gmra.mxu0 %vm355_vm0, %v2959_v19  ;;  %2724 = vmatmul.mubr.msk.f32.gmra.mxu1 %vm355_vm0, %v2959_v19 }
  0x1f   : > { %486 = vmatprep.mubr.f32.mxu0 %v4310_v1  ;;  %647 = vmatprep.mubr.f32.mxu1 %v4310_v1 }
  0x20   : > { %327 = vperm.xlu1 %2848, %v269_v20   ;;  %332 = vperm.xlu0 %2847, %v270_v21  }
  0x22   : > { %2709 = vmatmul.mubr.msk.f32.gmra.mxu0 %vm355_vm0, %v2976_v22  ;;  %2725 = vmatmul.mubr.msk.f32.gmra.mxu1 %vm355_vm0, %v2976_v22 }
  0x23   : > { %492 = vmatprep.mubr.f32.mxu0 %v4310_v1  ;;  %653 = vmatprep.mubr.f32.mxu1 %v4310_v1 }
  0x24   : > { %317 = vperm.xlu1 %2848, %v267_v23   ;;  %322 = vperm.xlu0 %2847, %v268_v24  }
  0x26   : > { %2710 = vmatmul.mubr.msk.f32.gmra.mxu0 %vm355_vm0, %v2993_v25  ;;  %2726 = vmatmul.mubr.msk.f32.gmra.mxu1 %vm355_vm0, %v2993_v25 }
  0x27   : > { %498 = vmatprep.mubr.f32.mxu0 %v4310_v1  ;;  %659 = vmatprep.mubr.f32.mxu1 %v4310_v1 }
  0x28   : > { %307 = vperm.xlu1 %2848, %v265_v26   ;;  %312 = vperm.xlu0 %2847, %v266_v27  }
  0x2a   : > { %2711 = vmatmul.mubr.msk.f32.gmra.mxu0 %vm355_vm0, %v3010_v28  ;;  %2727 = vmatmul.mubr.msk.f32.gmra.mxu1 %vm355_vm0, %v3010_v28 }
  0x2b   : > { %504 = vmatprep.mubr.f32.mxu0 %v4310_v1  ;;  %665 = vmatprep.mubr.f32.mxu1 %v4310_v1 }
  0x2c   : > { %297 = vperm.xlu1 %2848, %v263_v29   ;;  %302 = vperm.xlu0 %2847, %v264_v30  }
  0x2e   : > { %2712 = vmatmul.mubr.msk.f32.gmra.mxu0 %vm355_vm0, %v3027_v31  ;;  %2728 = vmatmul.mubr.msk.f32.gmra.mxu1 %vm355_vm0, %v3027_v31 }
  0x2f   : > { %510 = vmatprep.mubr.f32.mxu0 %v4310_v1  ;;  %671 = vmatprep.mubr.f32.mxu1 %v4310_v1 }
  0x30   : > { %287 = vperm.xlu1 %2848, %v261_v32   ;;  %292 = vperm.xlu0 %2847, %v262_v33  }
  0x32   : > { %2713 = vmatmul.mubr.msk.f32.gmra.mxu0 %vm355_vm0, %v3044_v34  ;;  %2729 = vmatmul.mubr.msk.f32.gmra.mxu1 %vm355_vm0, %v3044_v34 }
  0x33   : > { %516 = vmatprep.mubr.f32.mxu0 %v4310_v1  ;;  %677 = vmatprep.mubr.f32.mxu1 %v4310_v1 }
  0x34   : > { %277 = vperm.xlu1 %2848, %v259_v35   ;;  %282 = vperm.xlu0 %2847, %v260_v36  }
  0x36   : > { %2714 = vmatmul.mubr.msk.f32.gmra.mxu0 %vm355_vm0, %v3061_v37  ;;  %2730 = vmatmul.mubr.msk.f32.gmra.mxu1 %vm355_vm0, %v3061_v37 }
  0x37   : > { %522 = vmatprep.mubr.f32.mxu0 %v4310_v1  ;;  %683 = vmatprep.mubr.f32.mxu1 %v4310_v1 }
  0x38   : > { %1952 = vperm.xlu0 %2847, %v1949_v49  }
  0x3a   : > { %2715 = vmatmul.mubr.msk.f32.gmra.mxu0 %vm355_vm0, %v3072_v38  ;;  %2731 = vmatmul.mubr.msk.f32.gmra.mxu1 %vm355_vm0, %v3072_v38 }
  0x3b   : > { %528 = vmatprep.mubr.f32.mxu0 %v4310_v1  ;;  %689 = vmatprep.mubr.f32.mxu1 %v4310_v1 }
  0x3e   : > { %2716 = vmatmul.mubr.msk.f32.gmra.mxu0 %vm355_vm0, %v3083_v39  ;;  %2732 = vmatmul.mubr.msk.f32.gmra.mxu1 %vm355_vm0, %v3083_v39 }
  0x3f   : > { %534 = vmatprep.mubr.f32.mxu0 %v4310_v1  ;;  %695 = vmatprep.mubr.f32.mxu1 %v4310_v1 }
  0x42   : > { %2717 = vmatmul.mubr.msk.f32.gmra.mxu0 %vm355_vm0, %v3094_v40  ;;  %2733 = vmatmul.mubr.msk.f32.gmra.mxu1 %vm355_vm0, %v3094_v40 }
  0x43   : > { %540 = vmatprep.mubr.f32.mxu0 %v4310_v1  ;;  %701 = vmatprep.mubr.f32.mxu1 %v4310_v1 }
  0x46   : > { %2718 = vmatmul.mubr.msk.f32.gmra.mxu0 %vm355_vm0, %v3105_v41  ;;  %2734 = vmatmul.mubr.msk.f32.gmra.mxu1 %vm355_vm0, %v3105_v41 }
  0x47   : > { %546 = vmatprep.mubr.f32.mxu0 %v4310_v1  ;;  %707 = vmatprep.mubr.f32.mxu1 %v4310_v1 }
  0x4a   : > { %2719 = vmatmul.mubr.msk.f32.gmra.mxu0 %vm355_vm0, %v3116_v42  ;;  %2735 = vmatmul.mubr.msk.f32.gmra.mxu1 %vm355_vm0, %v3116_v42 }
  0x4b   : > { %552 = vmatprep.mubr.f32.mxu0 %v4310_v1  ;;  %713 = vmatprep.mubr.f32.mxu1 %v4310_v1 }
  0x4e   : > { %2720 = vmatmul.mubr.msk.f32.gmra.mxu0 %vm355_vm0, %v3127_v43  ;;  %2736 = vmatmul.mubr.msk.f32.gmra.mxu1 %vm355_vm0, %v3127_v43 }
  0x4f   : > { %558 = vmatprep.mubr.f32.mxu0 %v4310_v1  ;;  %719 = vmatprep.mubr.f32.mxu1 %v4310_v1 }
  0x52   : > { %2721 = vmatmul.mubr.msk.f32.gmra.mxu0 %vm355_vm0, %v3138_v44  ;;  %2737 = vmatmul.mubr.msk.f32.gmra.mxu1 %vm355_vm0, %v3138_v44 }
  0x53   : > { %790 = vmatprep.mubr.f32.mxu0 %v4310_v1  ;;  %951 = vmatprep.mubr.f32.mxu1 %v4310_v1 }
  0x56   : > { %2738 = vmatmul.mubr.msk.f32.vlgmr.msra.gmra.mxu0 %vm355_vm0, %v2921_v5  ;;  %2754 = vmatmul.mubr.msk.f32.vlgmr.msra.gmra.mxu1 %vm355_vm0, %v2921_v5 }
  0x57   : > { %1079 = vmatpush1.msra.mxu0 %v251_v45  ;;  %1240 = vmatpush1.msra.mxu1 %v253_v46 }
  0x58   : > { %796 = vmatprep.mubr.f32.mxu0 %v4310_v1  ;;  %957 = vmatprep.mubr.f32.mxu1 %v4310_v1 }
  0x59   : > { %1400 = vmatprep.subr.mxu0 %v256_v47  ;;  %1561 = vmatprep.subr.mxu1 %v258_v48 }
  0x5a   : > { %2739 = vmatmul.mubr.msk.f32.gmra.mxu0 %vm355_vm0, %v2938_v14  ;;  %2755 = vmatmul.mubr.msk.f32.gmra.mxu1 %vm355_vm0, %v2938_v14 }
  0x5b   : > { %802 = vmatprep.mubr.f32.mxu0 %v4310_v1  ;;  %963 = vmatprep.mubr.f32.mxu1 %v4310_v1 }
  0x5e   : > { %2740 = vmatmul.mubr.msk.f32.gmra.mxu0 %vm355_vm0, %v2959_v19  ;;  %2756 = vmatmul.mubr.msk.f32.gmra.mxu1 %vm355_vm0, %v2959_v19 }
  0x5f   : > { %808 = vmatprep.mubr.f32.mxu0 %v4310_v1  ;;  %969 = vmatprep.mubr.f32.mxu1 %v4310_v1 }
  0x62   : > { %2741 = vmatmul.mubr.msk.f32.gmra.mxu0 %vm355_vm0, %v2976_v22  ;;  %2757 = vmatmul.mubr.msk.f32.gmra.mxu1 %vm355_vm0, %v2976_v22 }
  0x63   : > { %814 = vmatprep.mubr.f32.mxu0 %v4310_v1  ;;  %975 = vmatprep.mubr.f32.mxu1 %v4310_v1 }
  0x66   : > { %2742 = vmatmul.mubr.msk.f32.gmra.mxu0 %vm355_vm0, %v2993_v25  ;;  %2758 = vmatmul.mubr.msk.f32.gmra.mxu1 %vm355_vm0, %v2993_v25 }
  0x67   : > { %820 = vmatprep.mubr.f32.mxu0 %v4310_v1  ;;  %981 = vmatprep.mubr.f32.mxu1 %v4310_v1 }
  0x6a   : > { %2743 = vmatmul.mubr.msk.f32.gmra.mxu0 %vm355_vm0, %v3010_v28  ;;  %2759 = vmatmul.mubr.msk.f32.gmra.mxu1 %vm355_vm0, %v3010_v28 }
  0x6b   : > { %826 = vmatprep.mubr.f32.mxu0 %v4310_v1  ;;  %987 = vmatprep.mubr.f32.mxu1 %v4310_v1 }
  0x6e   : > { %2744 = vmatmul.mubr.msk.f32.gmra.mxu0 %vm355_vm0, %v3027_v31  ;;  %2760 = vmatmul.mubr.msk.f32.gmra.mxu1 %vm355_vm0, %v3027_v31 }
  0x6f   : > { %832 = vmatprep.mubr.f32.mxu0 %v4310_v1  ;;  %993 = vmatprep.mubr.f32.mxu1 %v4310_v1 }
  0x72   : > { %2745 = vmatmul.mubr.msk.f32.gmra.mxu0 %vm355_vm0, %v3044_v34  ;;  %2761 = vmatmul.mubr.msk.f32.gmra.mxu1 %vm355_vm0, %v3044_v34 }
  0x73   : > { %838 = vmatprep.mubr.f32.mxu0 %v4310_v1  ;;  %999 = vmatprep.mubr.f32.mxu1 %v4310_v1 }
  0x76   : > { %2746 = vmatmul.mubr.msk.f32.gmra.mxu0 %vm355_vm0, %v3061_v37  ;;  %2762 = vmatmul.mubr.msk.f32.gmra.mxu1 %vm355_vm0, %v3061_v37 }
  0x77   : > { %844 = vmatprep.mubr.f32.mxu0 %v4310_v1  ;;  %1005 = vmatprep.mubr.f32.mxu1 %v4310_v1 }
  0x7a   : > { %2747 = vmatmul.mubr.msk.f32.gmra.mxu0 %vm355_vm0, %v3072_v38  ;;  %2763 = vmatmul.mubr.msk.f32.gmra.mxu1 %vm355_vm0, %v3072_v38 }
  0x7b   : > { %850 = vmatprep.mubr.f32.mxu0 %v4310_v1  ;;  %1011 = vmatprep.mubr.f32.mxu1 %v4310_v1 }
  0x7e   : > { %2748 = vmatmul.mubr.msk.f32.gmra.mxu0 %vm355_vm0, %v3083_v39  ;;  %2764 = vmatmul.mubr.msk.f32.gmra.mxu1 %vm355_vm0, %v3083_v39 }
  0x7f   : > { %856 = vmatprep.mubr.f32.mxu0 %v4310_v1  ;;  %1017 = vmatprep.mubr.f32.mxu1 %v4310_v1 }
  0x82   : > { %2749 = vmatmul.mubr.msk.f32.gmra.mxu0 %vm355_vm0, %v3094_v40  ;;  %2765 = vmatmul.mubr.msk.f32.gmra.mxu1 %vm355_vm0, %v3094_v40 }
  0x83   : > { %862 = vmatprep.mubr.f32.mxu0 %v4310_v1  ;;  %1023 = vmatprep.mubr.f32.mxu1 %v4310_v1 }
  0x86   : > { %2750 = vmatmul.mubr.msk.f32.gmra.mxu0 %vm355_vm0, %v3105_v41  ;;  %2766 = vmatmul.mubr.msk.f32.gmra.mxu1 %vm355_vm0, %v3105_v41 }
  0x87   : > { %868 = vmatprep.mubr.f32.mxu0 %v4310_v1  ;;  %1029 = vmatprep.mubr.f32.mxu1 %v4310_v1 }
  0x8a   : > { %2751 = vmatmul.mubr.msk.f32.gmra.mxu0 %vm355_vm0, %v3116_v42  ;;  %2767 = vmatmul.mubr.msk.f32.gmra.mxu1 %vm355_vm0, %v3116_v42 }
  0x8b   : > { %874 = vmatprep.mubr.f32.mxu0 %v4310_v1  ;;  %1035 = vmatprep.mubr.f32.mxu1 %v4310_v1  ;;  %v3506_v35 = vpop.permute.xlu0 %352 }
  0x8c   : > { %4363 = vst [vmem:[#allocation22_spill] sm:$0xff] %v3506_v35 }
  0x8e   : > { %2752 = vmatmul.mubr.msk.f32.gmra.mxu0 %vm355_vm0, %v3127_v43  ;;  %2768 = vmatmul.mubr.msk.f32.gmra.mxu1 %vm355_vm0, %v3127_v43 }
  0x8f   : > { %880 = vmatprep.mubr.f32.mxu0 %v4310_v1  ;;  %1041 = vmatprep.mubr.f32.mxu1 %v4310_v1 }
  0x92   : > { %2753 = vmatmul.mubr.msk.f32.gmra.mxu0 %vm355_vm0, %v3138_v44  ;;  %2769 = vmatmul.mubr.msk.f32.gmra.mxu1 %vm355_vm0, %v3138_v44 }
  0x93   : > { %1112 = vmatprep.mubr.f32.mxu0 %v4310_v1  ;;  %1273 = vmatprep.mubr.f32.mxu1 %v4310_v1 }
  0x96   : > { %2770 = vmatmul.mubr.msk.f32.vlgmr.msra.gmra.mxu0 %vm355_vm0, %v2921_v5  ;;  %2786 = vmatmul.mubr.msk.f32.vlgmr.msra.gmra.mxu1 %vm355_vm0, %v2921_v5 }
  0x97   : > { %1401 = vmatpush1.msra.mxu0 %v255_v50  ;;  %1562 = vmatpush1.msra.mxu1 %v257_v51  ;;  %v3526_v47 = vpop.permute.xlu0 %347 }
  0x98   : > { %1118 = vmatprep.mubr.f32.mxu0 %v4310_v1  ;;  %1279 = vmatprep.mubr.f32.mxu1 %v4310_v1  ;;  %4364 = vst [vmem:[#allocation23_spill] sm:$0xff] %v3526_v47 }
  0x9a   : > { %2771 = vmatmul.mubr.msk.f32.gmra.mxu0 %vm355_vm0, %v2938_v14  ;;  %2787 = vmatmul.mubr.msk.f32.gmra.mxu1 %vm355_vm0, %v2938_v14 }
  0x9b   : > { %1124 = vmatprep.mubr.f32.mxu0 %v4310_v1  ;;  %1285 = vmatprep.mubr.f32.mxu1 %v4310_v1 }
  0x9e   : > { %2772 = vmatmul.mubr.msk.f32.gmra.mxu0 %vm355_vm0, %v2959_v19  ;;  %2788 = vmatmul.mubr.msk.f32.gmra.mxu1 %vm355_vm0, %v2959_v19 }
  0x9f   : > { %1130 = vmatprep.mubr.f32.mxu0 %v4310_v1  ;;  %1291 = vmatprep.mubr.f32.mxu1 %v4310_v1 }
  0xa2   : > { %2773 = vmatmul.mubr.msk.f32.gmra.mxu0 %vm355_vm0, %v2976_v22  ;;  %2789 = vmatmul.mubr.msk.f32.gmra.mxu1 %vm355_vm0, %v2976_v22 }
  0xa3   : > { %1136 = vmatprep.mubr.f32.mxu0 %v4310_v1  ;;  %1297 = vmatprep.mubr.f32.mxu1 %v4310_v1 }
  0xa6   : > { %2774 = vmatmul.mubr.msk.f32.gmra.mxu0 %vm355_vm0, %v2993_v25  ;;  %2790 = vmatmul.mubr.msk.f32.gmra.mxu1 %vm355_vm0, %v2993_v25 }
  0xa7   : > { %1142 = vmatprep.mubr.f32.mxu0 %v4310_v1  ;;  %1303 = vmatprep.mubr.f32.mxu1 %v4310_v1 }
  0xaa   : > { %2775 = vmatmul.mubr.msk.f32.gmra.mxu0 %vm355_vm0, %v3010_v28  ;;  %2791 = vmatmul.mubr.msk.f32.gmra.mxu1 %vm355_vm0, %v3010_v28 }
  0xab   : > { %1148 = vmatprep.mubr.f32.mxu0 %v4310_v1  ;;  %1309 = vmatprep.mubr.f32.mxu1 %v4310_v1 }
  0xae   : > { %2776 = vmatmul.mubr.msk.f32.gmra.mxu0 %vm355_vm0, %v3027_v31  ;;  %2792 = vmatmul.mubr.msk.f32.gmra.mxu1 %vm355_vm0, %v3027_v31 }
  0xaf   : > { %1154 = vmatprep.mubr.f32.mxu0 %v4310_v1  ;;  %1315 = vmatprep.mubr.f32.mxu1 %v4310_v1 }
  0xb2   : > { %2777 = vmatmul.mubr.msk.f32.gmra.mxu0 %vm355_vm0, %v3044_v34  ;;  %2793 = vmatmul.mubr.msk.f32.gmra.mxu1 %vm355_vm0, %v3044_v34 }
  0xb3   : > { %1160 = vmatprep.mubr.f32.mxu0 %v4310_v1  ;;  %1321 = vmatprep.mubr.f32.mxu1 %v4310_v1 }
  0xb6   : > { %2778 = vmatmul.mubr.msk.f32.gmra.mxu0 %vm355_vm0, %v3061_v37  ;;  %2794 = vmatmul.mubr.msk.f32.gmra.mxu1 %vm355_vm0, %v3061_v37 }
  0xb7   : > { %1166 = vmatprep.mubr.f32.mxu0 %v4310_v1  ;;  %1327 = vmatprep.mubr.f32.mxu1 %v4310_v1 }
  0xba   : > { %2779 = vmatmul.mubr.msk.f32.gmra.mxu0 %vm355_vm0, %v3072_v38  ;;  %2795 = vmatmul.mubr.msk.f32.gmra.mxu1 %vm355_vm0, %v3072_v38 }
  0xbb   : > { %1172 = vmatprep.mubr.f32.mxu0 %v4310_v1  ;;  %1333 = vmatprep.mubr.f32.mxu1 %v4310_v1 }
  0xbe   : > { %2780 = vmatmul.mubr.msk.f32.gmra.mxu0 %vm355_vm0, %v3083_v39  ;;  %2796 = vmatmul.mubr.msk.f32.gmra.mxu1 %vm355_vm0, %v3083_v39 }
  0xbf   : > { %1178 = vmatprep.mubr.f32.mxu0 %v4310_v1  ;;  %1339 = vmatprep.mubr.f32.mxu1 %v4310_v1 }
  0xc2   : > { %2781 = vmatmul.mubr.msk.f32.gmra.mxu0 %vm355_vm0, %v3094_v40  ;;  %2797 = vmatmul.mubr.msk.f32.gmra.mxu1 %vm355_vm0, %v3094_v40 }
  0xc3   : > { %1184 = vmatprep.mubr.f32.mxu0 %v4310_v1  ;;  %1345 = vmatprep.mubr.f32.mxu1 %v4310_v1 }
  0xc6   : > { %2782 = vmatmul.mubr.msk.f32.gmra.mxu0 %vm355_vm0, %v3105_v41  ;;  %2798 = vmatmul.mubr.msk.f32.gmra.mxu1 %vm355_vm0, %v3105_v41 }
  0xc7   : > { %1190 = vmatprep.mubr.f32.mxu0 %v4310_v1  ;;  %1351 = vmatprep.mubr.f32.mxu1 %v4310_v1 }
  0xca   : > { %2783 = vmatmul.mubr.msk.f32.gmra.mxu0 %vm355_vm0, %v3116_v42  ;;  %2799 = vmatmul.mubr.msk.f32.gmra.mxu1 %vm355_vm0, %v3116_v42 }
  0xcb   : > { %1196 = vmatprep.mubr.f32.mxu0 %v4310_v1  ;;  %1357 = vmatprep.mubr.f32.mxu1 %v4310_v1 }
  0xce   : > { %2784 = vmatmul.mubr.msk.f32.gmra.mxu0 %vm355_vm0, %v3127_v43  ;;  %2800 = vmatmul.mubr.msk.f32.gmra.mxu1 %vm355_vm0, %v3127_v43 }
  0xcf   : > { %1202 = vmatprep.mubr.f32.mxu0 %v4310_v1  ;;  %1363 = vmatprep.mubr.f32.mxu1 %v4310_v1 }
  0xd2   : > { %2785 = vmatmul.mubr.msk.f32.gmra.mxu0 %vm355_vm0, %v3138_v44  ;;  %2801 = vmatmul.mubr.msk.f32.gmra.mxu1 %vm355_vm0, %v3138_v44 }
  0xd3   : > { %1434 = vmatprep.mubr.f32.mxu0 %v4310_v1  ;;  %1595 = vmatprep.mubr.f32.mxu1 %v4310_v1 }
  0xd6   : > { %v3344_v52 = vpop.f32.mrf.mxu0  ;;  %v3346_v53 = vpop.f32.mrf.mxu1  ;;  %2802 = vmatmul.mubr.msk.f32.vlgmr.msra.gmra.mxu0 %vm355_vm0, %v2921_v5  ;;  %2818 = vmatmul.mubr.msk.f32.vlgmr.msra.gmra.mxu1 %vm355_vm0, %v2921_v5 }
  0xd7   : > { %4344 = vst [vmem:[#allocation3_spill] sm:$0xff] %v3344_v52  ;;  %4345 = vst [vmem:[#allocation4_spill] sm:$0xff] %v3346_v53  ;;  %1440 = vmatprep.mubr.f32.mxu0 %v4310_v1  ;;  %1601 = vmatprep.mubr.f32.mxu1 %v4310_v1 }
  0xd8   : > { %v3354_v54 = vpop.f32.mrf.mxu0  ;;  %v3356_v55 = vpop.f32.mrf.mxu1 }
  0xd9   : > { %4346 = vst [vmem:[#allocation5_spill] sm:$0xff] %v3354_v54  ;;  %4347 = vst [vmem:[#allocation6_spill] sm:$0xff] %v3356_v55  ;;  %v3540_v55 = vpop.permute.xlu0 %332 }
  0xda   : > { %v3358_v56 = vpop.f32.mrf.mxu0  ;;  %v3360_v57 = vpop.f32.mrf.mxu1  ;;  %2803 = vmatmul.mubr.msk.f32.gmra.mxu0 %vm355_vm0, %v2938_v14  ;;  %2819 = vmatmul.mubr.msk.f32.gmra.mxu1 %vm355_vm0, %v2938_v14 }
  0xdb   : > { %4348 = vst [vmem:[#allocation7_spill] sm:$0xff] %v3358_v56  ;;  %4349 = vst [vmem:[#allocation8_spill] sm:$0xff] %v3360_v57  ;;  %1446 = vmatprep.mubr.f32.mxu0 %v4310_v1  ;;  %1607 = vmatprep.mubr.f32.mxu1 %v4310_v1 }
  0xdc   : > { %v3368_v58 = vpop.f32.mrf.mxu0  ;;  %v3370_v59 = vpop.f32.mrf.mxu1 }
  0xdd   : > { %4350 = vst [vmem:[#allocation9_spill] sm:$0xff] %v3368_v58  ;;  %4351 = vst [vmem:[#allocation10_spill] sm:$0xff] %v3370_v59 }
  0xde   : > { %v3372_v60 = vpop.f32.mrf.mxu0  ;;  %v3374_v61 = vpop.f32.mrf.mxu1  ;;  %2804 = vmatmul.mubr.msk.f32.gmra.mxu0 %vm355_vm0, %v2959_v19  ;;  %2820 = vmatmul.mubr.msk.f32.gmra.mxu1 %vm355_vm0, %v2959_v19 }
  0xdf   : > { %4352 = vst [vmem:[#allocation11_spill] sm:$0xff] %v3372_v60  ;;  %4353 = vst [vmem:[#allocation12_spill] sm:$0xff] %v3374_v61  ;;  %1452 = vmatprep.mubr.f32.mxu0 %v4310_v1  ;;  %1613 = vmatprep.mubr.f32.mxu1 %v4310_v1 }
  0xe0   : > { %v3382_v62 = vpop.f32.mrf.mxu0  ;;  %v3384_v63 = vpop.f32.mrf.mxu1 }
  0xe1   : > { %4354 = vst [vmem:[#allocation13_spill] sm:$0xff] %v3382_v62  ;;  %4355 = vst [vmem:[#allocation14_spill] sm:$0xff] %v3384_v63  ;;  %v3554_v63 = vpop.permute.xlu0 %322 }
  0xe2   : > { %v3386_v0 = vpop.f32.mrf.mxu0  ;;  %v3388_v2 = vpop.f32.mrf.mxu1  ;;  %2805 = vmatmul.mubr.msk.f32.gmra.mxu0 %vm355_vm0, %v2976_v22  ;;  %2821 = vmatmul.mubr.msk.f32.gmra.mxu1 %vm355_vm0, %v2976_v22 }
  0xe3   : > { %4356 = vst [vmem:[#allocation15_spill] sm:$0xff] %v3386_v0  ;;  %4357 = vst [vmem:[#allocation16_spill] sm:$0xff] %v3388_v2  ;;  %1458 = vmatprep.mubr.f32.mxu0 %v4310_v1  ;;  %1619 = vmatprep.mubr.f32.mxu1 %v4310_v1 }
  0xe4   : > { %v3396_v3 = vpop.f32.mrf.mxu0  ;;  %v3398_v4 = vpop.f32.mrf.mxu1 }
  0xe5   : > { %4358 = vst [vmem:[#allocation17_spill] sm:$0xff] %v3396_v3  ;;  %4359 = vst [vmem:[#allocation18_spill] sm:$0xff] %v3398_v4 }
  0xe6   : > { %v3400_v5 = vpop.f32.mrf.mxu0  ;;  %v3402_v6 = vpop.f32.mrf.mxu1  ;;  %2806 = vmatmul.mubr.msk.f32.gmra.mxu0 %vm355_vm0, %v2993_v25  ;;  %2822 = vmatmul.mubr.msk.f32.gmra.mxu1 %vm355_vm0, %v2993_v25 }
  0xe7   : > { %4360 = vst [vmem:[#allocation19_spill] sm:$0xff] %v3400_v5  ;;  %4361 = vst [vmem:[#allocation20_spill] sm:$0xff] %v3402_v6  ;;  %1464 = vmatprep.mubr.f32.mxu0 %v4310_v1  ;;  %1625 = vmatprep.mubr.f32.mxu1 %v4310_v1 }
  0xe8   : > { %v3410_v7 = vpop.f32.mrf.mxu0  ;;  %v3412_v8 = vpop.f32.mrf.mxu1 }
  0xe9   : > { %4362 = vst [vmem:[#allocation21_spill] sm:$0xff] %v3412_v8 }
  0xea   : > { %v3414_v9 = vpop.f32.mrf.mxu0  ;;  %v3416_v10 = vpop.f32.mrf.mxu1  ;;  %2807 = vmatmul.mubr.msk.f32.gmra.mxu0 %vm355_vm0, %v3010_v28  ;;  %2823 = vmatmul.mubr.msk.f32.gmra.mxu1 %vm355_vm0, %v3010_v28 }
  0xeb   : > { %1470 = vmatprep.mubr.f32.mxu0 %v4310_v1  ;;  %1631 = vmatprep.mubr.f32.mxu1 %v4310_v1 }
  0xec   : > { %v3424_v11 = vpop.f32.mrf.mxu0  ;;  %v3426_v12 = vpop.f32.mrf.mxu1 }
  0xee   : > { %v3428_v13 = vpop.f32.mrf.mxu0  ;;  %v3430_v14 = vpop.f32.mrf.mxu1  ;;  %2808 = vmatmul.mubr.msk.f32.gmra.mxu0 %vm355_vm0, %v3027_v31  ;;  %2824 = vmatmul.mubr.msk.f32.gmra.mxu1 %vm355_vm0, %v3027_v31 }
  0xef   : > { %1476 = vmatprep.mubr.f32.mxu0 %v4310_v1  ;;  %1637 = vmatprep.mubr.f32.mxu1 %v4310_v1 }
  0xf0   : > { %v3438_v15 = vpop.f32.mrf.mxu0  ;;  %v3440_v16 = vpop.f32.mrf.mxu1 }
  0xf2   : > { %v3442_v17 = vpop.f32.mrf.mxu0  ;;  %v3444_v18 = vpop.f32.mrf.mxu1  ;;  %2809 = vmatmul.mubr.msk.f32.gmra.mxu0 %vm355_vm0, %v3044_v34  ;;  %2825 = vmatmul.mubr.msk.f32.gmra.mxu1 %vm355_vm0, %v3044_v34 }
  0xf3   : > { %1482 = vmatprep.mubr.f32.mxu0 %v4310_v1  ;;  %1643 = vmatprep.mubr.f32.mxu1 %v4310_v1 }
  0xf4   : > { %v3452_v19 = vpop.f32.mrf.mxu0  ;;  %v3454_v20 = vpop.f32.mrf.mxu1 }
  0xf6   : > { %v3456_v21 = vpop.f32.mrf.mxu0  ;;  %v3458_v22 = vpop.f32.mrf.mxu1  ;;  %2810 = vmatmul.mubr.msk.f32.gmra.mxu0 %vm355_vm0, %v3061_v37  ;;  %2826 = vmatmul.mubr.msk.f32.gmra.mxu1 %vm355_vm0, %v3061_v37 }
  0xf7   : > { %1488 = vmatprep.mubr.f32.mxu0 %v4310_v1  ;;  %1649 = vmatprep.mubr.f32.mxu1 %v4310_v1 }
  0xf8   : > { %v3466_v23 = vpop.f32.mrf.mxu0  ;;  %v3468_v24 = vpop.f32.mrf.mxu1 }
  0xfa   : > { %v3470_v25 = vpop.f32.mrf.mxu0  ;;  %v3472_v26 = vpop.f32.mrf.mxu1  ;;  %2811 = vmatmul.mubr.msk.f32.gmra.mxu0 %vm355_vm0, %v3072_v38  ;;  %2827 = vmatmul.mubr.msk.f32.gmra.mxu1 %vm355_vm0, %v3072_v38 }
  0xfb   : > { %1494 = vmatprep.mubr.f32.mxu0 %v4310_v1  ;;  %1655 = vmatprep.mubr.f32.mxu1 %v4310_v1  ;;  %v3514_v38 = vpop.permute.xlu1 %342 }
  0xfc   : > { %v3480_v27 = vpop.f32.mrf.mxu0  ;;  %v3482_v28 = vpop.f32.mrf.mxu1 }
  0xfe   : > { %v3484_v29 = vpop.f32.mrf.mxu0  ;;  %v3486_v30 = vpop.f32.mrf.mxu1  ;;  %2812 = vmatmul.mubr.msk.f32.gmra.mxu0 %vm355_vm0, %v3083_v39  ;;  %2828 = vmatmul.mubr.msk.f32.gmra.mxu1 %vm355_vm0, %v3083_v39 }
  0xff   : > { %1500 = vmatprep.mubr.f32.mxu0 %v4310_v1  ;;  %1661 = vmatprep.mubr.f32.mxu1 %v4310_v1  ;;  %v3532_v50 = vpop.permute.xlu1 %337 }
 0x100   : > { %v3494_v31 = vpop.f32.mrf.mxu0  ;;  %v3496_v32 = vpop.f32.mrf.mxu1 }
 0x102   : > { %v3498_v33 = vpop.f32.mrf.mxu0  ;;  %v3500_v34 = vpop.f32.mrf.mxu1  ;;  %2813 = vmatmul.mubr.msk.f32.gmra.mxu0 %vm355_vm0, %v3094_v40  ;;  %2829 = vmatmul.mubr.msk.f32.gmra.mxu1 %vm355_vm0, %v3094_v40 }
 0x103   : > { %1506 = vmatprep.mubr.f32.mxu0 %v4310_v1  ;;  %1667 = vmatprep.mubr.f32.mxu1 %v4310_v1  ;;  %v3544_v57 = vpop.permute.xlu1 %327 }
 0x104   : > { %v3510_v36 = vpop.f32.mrf.mxu0  ;;  %v3512_v37 = vpop.f32.mrf.mxu1 }
 0x106   : > { %v3516_v39 = vpop.f32.mrf.mxu0  ;;  %v3518_v45 = vpop.f32.mrf.mxu1  ;;  %2814 = vmatmul.mubr.msk.f32.gmra.mxu0 %vm355_vm0, %v3105_v41  ;;  %2830 = vmatmul.mubr.msk.f32.gmra.mxu1 %vm355_vm0, %v3105_v41 }
 0x107   : > { %1512 = vmatprep.mubr.f32.mxu0 %v4310_v1  ;;  %1673 = vmatprep.mubr.f32.mxu1 %v4310_v1 }
 0x108   : > { %v544_v40 = vpop.f32.mrf.mxu0  ;;  %v705_v46 = vpop.f32.mrf.mxu1 }
 0x10a   : > { %v548_v48 = vpop.f32.mrf.mxu0  ;;  %v709_v49 = vpop.f32.mrf.mxu1  ;;  %2815 = vmatmul.mubr.msk.f32.gmra.mxu0 %vm355_vm0, %v3116_v42  ;;  %2831 = vmatmul.mubr.msk.f32.gmra.mxu1 %vm355_vm0, %v3116_v42 }
 0x10b   : > { %1518 = vmatprep.mubr.f32.mxu0 %v4310_v1  ;;  %1679 = vmatprep.mubr.f32.mxu1 %v4310_v1 }
 0x10c   : > { %v550_v41 = vpop.f32.mrf.mxu0  ;;  %v711_v51 = vpop.f32.mrf.mxu1 }
 0x10d   : > { %v551_v6 = vadd.f32 %v550_v41, %v3514_v38 }
 0x10e   : > { %v554_v53 = vpop.f32.mrf.mxu0  ;;  %v715_v52 = vpop.f32.mrf.mxu1  ;;  %2816 = vmatmul.mubr.msk.f32.gmra.mxu0 %vm355_vm0, %v3127_v43  ;;  %2832 = vmatmul.mubr.msk.f32.gmra.mxu1 %vm355_vm0, %v3127_v43 }
 0x10f   : > { %1524 = vmatprep.mubr.f32.mxu0 %v4310_v1  ;;  %1685 = vmatprep.mubr.f32.mxu1 %v4310_v1  ;;  %v555_v4 = vadd.f32 %v554_v53, %v3526_v47 }
 0x110   : > { %v556_v42 = vpop.f32.mrf.mxu0  ;;  %v717_v54 = vpop.f32.mrf.mxu1 }
 0x111   : > { %v557_v62 = vadd.f32 %v556_v42, %v3526_v47  ;;  %v718_v2 = vadd.f32 %v717_v54, %v3526_v47  ;;  %v712_v42 = vadd.f32 %v711_v51, %v3514_v38 }
 0x112   : > { %v560_v56 = vpop.f32.mrf.mxu0  ;;  %v721_v59 = vpop.f32.mrf.mxu1  ;;  %2817 = vmatmul.mubr.msk.f32.gmra.mxu0 %vm355_vm0, %v3138_v44  ;;  %2833 = vmatmul.mubr.msk.f32.gmra.mxu1 %vm355_vm0, %v3138_v44 }
 0x113   : > { %2023 = vmatprep.mubr.f32.mxu0 %v4310_v1  ;;  %2094 = vmatprep.mubr.f32.mxu1 %v4310_v1  ;;  %v561_v43 = vadd.f32 %v560_v56, %v3506_v35  ;;  %v722_v58 = vadd.f32 %v721_v59, %v3506_v35  ;;  %v716_v1 = vadd.f32 %v715_v52, %v3526_v47  ;;  %v3566_v59 = vpop.permute.xlu1 %317  ;;  %v1917_v47 = vmax.f32 %v557_v62, 0.0 }
 0x114   : > { %v562_v61 = vpop.f32.mrf.mxu0  ;;  %v723_v60 = vpop.f32.mrf.mxu1  ;;  %v1919_v41 = vmax.f32 %v718_v2, 0.0  ;;  %v539_v62 = vadd.f32 %v3510_v36, %v3540_v55  ;;  %v700_v2 = vadd.f32 %v3512_v37, %v3540_v55  ;;  %v694_v37 = vadd.f32 %v3496_v32, %v3544_v57 }
 0x115   : > { %v563_v0 = vadd.f32 %v562_v61, %v3506_v35  ;;  %v724_v44 = vadd.f32 %v723_v60, %v3506_v35  ;;  %v549_v61 = vadd.f32 %v548_v48, %v3514_v38  ;;  %v710_v60 = vadd.f32 %v709_v49, %v3514_v38 }
 0x116   : > { %v3562_v3 = vpop.f32.mrf.mxu0  ;;  %v3564_v56 = vpop.f32.mrf.mxu1  ;;  %v1932_v35 = vmax.f32 %v561_v43, 0.0  ;;  %v1934_v53 = vmax.f32 %v722_v58, 0.0  ;;  %v704_v48 = vadd.f32 %v3518_v45, %v3532_v50  ;;  %v1916_v49 = vmax.f32 %v555_v4, 0.0 }
 0x117   : > { %4365 = vst [vmem:[#allocation24_spill] sm:$0xff] %v3562_v3  ;;  %4366 = vst [vmem:[#allocation25_spill] sm:$0xff] %v3564_v56  ;;  %v1933_v5 = vmax.f32 %v563_v0, 0.0  ;;  %v1935_v54 = vmax.f32 %v724_v44, 0.0  ;;  %v545_v56 = vadd.f32 %v544_v40, %v3532_v50  ;;  %v706_v3 = vadd.f32 %v705_v46, %v3532_v50  ;;  %v3586_v40 = vpop.permute.xlu0 %312  ;;  %v3600_v36 = vpop.permute.xlu1 %307 }
 0x118   : > { %v3572_v8 = vpop.f32.mrf.mxu0  ;;  %v3574_v52 = vpop.f32.mrf.mxu1  ;;  %v543_v0 = vadd.f32 %v3516_v39, %v3532_v50  ;;  %v1918_v58 = vmax.f32 %v716_v1, 0.0  ;;  %v1903_v39 = vmax.f32 %v712_v42, 0.0  ;;  %v537_v1 = vadd.f32 %v3498_v33, %v3540_v55 }
 0x119   : > { %4367 = vst [vmem:[#allocation26_spill] sm:$0xff] %v3572_v8  ;;  %4368 = vst [vmem:[#allocation27_spill] sm:$0xff] %v3574_v52  ;;  %1959 = vmatprep.subr.mxu0 %v1933_v5  ;;  %2030 = vmatprep.subr.mxu1 %v1935_v54  ;;  %v1901_v5 = vmax.f32 %v551_v6, 0.0  ;;  %v698_v4 = vadd.f32 %v3500_v34, %v3540_v55  ;;  %v1902_v45 = vmax.f32 %v710_v60, 0.0  ;;  %v1885_v33 = vmax.f32 %v545_v56, 0.0 }
 0x11a   : > { %v3582_v51 = vpop.f32.mrf.mxu0  ;;  %v3584_v43 = vpop.f32.mrf.mxu1  ;;  %1960 = vmatpush1.msra.mxu0 %v1932_v35  ;;  %2031 = vmatpush1.msra.mxu1 %v1934_v53  ;;  %v1900_v35 = vmax.f32 %v549_v61, 0.0  ;;  %v533_v6 = vadd.f32 %v3494_v31, %v3544_v57  ;;  %v531_v34 = vadd.f32 %v3484_v29, %v3544_v57  ;;  %v692_v42 = vadd.f32 %v3486_v30, %v3544_v57 }
 0x11b   : > { %4369 = vst [vmem:[#allocation28_spill] sm:$0xff] %v3582_v51  ;;  %4370 = vst [vmem:[#allocation29_spill] sm:$0xff] %v3584_v43  ;;  %1961 = vmatprep.subr.mxu0 %v1917_v47  ;;  %2032 = vmatprep.subr.mxu1 %v1919_v41  ;;  %v1887_v47 = vmax.f32 %v706_v3, 0.0  ;;  %v1884_v54 = vmax.f32 %v543_v0, 0.0  ;;  %v1886_v61 = vmax.f32 %v704_v48, 0.0  ;;  %v527_v31 = vadd.f32 %v3480_v27, %v3554_v63  ;;  %v3626_v27 = vpop.permute.xlu0 %302 }
 0x11c   : > { %v3596_v46 = vpop.f32.mrf.mxu0  ;;  %v3598_v44 = vpop.f32.mrf.mxu1  ;;  %1962 = vmatpush1.msra.mxu0 %v1916_v49  ;;  %2033 = vmatpush1.msra.mxu1 %v1918_v58  ;;  %v688_v3 = vadd.f32 %v3482_v28, %v3554_v63  ;;  %v1869_v32 = vmax.f32 %v539_v62, 0.0  ;;  %v1871_v56 = vmax.f32 %v700_v2, 0.0  ;;  %v525_v29 = vadd.f32 %v3470_v25, %v3554_v63 }
 0x11d   : > { %4371 = vst [vmem:[#allocation30_spill] sm:$0xff] %v3596_v46  ;;  %4372 = vst [vmem:[#allocation31_spill] sm:$0xff] %v3598_v44  ;;  %1963 = vmatprep.subr.mxu0 %v1901_v5  ;;  %2034 = vmatprep.subr.mxu1 %v1903_v39  ;;  %v686_v30 = vadd.f32 %v3472_v26, %v3554_v63  ;;  %v1868_v41 = vmax.f32 %v537_v1, 0.0  ;;  %v1870_v0 = vmax.f32 %v698_v4, 0.0  ;;  %v1853_v25 = vmax.f32 %v533_v6, 0.0 }
 0x11e   : > { %v3610_v60 = vpop.f32.mrf.mxu0  ;;  %v3612_v53 = vpop.f32.mrf.mxu1  ;;  %1964 = vmatpush1.msra.mxu0 %v1900_v35  ;;  %2035 = vmatpush1.msra.mxu1 %v1902_v45  ;;  %v521_v28 = vadd.f32 %v3466_v23, %v3566_v59  ;;  %v682_v58 = vadd.f32 %v3468_v24, %v3566_v59  ;;  %v1855_v62 = vmax.f32 %v694_v37, 0.0  ;;  %v519_v26 = vadd.f32 %v3456_v21, %v3566_v59 }
 0x11f   : > { %4373 = vst [vmem:[#allocation32_spill] sm:$0xff] %v3610_v60  ;;  %4374 = vst [vmem:[#allocation33_spill] sm:$0xff] %v3612_v53  ;;  %1965 = vmatprep.subr.mxu0 %v1885_v33  ;;  %2036 = vmatprep.subr.mxu1 %v1887_v47  ;;  %v680_v2 = vadd.f32 %v3458_v22, %v3566_v59  ;;  %v1852_v5 = vmax.f32 %v531_v34, 0.0  ;;  %v1854_v39 = vmax.f32 %v692_v42, 0.0  ;;  %v3640_v23 = vpop.permute.xlu1 %297  ;;  %v1837_v21 = vmax.f32 %v527_v31, 0.0 }
 0x120   : > { %v3622_v48 = vpop.f32.mrf.mxu0  ;;  %v3624_v49 = vpop.f32.mrf.mxu1  ;;  %1966 = vmatpush1.msra.mxu0 %v1884_v54  ;;  %2037 = vmatpush1.msra.mxu1 %v1886_v61  ;;  %4379 = vst [vmem:[#allocation38_spill] sm:$0xff] %v3640_v23  ;;  %v515_v24 = vadd.f32 %v3452_v19, %v3586_v40  ;;  %v676_v35 = vadd.f32 %v3454_v20, %v3586_v40  ;;  %v1839_v45 = vmax.f32 %v688_v3, 0.0  ;;  %v1836_v37 = vmax.f32 %v525_v29, 0.0 }
 0x121   : > { %4375 = vst [vmem:[#allocation34_spill] sm:$0xff] %v3622_v48  ;;  %4376 = vst [vmem:[#allocation35_spill] sm:$0xff] %v3624_v49  ;;  %1967 = vmatprep.subr.mxu0 %v1869_v32  ;;  %2038 = vmatprep.subr.mxu1 %v1871_v56  ;;  %v513_v22 = vadd.f32 %v3442_v17, %v3586_v40  ;;  %v674_v6 = vadd.f32 %v3444_v18, %v3586_v40  ;;  %v1838_v33 = vmax.f32 %v686_v30, 0.0  ;;  %v4414_v49 = vld [vmem:[#allocation22_spill] sm:$0xff] }
 0x122   : > { %v3636_v1 = vpop.f32.mrf.mxu0  ;;  %v3638_v4 = vpop.f32.mrf.mxu1  ;;  %1968 = vmatpush1.msra.mxu0 %v1868_v41  ;;  %2039 = vmatpush1.msra.mxu1 %v1870_v0  ;;  %v509_v19 = vadd.f32 %v3438_v15, %v3600_v36  ;;  %v670_v20 = vadd.f32 %v3440_v16, %v3600_v36  ;;  %v1821_v42 = vmax.f32 %v521_v28, 0.0  ;;  %v1823_v54 = vmax.f32 %v682_v58, 0.0 }
 0x123   : > { %4377 = vst [vmem:[#allocation36_spill] sm:$0xff] %v3636_v1  ;;  %4378 = vst [vmem:[#allocation37_spill] sm:$0xff] %v3638_v4  ;;  %1969 = vmatprep.subr.mxu0 %v1853_v25  ;;  %2040 = vmatprep.subr.mxu1 %v1855_v62  ;;  %v507_v17 = vadd.f32 %v3428_v13, %v3600_v36  ;;  %v668_v18 = vadd.f32 %v3430_v14, %v3600_v36  ;;  %v1820_v61 = vmax.f32 %v519_v26, 0.0  ;;  %v3666_v15 = vpop.permute.xlu0 %292  ;;  %v4388_v25 = vld [vmem:[#allocation21_spill] sm:$0xff] }
 0x124   : > { %v3650_v47 = vpop.f32.mrf.mxu0  ;;  %v3652_v34 = vpop.f32.mrf.mxu1  ;;  %1970 = vmatpush1.msra.mxu0 %v1852_v5  ;;  %2041 = vmatpush1.msra.mxu1 %v1854_v39  ;;  %v1822_v31 = vmax.f32 %v680_v2, 0.0  ;;  %4384 = vst [vmem:[#allocation43_spill] sm:$0xff] %v3666_v15  ;;  %v503_v16 = vadd.f32 %v3424_v11, %v3626_v27  ;;  %v664_v56 = vadd.f32 %v3426_v12, %v3626_v27  ;;  %v1805_v13 = vmax.f32 %v515_v24, 0.0  ;;  %v4390_v5 = vld [vmem:[#allocation20_spill] sm:$0xff] }
 0x125   : > { %4380 = vst [vmem:[#allocation39_spill] sm:$0xff] %v3650_v47  ;;  %4381 = vst [vmem:[#allocation40_spill] sm:$0xff] %v3652_v34  ;;  %1971 = vmatprep.subr.mxu0 %v1837_v21  ;;  %2042 = vmatprep.subr.mxu1 %v1839_v45  ;;  %v1807_v29 = vmax.f32 %v676_v35, 0.0  ;;  %v501_v14 = vadd.f32 %v3414_v9, %v3626_v27  ;;  %v662_v30 = vadd.f32 %v3416_v10, %v3626_v27  ;;  %v3680_v11 = vpop.permute.xlu1 %287  ;;  %v4389_v10 = vld [vmem:[#allocation19_spill] sm:$0xff] }
 0x126   : > { %v3662_v3 = vpop.f32.mrf.mxu0  ;;  %v3664_v32 = vpop.f32.mrf.mxu1  ;;  %1972 = vmatpush1.msra.mxu0 %v1836_v37  ;;  %2043 = vmatpush1.msra.mxu1 %v1838_v33  ;;  %v1804_v41 = vmax.f32 %v513_v22, 0.0  ;;  %v1806_v0 = vmax.f32 %v674_v6, 0.0  ;;  %4387 = vst [vmem:[#allocation46_spill] sm:$0xff] %v3680_v11  ;;  %v497_v12 = vadd.f32 %v3410_v7, %v3640_v23  ;;  %v658_v62 = vadd.f32 %v4388_v25, %v3640_v23  ;;  %v4393_v7 = vld [vmem:[#allocation17_spill] sm:$0xff]  ;;  %v4394_v6 = vld [vmem:[#allocation18_spill] sm:$0xff]  ;;  %v4415_v34 = vld [vmem:[#allocation23_spill] sm:$0xff] }
 0x127   : > { %4382 = vst [vmem:[#allocation41_spill] sm:$0xff] %v3662_v3  ;;  %4383 = vst [vmem:[#allocation42_spill] sm:$0xff] %v3664_v32  ;;  %1973 = vmatprep.subr.mxu0 %v1821_v42  ;;  %2044 = vmatprep.subr.mxu1 %v1823_v54  ;;  %v1789_v9 = vmax.f32 %v509_v19, 0.0  ;;  %v1791_v26 = vmax.f32 %v670_v20, 0.0  ;;  %v495_v2 = vadd.f32 %v4389_v10, %v3640_v23  ;;  %v1788_v24 = vmax.f32 %v507_v17, 0.0  ;;  %v4395_v20 = vld [vmem:[#allocation15_spill] sm:$0xff] }
 0x128   : > { %v3676_v28 = vpop.f32.mrf.mxu0  ;;  %v3678_v58 = vpop.f32.mrf.mxu1  ;;  %1974 = vmatpush1.msra.mxu0 %v1820_v61  ;;  %2045 = vmatpush1.msra.mxu1 %v1822_v31  ;;  %v656_v39 = vadd.f32 %v4390_v5, %v3640_v23  ;;  %v1790_v35 = vmax.f32 %v668_v18, 0.0  ;;  %v491_v22 = vadd.f32 %v4393_v7, %v3666_v15  ;;  %v652_v37 = vadd.f32 %v4394_v6, %v3666_v15  ;;  %v4396_v54 = vld [vmem:[#allocation16_spill] sm:$0xff] }
 0x129   : > { %4385 = vst [vmem:[#allocation44_spill] sm:$0xff] %v3676_v28  ;;  %4386 = vst [vmem:[#allocation45_spill] sm:$0xff] %v3678_v58  ;;  %1975 = vmatprep.subr.mxu0 %v1805_v13  ;;  %2046 = vmatprep.subr.mxu1 %v1807_v29  ;;  %v1773_v33 = vmax.f32 %v503_v16, 0.0  ;;  %v1775_v19 = vmax.f32 %v664_v56, 0.0  ;;  %v489_v42 = vadd.f32 %v4395_v20, %v3666_v15  ;;  %v1772_v18 = vmax.f32 %v501_v14, 0.0  ;;  %v3706_v29 = vpop.permute.xlu0 %282  ;;  %v4399_v16 = vld [vmem:[#allocation13_spill] sm:$0xff]  ;;  %v3720_v6 = vpop.permute.xlu1 %277 }
 0x12a   : > { %v3690_v21 = vpop.f32.mrf.mxu0  ;;  %v3692_v45 = vpop.f32.mrf.mxu1  ;;  %1976 = vmatpush1.msra.mxu0 %v1804_v41  ;;  %2047 = vmatpush1.msra.mxu1 %v1806_v0  ;;  %v650_v17 = vadd.f32 %v4396_v54, %v3666_v15  ;;  %v1774_v61 = vmax.f32 %v662_v30, 0.0  ;;  %4398 = vst [vmem:[#allocation17_spill] sm:$0xff] %v3706_v29  ;;  %v485_v56 = vadd.f32 %v4399_v16, %v3680_v11  ;;  %v4400_v41 = vld [vmem:[#allocation14_spill] sm:$0xff]  ;;  %v1757_v25 = vmax.f32 %v497_v12, 0.0  ;;  %v4401_v14 = vld [vmem:[#allocation11_spill] sm:$0xff]  ;;  %v4404_v12 = vld [vmem:[#allocation9_spill] sm:$0xff] }
 0x12b   : > { %4391 = vst [vmem:[#allocation21_spill] sm:$0xff] %v3690_v21  ;;  %4392 = vst [vmem:[#allocation19_spill] sm:$0xff] %v3692_v45  ;;  %1977 = vmatprep.subr.mxu0 %v1789_v9  ;;  %2048 = vmatprep.subr.mxu1 %v1791_v26  ;;  %v646_v0 = vadd.f32 %v4400_v41, %v3680_v11  ;;  %v1759_v9 = vmax.f32 %v658_v62, 0.0  ;;  %v483_v30 = vadd.f32 %v4401_v14, %v3680_v11  ;;  %v4402_v26 = vld [vmem:[#allocation12_spill] sm:$0xff] }
 0x12c   : > { %v3702_v31 = vpop.f32.mrf.mxu0  ;;  %v3704_v13 = vpop.f32.mrf.mxu1  ;;  %1978 = vmatpush1.msra.mxu0 %v1788_v24  ;;  %2049 = vmatpush1.msra.mxu1 %v1790_v35  ;;  %v644_v10 = vadd.f32 %v4402_v26, %v3680_v11  ;;  %v1756_v5 = vmax.f32 %v495_v2, 0.0  ;;  %v1758_v24 = vmax.f32 %v656_v39, 0.0  ;;  %4403 = vst [vmem:[#allocation18_spill] sm:$0xff] %v3720_v6  ;;  %v479_v62 = vadd.f32 %v4404_v12, %v3706_v29  ;;  %v4407_v14 = vld [vmem:[#allocation8_spill] sm:$0xff]  ;;  %v4408_v12 = vld [vmem:[#allocation5_spill] sm:$0xff] }
 0x12d   : > { %4397 = vst [vmem:[#allocation20_spill] sm:$0xff] %v3704_v13  ;;  %1979 = vmatprep.subr.mxu0 %v1773_v33  ;;  %2050 = vmatprep.subr.mxu1 %v1775_v19  ;;  %v4405_v33 = vld [vmem:[#allocation10_spill] sm:$0xff]  ;;  %v1741_v20 = vmax.f32 %v491_v22, 0.0  ;;  %v1743_v54 = vmax.f32 %v652_v37, 0.0  ;;  %v1740_v2 = vmax.f32 %v489_v42, 0.0  ;;  %v1742_v39 = vmax.f32 %v650_v17, 0.0 }
 0x12e   : > { %v3716_v35 = vpop.f32.mrf.mxu0  ;;  %v3718_v7 = vpop.f32.mrf.mxu1  ;;  %1980 = vmatpush1.msra.mxu0 %v1772_v18  ;;  %2051 = vmatpush1.msra.mxu1 %v1774_v61  ;;  %v640_v19 = vadd.f32 %v4405_v33, %v3706_v29  ;;  %v4406_v18 = vld [vmem:[#allocation7_spill] sm:$0xff]  ;;  %v638_v26 = vadd.f32 %v4407_v14, %v3706_v29  ;;  %v473_v22 = vadd.f32 %v4408_v12, %v3720_v6  ;;  %v4409_v37 = vld [vmem:[#allocation6_spill] sm:$0xff]  ;;  %v1725_v42 = vmax.f32 %v485_v56, 0.0  ;;  %v4411_v12 = vld [vmem:[#allocation4_spill] sm:$0xff] }
 0x12f   : > { %1981 = vmatprep.subr.mxu0 %v1757_v25  ;;  %2052 = vmatprep.subr.mxu1 %v1759_v9  ;;  %v477_v61 = vadd.f32 %v4406_v18, %v3706_v29  ;;  %v634_v25 = vadd.f32 %v4409_v37, %v3720_v6  ;;  %v1727_v17 = vmax.f32 %v646_v0, 0.0  ;;  %v1724_v9 = vmax.f32 %v483_v30, 0.0  ;;  %v4410_v18 = vld [vmem:[#allocation3_spill] sm:$0xff] }
 0x130   : > { %v3726_v16 = vpop.f32.mrf.mxu0  ;;  %v3728_v41 = vpop.f32.mrf.mxu1  ;;  %1982 = vmatpush1.msra.mxu0 %v1756_v5  ;;  %2053 = vmatpush1.msra.mxu1 %v1758_v24  ;;  %v1726_v33 = vmax.f32 %v644_v10, 0.0  ;;  %v471_v14 = vadd.f32 %v4410_v18, %v3720_v6  ;;  %v632_v52 = vadd.f32 %v4411_v12, %v3720_v6  ;;  %v1709_v8 = vmax.f32 %v479_v62, 0.0 }
 0x131   : > { %1983 = vmatprep.subr.mxu0 %v1741_v20  ;;  %2054 = vmatprep.subr.mxu1 %v1743_v54  ;;  %v1711_v37 = vmax.f32 %v640_v19, 0.0  ;;  %v1708_v30 = vmax.f32 %v477_v61, 0.0  ;;  %v1710_v10 = vmax.f32 %v638_v26, 0.0  ;;  %v1693_v20 = vmax.f32 %v473_v22, 0.0 }
 0x132   : > { %v3738_v5 = vpop.f32.mrf.mxu0  ;;  %v3740_v24 = vpop.f32.mrf.mxu1  ;;  %1984 = vmatpush1.msra.mxu0 %v1740_v2  ;;  %2055 = vmatpush1.msra.mxu1 %v1742_v39  ;;  %v1695_v54 = vmax.f32 %v634_v25, 0.0  ;;  %v1692_v62 = vmax.f32 %v471_v14, 0.0  ;;  %v1694_v19 = vmax.f32 %v632_v52, 0.0  ;;  %v4413_v22 = vmov 0.0  }
 0x133   : > { %1985 = vmatprep.subr.mxu0 %v1725_v42  ;;  %2056 = vmatprep.subr.mxu1 %v1727_v17  ;;  %v3757_v42 = vld [vmem:[%s4307_s3] sm:$0x1] }
 0x134   : > { %v3746_v56 = vpop.f32.mrf.mxu0  ;;  %v3748_v0 = vpop.f32.mrf.mxu1  ;;  %1986 = vmatpush1.msra.mxu0 %v1724_v9  ;;  %2057 = vmatpush1.msra.mxu1 %v1726_v33  ;;  %4412 = vst [vmem:[#allocation15_spill] sm:$0xff] %v3757_v42 }
 0x135   : > { %1987 = vmatprep.subr.mxu0 %v1709_v8  ;;  %2058 = vmatprep.subr.mxu1 %v1711_v37 }
 0x136   : > { %v3750_v2 = vpop.f32.mrf.mxu0  ;;  %v3752_v39 = vpop.f32.mrf.mxu1  ;;  %1988 = vmatpush1.msra.mxu0 %v1708_v30  ;;  %2059 = vmatpush1.msra.mxu1 %v1710_v10 }
 0x137   : > { %1989 = vmatprep.subr.mxu0 %v1693_v20  ;;  %2060 = vmatprep.subr.mxu1 %v1695_v54 }
 0x138   : > { %v3759_v61 = vpop.f32.mrf.mxu0  ;;  %v3761_v26 = vpop.f32.mrf.mxu1  ;;  %1990 = vmatpush1.msra.mxu0 %v1692_v62  ;;  %2061 = vmatpush1.msra.mxu1 %v1694_v19 }
 0x139   : > { %2024 = vmatmul.mubr.f32.vlgmr.msra.gmra.mxu0 %v3757_v42  ;;  %2095 = vmatmul.mubr.f32.vlgmr.msra.gmra.mxu1 %v3757_v42 }
 0x13a   : > { %v3765_v8 = vpop.f32.mrf.mxu0  ;;  %v3767_v52 = vpop.f32.mrf.mxu1  ;;  %2165 = vmatprep.mubr.f32.mxu0 %v4413_v22  ;;  %2236 = vmatprep.mubr.f32.mxu1 %v4413_v22 }
 0x13c   : > { %v3771_v25 = vpop.f32.mrf.mxu0  ;;  %v3773_v17 = vpop.f32.mrf.mxu1 }
 0x13e   : > { %v3775_v9 = vpop.f32.mrf.mxu0  ;;  %v3777_v33 = vpop.f32.mrf.mxu1 }
 0x140   : > { %v3779_v18 = vpop.f32.mrf.mxu0  ;;  %v3781_v14 = vpop.f32.mrf.mxu1 }
 0x142   : > { %v858_v12 = vpop.f32.mrf.mxu0  ;;  %v1019_v37 = vpop.f32.mrf.mxu1 }
 0x144   : > { %v860_v30 = vpop.f32.mrf.mxu0  ;;  %v1021_v10 = vpop.f32.mrf.mxu1 }
 0x146   : > { %v864_v20 = vpop.f32.mrf.mxu0  ;;  %v1025_v54 = vpop.f32.mrf.mxu1 }
 0x148   : > { %v866_v62 = vpop.f32.mrf.mxu0  ;;  %v1027_v19 = vpop.f32.mrf.mxu1 }
 0x14a   : > { %v870_v22 = vpop.f32.mrf.mxu0  ;;  %v1031_v42 = vpop.f32.mrf.mxu1 }
 0x14c   : > { %v872_v6 = vpop.f32.mrf.mxu0  ;;  %v1033_v43 = vpop.f32.mrf.mxu1 }
 0x14e   : > { %v876_v51 = vpop.f32.mrf.mxu0  ;;  %v1037_v44 = vpop.f32.mrf.mxu1 }
 0x14f   : > { %v877_v58 = vadd.f32 %v876_v51, %v4415_v34  ;;  %v1038_v28 = vadd.f32 %v1037_v44, %v4415_v34  ;;  %v867_v44 = vadd.f32 %v866_v62, %v3532_v50  ;;  %v1022_v62 = vadd.f32 %v1021_v10, %v3540_v55 }
 0x150   : > { %v878_v46 = vpop.f32.mrf.mxu0  ;;  %v1039_v29 = vpop.f32.mrf.mxu1 }
 0x151   : > { %v879_v47 = vadd.f32 %v878_v46, %v4415_v34  ;;  %v1040_v15 = vadd.f32 %v1039_v29, %v4415_v34  ;;  %v871_v29 = vadd.f32 %v870_v22, %v3514_v38  ;;  %v861_v22 = vadd.f32 %v860_v30, %v3540_v55 }
 0x152   : > { %v882_v53 = vpop.f32.mrf.mxu0  ;;  %v1043_v60 = vpop.f32.mrf.mxu1  ;;  %v1016_v30 = vadd.f32 %v3781_v14, %v3544_v57 }
 0x153   : > { %v883_v48 = vadd.f32 %v882_v53, %v4414_v49  ;;  %v1044_v11 = vadd.f32 %v1043_v60, %v4414_v49  ;;  %v873_v60 = vadd.f32 %v872_v6, %v3514_v38  ;;  %v1034_v53 = vadd.f32 %v1033_v43, %v3514_v38 }
 0x154   : > { %v884_v4 = vpop.f32.mrf.mxu0  ;;  %v1045_v1 = vpop.f32.mrf.mxu1  ;;  %v1923_v6 = vmax.f32 %v1040_v15, 0.0  ;;  %v865_v43 = vadd.f32 %v864_v20, %v3532_v50  ;;  %v1020_v20 = vadd.f32 %v1019_v37, %v3540_v55  ;;  %v1014_v37 = vadd.f32 %v3777_v33, %v3544_v57 }
 0x155   : > { %v885_v32 = vadd.f32 %v884_v4, %v4414_v49  ;;  %v1046_v3 = vadd.f32 %v1045_v1, %v4414_v49  ;;  %v1032_v4 = vadd.f32 %v1031_v42, %v3514_v38  ;;  %v1936_v13 = vmax.f32 %v883_v48, 0.0 }
 0x156   : > { %v3791_v23 = vpop.f32.mrf.mxu0  ;;  %v3793_v45 = vpop.f32.mrf.mxu1  ;;  %v1938_v1 = vmax.f32 %v1044_v11, 0.0  ;;  %v1922_v42 = vmax.f32 %v1038_v28, 0.0  ;;  %v1907_v15 = vmax.f32 %v1034_v53, 0.0  ;;  %v1873_v14 = vmax.f32 %v861_v22, 0.0 }
 0x157   : > { %4416 = vst [vmem:[#allocation16_spill] sm:$0xff] %v3791_v23  ;;  %4417 = vst [vmem:[#allocation13_spill] sm:$0xff] %v3793_v45  ;;  %v1937_v21 = vmax.f32 %v885_v32, 0.0  ;;  %v1939_v46 = vmax.f32 %v1046_v3, 0.0  ;;  %v1028_v45 = vadd.f32 %v1027_v19, %v3532_v50  ;;  %v1921_v23 = vmax.f32 %v879_v47, 0.0 }
 0x158   : > { %v3799_v49 = vpop.f32.mrf.mxu0  ;;  %v3801_v51 = vpop.f32.mrf.mxu1  ;;  %v1026_v3 = vadd.f32 %v1025_v54, %v3532_v50  ;;  %v1920_v32 = vmax.f32 %v877_v58, 0.0  ;;  %v1905_v47 = vmax.f32 %v873_v60, 0.0  ;;  %v1904_v58 = vmax.f32 %v871_v29, 0.0 }
 0x159   : > { %4418 = vst [vmem:[#allocation14_spill] sm:$0xff] %v3799_v49  ;;  %4419 = vst [vmem:[#allocation11_spill] sm:$0xff] %v3801_v51  ;;  %2101 = vmatprep.subr.mxu0 %v1937_v21  ;;  %2172 = vmatprep.subr.mxu1 %v1939_v46  ;;  %v859_v21 = vadd.f32 %v858_v12, %v3540_v55  ;;  %v1906_v28 = vmax.f32 %v1032_v4, 0.0  ;;  %v1891_v10 = vmax.f32 %v1028_v45, 0.0  ;;  %v1888_v60 = vmax.f32 %v865_v43, 0.0 }
 0x15a   : > { %v3807_v48 = vpop.f32.mrf.mxu0  ;;  %v3809_v11 = vpop.f32.mrf.mxu1  ;;  %2102 = vmatpush1.msra.mxu0 %v1936_v13  ;;  %2173 = vmatpush1.msra.mxu1 %v1938_v1  ;;  %v855_v13 = vadd.f32 %v3779_v18, %v3544_v57  ;;  %v853_v12 = vadd.f32 %v3775_v9, %v3544_v57  ;;  %v1890_v53 = vmax.f32 %v1026_v3, 0.0  ;;  %v849_v18 = vadd.f32 %v3771_v25, %v3554_v63 }
 0x15b   : > { %4420 = vst [vmem:[#allocation12_spill] sm:$0xff] %v3807_v48  ;;  %4421 = vst [vmem:[#allocation9_spill] sm:$0xff] %v3809_v11  ;;  %2103 = vmatprep.subr.mxu0 %v1921_v23  ;;  %2174 = vmatprep.subr.mxu1 %v1923_v6  ;;  %v1889_v23 = vmax.f32 %v867_v44, 0.0  ;;  %v1010_v45 = vadd.f32 %v3773_v17, %v3554_v63  ;;  %v1875_v4 = vmax.f32 %v1022_v62, 0.0  ;;  %v1872_v1 = vmax.f32 %v859_v21, 0.0 }
 0x15c   : > { %v3815_v54 = vpop.f32.mrf.mxu0  ;;  %v3817_v19 = vpop.f32.mrf.mxu1  ;;  %2104 = vmatpush1.msra.mxu0 %v1920_v32  ;;  %2175 = vmatpush1.msra.mxu1 %v1922_v42  ;;  %v847_v9 = vadd.f32 %v3765_v8, %v3554_v63  ;;  %v1008_v33 = vadd.f32 %v3767_v52, %v3554_v63  ;;  %v1874_v44 = vmax.f32 %v1020_v20, 0.0  ;;  %v843_v25 = vadd.f32 %v3759_v61, %v3566_v59 }
 0x15d   : > { %4422 = vst [vmem:[#allocation10_spill] sm:$0xff] %v3815_v54  ;;  %4423 = vst [vmem:[#allocation7_spill] sm:$0xff] %v3817_v19  ;;  %2105 = vmatprep.subr.mxu0 %v1905_v47  ;;  %2176 = vmatprep.subr.mxu1 %v1907_v15  ;;  %v1004_v17 = vadd.f32 %v3761_v26, %v3566_v59  ;;  %v1857_v3 = vmax.f32 %v855_v13, 0.0  ;;  %v1859_v32 = vmax.f32 %v1016_v30, 0.0  ;;  %v1856_v42 = vmax.f32 %v853_v12, 0.0 }
 0x15e   : > { %v3827_v46 = vpop.f32.mrf.mxu0  ;;  %v3829_v29 = vpop.f32.mrf.mxu1  ;;  %2106 = vmatpush1.msra.mxu0 %v1904_v58  ;;  %2177 = vmatpush1.msra.mxu1 %v1906_v28  ;;  %v841_v8 = vadd.f32 %v3750_v2, %v3566_v59  ;;  %v1002_v52 = vadd.f32 %v3752_v39, %v3566_v59  ;;  %v1858_v22 = vmax.f32 %v1014_v37, 0.0  ;;  %v837_v61 = vadd.f32 %v3746_v56, %v3586_v40 }
 0x15f   : > { %4424 = vst [vmem:[#allocation8_spill] sm:$0xff] %v3827_v46  ;;  %4425 = vst [vmem:[#allocation5_spill] sm:$0xff] %v3829_v29  ;;  %2107 = vmatprep.subr.mxu0 %v1889_v23  ;;  %2178 = vmatprep.subr.mxu1 %v1891_v10  ;;  %v998_v26 = vadd.f32 %v3748_v0, %v3586_v40  ;;  %v1841_v15 = vmax.f32 %v849_v18, 0.0  ;;  %v1843_v21 = vmax.f32 %v1010_v45, 0.0  ;;  %v1840_v20 = vmax.f32 %v847_v9, 0.0 }
 0x160   : > { %v3839_v6 = vpop.f32.mrf.mxu0  ;;  %v3841_v43 = vpop.f32.mrf.mxu1  ;;  %2108 = vmatpush1.msra.mxu0 %v1888_v60  ;;  %2179 = vmatpush1.msra.mxu1 %v1890_v53  ;;  %v835_v2 = vadd.f32 %v3738_v5, %v3586_v40  ;;  %v996_v39 = vadd.f32 %v3740_v24, %v3586_v40  ;;  %v1842_v58 = vmax.f32 %v1008_v33, 0.0  ;;  %v831_v56 = vadd.f32 %v3726_v16, %v3600_v36 }
 0x161   : > { %4426 = vst [vmem:[#allocation6_spill] sm:$0xff] %v3839_v6  ;;  %4427 = vst [vmem:[#allocation3_spill] sm:$0xff] %v3841_v43  ;;  %2109 = vmatprep.subr.mxu0 %v1873_v14  ;;  %2180 = vmatprep.subr.mxu1 %v1875_v4  ;;  %v992_v0 = vadd.f32 %v3728_v41, %v3600_v36  ;;  %v1825_v30 = vmax.f32 %v843_v25, 0.0  ;;  %v1827_v23 = vmax.f32 %v1004_v17, 0.0  ;;  %v1824_v10 = vmax.f32 %v841_v8, 0.0  ;;  %v4434_v41 = vld [vmem:[#allocation20_spill] sm:$0xff] }
 0x162   : > { %v3851_v62 = vpop.f32.mrf.mxu0  ;;  %v3853_v47 = vpop.f32.mrf.mxu1  ;;  %2110 = vmatpush1.msra.mxu0 %v1872_v1  ;;  %2181 = vmatpush1.msra.mxu1 %v1874_v44  ;;  %v829_v5 = vadd.f32 %v3716_v35, %v3600_v36  ;;  %v990_v24 = vadd.f32 %v3718_v7, %v3600_v36  ;;  %v1826_v12 = vmax.f32 %v1002_v52, 0.0  ;;  %v825_v16 = vadd.f32 %v3702_v31, %v3626_v27  ;;  %v4435_v35 = vld [vmem:[#allocation21_spill] sm:$0xff]  ;;  %v4436_v14 = vld [vmem:[#allocation19_spill] sm:$0xff]  ;;  %v4439_v31 = vld [vmem:[#allocation38_spill] sm:$0xff] }
 0x163   : > { %4428 = vst [vmem:[#allocation4_spill] sm:$0xff] %v3851_v62  ;;  %4429 = vst [vmem:[#allocation23_spill] sm:$0xff] %v3853_v47  ;;  %2111 = vmatprep.subr.mxu0 %v1857_v3  ;;  %2182 = vmatprep.subr.mxu1 %v1859_v32  ;;  %v986_v53 = vadd.f32 %v4434_v41, %v3626_v27  ;;  %v1809_v18 = vmax.f32 %v837_v61, 0.0  ;;  %v1811_v45 = vmax.f32 %v998_v26, 0.0  ;;  %v1808_v9 = vmax.f32 %v835_v2, 0.0  ;;  %v4440_v25 = vld [vmem:[#allocation44_spill] sm:$0xff] }
 0x164   : > { %v3863_v28 = vpop.f32.mrf.mxu0  ;;  %v3865_v13 = vpop.f32.mrf.mxu1  ;;  %2112 = vmatpush1.msra.mxu0 %v1856_v42  ;;  %2183 = vmatpush1.msra.mxu1 %v1858_v22  ;;  %v823_v7 = vadd.f32 %v4435_v35, %v3626_v27  ;;  %v984_v4 = vadd.f32 %v4436_v14, %v3626_v27  ;;  %v1810_v33 = vmax.f32 %v996_v39, 0.0  ;;  %v819_v17 = vadd.f32 %v4440_v25, %v4439_v31  ;;  %v4441_v3 = vld [vmem:[#allocation45_spill] sm:$0xff]  ;;  %v4443_v61 = vld [vmem:[#allocation42_spill] sm:$0xff] }
 0x165   : > { %4430 = vst [vmem:[#allocation47_spill] sm:$0xff] %v3863_v28  ;;  %4431 = vst [vmem:[#allocation48_spill] sm:$0xff] %v3865_v13  ;;  %2113 = vmatprep.subr.mxu0 %v1841_v15  ;;  %2184 = vmatprep.subr.mxu1 %v1843_v21  ;;  %v980_v32 = vadd.f32 %v4441_v3, %v4439_v31  ;;  %v1793_v8 = vmax.f32 %v831_v56, 0.0  ;;  %v1795_v52 = vmax.f32 %v992_v0, 0.0  ;;  %v4442_v42 = vld [vmem:[#allocation41_spill] sm:$0xff]  ;;  %v1792_v15 = vmax.f32 %v829_v5, 0.0 }
 0x166   : > { %v3875_v37 = vpop.f32.mrf.mxu0  ;;  %v3877_v60 = vpop.f32.mrf.mxu1  ;;  %2114 = vmatpush1.msra.mxu0 %v1840_v20  ;;  %2185 = vmatpush1.msra.mxu1 %v1842_v58  ;;  %v817_v22 = vadd.f32 %v4442_v42, %v4439_v31  ;;  %v978_v26 = vadd.f32 %v4443_v61, %v4439_v31  ;;  %v1794_v21 = vmax.f32 %v990_v24, 0.0  ;;  %v4446_v20 = vld [vmem:[#allocation43_spill] sm:$0xff]  ;;  %v4448_v0 = vld [vmem:[#allocation40_spill] sm:$0xff]  ;;  %v4450_v24 = vld [vmem:[#allocation37_spill] sm:$0xff]  ;;  %v1761_v3 = vmax.f32 %v819_v17, 0.0 }
 0x167   : > { %4432 = vst [vmem:[#allocation49_spill] sm:$0xff] %v3875_v37  ;;  %4433 = vst [vmem:[#allocation50_spill] sm:$0xff] %v3877_v60  ;;  %2115 = vmatprep.subr.mxu0 %v1825_v30  ;;  %2186 = vmatprep.subr.mxu1 %v1827_v23  ;;  %v4447_v58 = vld [vmem:[#allocation39_spill] sm:$0xff]  ;;  %v974_v30 = vadd.f32 %v4448_v0, %v4446_v20  ;;  %v1777_v23 = vmax.f32 %v825_v16, 0.0  ;;  %v972_v41 = vadd.f32 %v4450_v24, %v4446_v20  ;;  %v4457_v0 = vld [vmem:[#allocation17_spill] sm:$0xff] }
 0x168   : > { %v3887_v1 = vpop.f32.mrf.mxu0  ;;  %v3889_v44 = vpop.f32.mrf.mxu1  ;;  %2116 = vmatpush1.msra.mxu0 %v1824_v10  ;;  %2187 = vmatpush1.msra.mxu1 %v1826_v12  ;;  %v813_v56 = vadd.f32 %v4447_v58, %v4446_v20  ;;  %v1779_v10 = vmax.f32 %v986_v53, 0.0  ;;  %v4449_v12 = vld [vmem:[#allocation36_spill] sm:$0xff]  ;;  %v4454_v53 = vld [vmem:[#allocation35_spill] sm:$0xff]  ;;  %v1760_v61 = vmax.f32 %v817_v22, 0.0  ;;  %v1762_v58 = vmax.f32 %v978_v26, 0.0  ;;  %v4461_v26 = vld [vmem:[#allocation29_spill] sm:$0xff] }
 0x169   : > { %4437 = vst [vmem:[#allocation20_spill] sm:$0xff] %v3887_v1  ;;  %4438 = vst [vmem:[#allocation21_spill] sm:$0xff] %v3889_v44  ;;  %2117 = vmatprep.subr.mxu0 %v1809_v18  ;;  %2188 = vmatprep.subr.mxu1 %v1811_v45  ;;  %v811_v5 = vadd.f32 %v4449_v12, %v4446_v20  ;;  %v1776_v18 = vmax.f32 %v823_v7, 0.0  ;;  %v1778_v45 = vmax.f32 %v984_v4, 0.0  ;;  %v4456_v4 = vld [vmem:[#allocation33_spill] sm:$0xff]  ;;  %v4458_v12 = vld [vmem:[#allocation30_spill] sm:$0xff] }
 0x16a   : > { %v3899_v2 = vpop.f32.mrf.mxu0  ;;  %v3901_v39 = vpop.f32.mrf.mxu1  ;;  %2118 = vmatpush1.msra.mxu0 %v1808_v9  ;;  %2189 = vmatpush1.msra.mxu1 %v1810_v33  ;;  %v4452_v9 = vld [vmem:[#allocation46_spill] sm:$0xff]  ;;  %v801_v17 = vadd.f32 %v4458_v12, %v4457_v0  ;;  %v1747_v24 = vmax.f32 %v974_v30, 0.0  ;;  %v4464_v30 = vld [vmem:[#allocation27_spill] sm:$0xff] }
 0x16b   : > { %4444 = vst [vmem:[#allocation19_spill] sm:$0xff] %v3899_v2  ;;  %4445 = vst [vmem:[#allocation44_spill] sm:$0xff] %v3901_v39  ;;  %2119 = vmatprep.subr.mxu0 %v1793_v8  ;;  %2190 = vmatprep.subr.mxu1 %v1795_v52  ;;  %v4453_v33 = vld [vmem:[#allocation34_spill] sm:$0xff]  ;;  %v968_v25 = vadd.f32 %v4454_v53, %v4452_v9  ;;  %v1763_v8 = vmax.f32 %v980_v32, 0.0  ;;  %v4455_v52 = vld [vmem:[#allocation32_spill] sm:$0xff]  ;;  %v966_v42 = vadd.f32 %v4456_v4, %v4452_v9 }
 0x16c   : > { %v3911_v35 = vpop.f32.mrf.mxu0  ;;  %v3913_v14 = vpop.f32.mrf.mxu1  ;;  %2120 = vmatpush1.msra.mxu0 %v1792_v15  ;;  %2191 = vmatpush1.msra.mxu1 %v1794_v21  ;;  %v807_v16 = vadd.f32 %v4453_v33, %v4452_v9  ;;  %v805_v7 = vadd.f32 %v4455_v52, %v4452_v9  ;;  %v4459_v32 = vld [vmem:[#allocation31_spill] sm:$0xff]  ;;  %v4460_v33 = vld [vmem:[#allocation28_spill] sm:$0xff]  ;;  %v960_v53 = vadd.f32 %v4461_v26, %v4457_v0  ;;  %v1744_v52 = vmax.f32 %v811_v5, 0.0  ;;  %v4462_v12 = vld [vmem:[#allocation18_spill] sm:$0xff] }
 0x16d   : > { %4451 = vst [vmem:[#allocation45_spill] sm:$0xff] %v3913_v14  ;;  %2121 = vmatprep.subr.mxu0 %v1777_v23  ;;  %2192 = vmatprep.subr.mxu1 %v1779_v10  ;;  %v962_v23 = vadd.f32 %v4459_v32, %v4457_v0  ;;  %v1745_v10 = vmax.f32 %v813_v56, 0.0  ;;  %v799_v22 = vadd.f32 %v4460_v33, %v4457_v0  ;;  %v1746_v4 = vmax.f32 %v972_v41, 0.0  ;;  %v4463_v32 = vld [vmem:[#allocation26_spill] sm:$0xff]  ;;  %v4465_v33 = vld [vmem:[#allocation24_spill] sm:$0xff]  ;;  %v4466_v41 = vld [vmem:[#allocation25_spill] sm:$0xff] }
 0x16e   : > { %v3923_v15 = vpop.f32.mrf.mxu0  ;;  %v3925_v21 = vpop.f32.mrf.mxu1  ;;  %2122 = vmatpush1.msra.mxu0 %v1776_v18  ;;  %2193 = vmatpush1.msra.mxu1 %v1778_v45  ;;  %v795_v56 = vadd.f32 %v4463_v32, %v4462_v12  ;;  %v1731_v51 = vmax.f32 %v968_v25, 0.0  ;;  %v793_v5 = vadd.f32 %v4465_v33, %v4462_v12  ;;  %v954_v26 = vadd.f32 %v4466_v41, %v4462_v12  ;;  %v4469_v6 = vld [vmem:[#allocation22_spill] sm:$0xff] }
 0x16f   : > { %2123 = vmatprep.subr.mxu0 %v1761_v3  ;;  %2194 = vmatprep.subr.mxu1 %v1763_v8  ;;  %v956_v3 = vadd.f32 %v4464_v30, %v4462_v12  ;;  %v1729_v8 = vmax.f32 %v807_v16, 0.0  ;;  %v1728_v49 = vmax.f32 %v805_v7, 0.0  ;;  %v1730_v11 = vmax.f32 %v966_v42, 0.0 }
 0x170   : > { %v3935_v18 = vpop.f32.mrf.mxu0  ;;  %v3937_v45 = vpop.f32.mrf.mxu1  ;;  %2124 = vmatpush1.msra.mxu0 %v1760_v61  ;;  %2195 = vmatpush1.msra.mxu1 %v1762_v58  ;;  %v1713_v32 = vmax.f32 %v801_v17, 0.0  ;;  %v1715_v30 = vmax.f32 %v962_v23, 0.0  ;;  %v1712_v16 = vmax.f32 %v799_v22, 0.0  ;;  %v1714_v25 = vmax.f32 %v960_v53, 0.0 }
 0x171   : > { %2125 = vmatprep.subr.mxu0 %v1745_v10  ;;  %2196 = vmatprep.subr.mxu1 %v1747_v24  ;;  %v1697_v7 = vmax.f32 %v795_v56, 0.0  ;;  %v1699_v42 = vmax.f32 %v956_v3, 0.0  ;;  %v1696_v33 = vmax.f32 %v793_v5, 0.0  ;;  %v1698_v41 = vmax.f32 %v954_v26, 0.0 }
 0x172   : > { %v3947_v61 = vpop.f32.mrf.mxu0  ;;  %v3949_v58 = vpop.f32.mrf.mxu1  ;;  %2126 = vmatpush1.msra.mxu0 %v1744_v52  ;;  %2197 = vmatpush1.msra.mxu1 %v1746_v4  ;;  %v4468_v53 = vmov 0.0  }
 0x173   : > { %2127 = vmatprep.subr.mxu0 %v1729_v8  ;;  %2198 = vmatprep.subr.mxu1 %v1731_v51 }
 0x174   : > { %v3951_v10 = vpop.f32.mrf.mxu0  ;;  %v3953_v24 = vpop.f32.mrf.mxu1  ;;  %2128 = vmatpush1.msra.mxu0 %v1728_v49  ;;  %2199 = vmatpush1.msra.mxu1 %v1730_v11  ;;  %v4467_v49 = vld [vmem:[#allocation15_spill] sm:$0xff] }
 0x175   : > { %2129 = vmatprep.subr.mxu0 %v1713_v32  ;;  %2200 = vmatprep.subr.mxu1 %v1715_v30 }
 0x176   : > { %v3955_v52 = vpop.f32.mrf.mxu0  ;;  %v3957_v17 = vpop.f32.mrf.mxu1  ;;  %2130 = vmatpush1.msra.mxu0 %v1712_v16  ;;  %2201 = vmatpush1.msra.mxu1 %v1714_v25 }
 0x177   : > { %2131 = vmatprep.subr.mxu0 %v1697_v7  ;;  %2202 = vmatprep.subr.mxu1 %v1699_v42 }
 0x178   : > { %v3959_v51 = vpop.f32.mrf.mxu0  ;;  %v3961_v23 = vpop.f32.mrf.mxu1  ;;  %2132 = vmatpush1.msra.mxu0 %v1696_v33  ;;  %2203 = vmatpush1.msra.mxu1 %v1698_v41 }
 0x179   : > { %2166 = vmatmul.mubr.f32.vlgmr.msra.gmra.mxu0 %v4467_v49  ;;  %2237 = vmatmul.mubr.f32.vlgmr.msra.gmra.mxu1 %v4467_v49 }
 0x17a   : > { %v3965_v11 = vpop.f32.mrf.mxu0  ;;  %v3967_v22 = vpop.f32.mrf.mxu1  ;;  %2307 = vmatprep.mubr.f32.mxu0 %v4468_v53  ;;  %2378 = vmatprep.mubr.f32.mxu1 %v4468_v53 }
 0x17c   : > { %v3971_v4 = vpop.f32.mrf.mxu0  ;;  %v3973_v56 = vpop.f32.mrf.mxu1 }
 0x17e   : > { %v3975_v3 = vpop.f32.mrf.mxu0  ;;  %v3977_v8 = vpop.f32.mrf.mxu1 }
 0x180   : > { %v3979_v5 = vpop.f32.mrf.mxu0  ;;  %v3981_v26 = vpop.f32.mrf.mxu1 }
 0x182   : > { %v1180_v32 = vpop.f32.mrf.mxu0  ;;  %v1341_v30 = vpop.f32.mrf.mxu1 }
 0x184   : > { %v1182_v16 = vpop.f32.mrf.mxu0  ;;  %v1343_v25 = vpop.f32.mrf.mxu1 }
 0x186   : > { %v1186_v7 = vpop.f32.mrf.mxu0  ;;  %v1347_v42 = vpop.f32.mrf.mxu1 }
 0x188   : > { %v1188_v33 = vpop.f32.mrf.mxu0  ;;  %v1349_v41 = vpop.f32.mrf.mxu1 }
 0x18a   : > { %v1192_v49 = vpop.f32.mrf.mxu0  ;;  %v1353_v53 = vpop.f32.mrf.mxu1 }
 0x18c   : > { %v1194_v12 = vpop.f32.mrf.mxu0  ;;  %v1355_v48 = vpop.f32.mrf.mxu1 }
 0x18e   : > { %v1198_v19 = vpop.f32.mrf.mxu0  ;;  %v1359_v54 = vpop.f32.mrf.mxu1 }
 0x18f   : > { %v1199_v44 = vadd.f32 %v1198_v19, %v4415_v34  ;;  %v1360_v1 = vadd.f32 %v1359_v54, %v4415_v34  ;;  %v1189_v54 = vadd.f32 %v1188_v33, %v3532_v50  ;;  %v1183_v33 = vadd.f32 %v1182_v16, %v3540_v55 }
 0x190   : > { %v1200_v0 = vpop.f32.mrf.mxu0  ;;  %v1361_v29 = vpop.f32.mrf.mxu1  ;;  %v1338_v16 = vadd.f32 %v3981_v26, %v3544_v57 }
 0x191   : > { %v1201_v28 = vadd.f32 %v1200_v0, %v4415_v34  ;;  %v1362_v20 = vadd.f32 %v1361_v29, %v4415_v34  ;;  %v1193_v29 = vadd.f32 %v1192_v49, %v3514_v38  ;;  %v1877_v26 = vmax.f32 %v1183_v33, 0.0 }
 0x192   : > { %v1204_v46 = vpop.f32.mrf.mxu0  ;;  %v1365_v43 = vpop.f32.mrf.mxu1 }
 0x193   : > { %v1205_v9 = vadd.f32 %v1204_v46, %v4469_v6  ;;  %v1366_v47 = vadd.f32 %v1365_v43, %v4469_v6  ;;  %v1195_v46 = vadd.f32 %v1194_v12, %v3514_v38  ;;  %v1356_v43 = vadd.f32 %v1355_v48, %v3514_v38 }
 0x194   : > { %v1206_v62 = vpop.f32.mrf.mxu0  ;;  %v1367_v13 = vpop.f32.mrf.mxu1  ;;  %v1927_v12 = vmax.f32 %v1362_v20, 0.0  ;;  %v1187_v48 = vadd.f32 %v1186_v7, %v3532_v50  ;;  %v1342_v7 = vadd.f32 %v1341_v30, %v3540_v55  ;;  %v1336_v30 = vadd.f32 %v3977_v8, %v3544_v57 }
 0x195   : > { %v1207_v60 = vadd.f32 %v1206_v62, %v4469_v6  ;;  %v1368_v37 = vadd.f32 %v1367_v13, %v4469_v6  ;;  %v1354_v62 = vadd.f32 %v1353_v53, %v3514_v38  ;;  %v1940_v14 = vmax.f32 %v1205_v9, 0.0 }
 0x196   : > { %v3991_v31 = vpop.f32.mrf.mxu0  ;;  %v3993_v39 = vpop.f32.mrf.mxu1  ;;  %v1942_v13 = vmax.f32 %v1366_v47, 0.0  ;;  %v1926_v53 = vmax.f32 %v1360_v1, 0.0  ;;  %v1911_v20 = vmax.f32 %v1356_v43, 0.0  ;;  %v1330_v8 = vadd.f32 %v3967_v22, %v3554_v63 }
 0x197   : > { %4470 = vst [vmem:[#allocation41_spill] sm:$0xff] %v3991_v31  ;;  %4471 = vst [vmem:[#allocation42_spill] sm:$0xff] %v3993_v39  ;;  %v1941_v2 = vmax.f32 %v1207_v60, 0.0  ;;  %v1943_v0 = vmax.f32 %v1368_v37, 0.0  ;;  %v1350_v39 = vadd.f32 %v1349_v41, %v3532_v50  ;;  %v1925_v31 = vmax.f32 %v1201_v28, 0.0 }
 0x198   : > { %v3999_v6 = vpop.f32.mrf.mxu0  ;;  %v4001_v19 = vpop.f32.mrf.mxu1  ;;  %v1348_v37 = vadd.f32 %v1347_v42, %v3532_v50  ;;  %v1924_v60 = vmax.f32 %v1199_v44, 0.0  ;;  %v1344_v41 = vadd.f32 %v1343_v25, %v3540_v55  ;;  %v1909_v28 = vmax.f32 %v1195_v46, 0.0 }
 0x199   : > { %4472 = vst [vmem:[#allocation39_spill] sm:$0xff] %v3999_v6  ;;  %4473 = vst [vmem:[#allocation40_spill] sm:$0xff] %v4001_v19  ;;  %2243 = vmatprep.subr.mxu0 %v1941_v2  ;;  %2314 = vmatprep.subr.mxu1 %v1943_v0  ;;  %v1181_v2 = vadd.f32 %v1180_v32, %v3540_v55  ;;  %v1908_v44 = vmax.f32 %v1193_v29, 0.0  ;;  %v1910_v1 = vmax.f32 %v1354_v62, 0.0  ;;  %v1895_v25 = vmax.f32 %v1350_v39, 0.0 }
 0x19a   : > { %v4007_v9 = vpop.f32.mrf.mxu0  ;;  %v4009_v47 = vpop.f32.mrf.mxu1  ;;  %2244 = vmatpush1.msra.mxu0 %v1940_v14  ;;  %2315 = vmatpush1.msra.mxu1 %v1942_v13  ;;  %v1177_v14 = vadd.f32 %v3979_v5, %v3544_v57  ;;  %v1175_v32 = vadd.f32 %v3975_v3, %v3544_v57  ;;  %v1892_v46 = vmax.f32 %v1187_v48, 0.0  ;;  %v1894_v43 = vmax.f32 %v1348_v37, 0.0 }
 0x19b   : > { %4474 = vst [vmem:[#allocation36_spill] sm:$0xff] %v4007_v9  ;;  %4475 = vst [vmem:[#allocation37_spill] sm:$0xff] %v4009_v47  ;;  %2245 = vmatprep.subr.mxu0 %v1925_v31  ;;  %2316 = vmatprep.subr.mxu1 %v1927_v12  ;;  %v1893_v31 = vmax.f32 %v1189_v54, 0.0  ;;  %v1171_v5 = vadd.f32 %v3971_v4, %v3554_v63  ;;  %v1332_v39 = vadd.f32 %v3973_v56, %v3554_v63 }
 0x19c   : > { %v4015_v42 = vpop.f32.mrf.mxu0  ;;  %v4017_v49 = vpop.f32.mrf.mxu1  ;;  %2246 = vmatpush1.msra.mxu0 %v1924_v60  ;;  %2317 = vmatpush1.msra.mxu1 %v1926_v53  ;;  %v1879_v62 = vmax.f32 %v1344_v41, 0.0  ;;  %v1169_v3 = vadd.f32 %v3965_v11, %v3554_v63  ;;  %v1876_v13 = vmax.f32 %v1181_v2, 0.0  ;;  %v1878_v54 = vmax.f32 %v1342_v7, 0.0 }
 0x19d   : > { %4476 = vst [vmem:[#allocation34_spill] sm:$0xff] %v4015_v42  ;;  %4477 = vst [vmem:[#allocation35_spill] sm:$0xff] %v4017_v49  ;;  %2247 = vmatprep.subr.mxu0 %v1909_v28  ;;  %2318 = vmatprep.subr.mxu1 %v1911_v20  ;;  %v1165_v4 = vadd.f32 %v3959_v51, %v3566_v59  ;;  %v1326_v56 = vadd.f32 %v3961_v23, %v3566_v59  ;;  %v1861_v37 = vmax.f32 %v1177_v14, 0.0 }
 0x19e   : > { %v4027_v0 = vpop.f32.mrf.mxu0  ;;  %v4029_v29 = vpop.f32.mrf.mxu1  ;;  %2248 = vmatpush1.msra.mxu0 %v1908_v44  ;;  %2319 = vmatpush1.msra.mxu1 %v1910_v1  ;;  %v1863_v60 = vmax.f32 %v1338_v16, 0.0  ;;  %v1163_v11 = vadd.f32 %v3955_v52, %v3566_v59  ;;  %v1324_v22 = vadd.f32 %v3957_v17, %v3566_v59  ;;  %v1860_v53 = vmax.f32 %v1175_v32, 0.0 }
 0x19f   : > { %4478 = vst [vmem:[#allocation32_spill] sm:$0xff] %v4027_v0  ;;  %4479 = vst [vmem:[#allocation33_spill] sm:$0xff] %v4029_v29  ;;  %2249 = vmatprep.subr.mxu0 %v1893_v31  ;;  %2320 = vmatprep.subr.mxu1 %v1895_v25  ;;  %v1862_v33 = vmax.f32 %v1336_v30, 0.0  ;;  %v1159_v51 = vadd.f32 %v3951_v10, %v3586_v40  ;;  %v1320_v23 = vadd.f32 %v3953_v24, %v3586_v40 }
 0x1a0   : > { %v4039_v12 = vpop.f32.mrf.mxu0  ;;  %v4041_v48 = vpop.f32.mrf.mxu1  ;;  %2250 = vmatpush1.msra.mxu0 %v1892_v46  ;;  %2321 = vmatpush1.msra.mxu1 %v1894_v43  ;;  %v1845_v20 = vmax.f32 %v1171_v5, 0.0  ;;  %v1847_v2 = vmax.f32 %v1332_v39, 0.0  ;;  %v1157_v52 = vadd.f32 %v3947_v61, %v3586_v40  ;;  %v1318_v17 = vadd.f32 %v3949_v58, %v3586_v40 }
 0x1a1   : > { %4480 = vst [vmem:[#allocation30_spill] sm:$0xff] %v4039_v12  ;;  %4481 = vst [vmem:[#allocation31_spill] sm:$0xff] %v4041_v48  ;;  %2251 = vmatprep.subr.mxu0 %v1877_v26  ;;  %2322 = vmatprep.subr.mxu1 %v1879_v62  ;;  %v1844_v7 = vmax.f32 %v1169_v3, 0.0  ;;  %v1846_v44 = vmax.f32 %v1330_v8, 0.0  ;;  %v1153_v10 = vadd.f32 %v3935_v18, %v3600_v36  ;;  %v1829_v16 = vmax.f32 %v1165_v4, 0.0  ;;  %v4490_v26 = vld [vmem:[#allocation44_spill] sm:$0xff] }
 0x1a2   : > { %v4051_v41 = vpop.f32.mrf.mxu0  ;;  %v4053_v28 = vpop.f32.mrf.mxu1  ;;  %2252 = vmatpush1.msra.mxu0 %v1876_v13  ;;  %2323 = vmatpush1.msra.mxu1 %v1878_v54  ;;  %v1314_v24 = vadd.f32 %v3937_v45, %v3600_v36  ;;  %v1831_v31 = vmax.f32 %v1326_v56, 0.0  ;;  %v1151_v61 = vadd.f32 %v3923_v15, %v3600_v36  ;;  %v1312_v58 = vadd.f32 %v3925_v21, %v3600_v36  ;;  %v4488_v45 = vld [vmem:[#allocation45_spill] sm:$0xff]  ;;  %v4489_v15 = vld [vmem:[#allocation19_spill] sm:$0xff]  ;;  %v4494_v4 = vld [vmem:[#allocation20_spill] sm:$0xff] }
 0x1a3   : > { %4482 = vst [vmem:[#allocation28_spill] sm:$0xff] %v4051_v41  ;;  %4483 = vst [vmem:[#allocation29_spill] sm:$0xff] %v4053_v28  ;;  %2253 = vmatprep.subr.mxu0 %v1861_v37  ;;  %2324 = vmatprep.subr.mxu1 %v1863_v60  ;;  %v1828_v25 = vmax.f32 %v1163_v11, 0.0  ;;  %v1830_v32 = vmax.f32 %v1324_v22, 0.0  ;;  %v1147_v18 = vadd.f32 %v3911_v35, %v3626_v27  ;;  %v1813_v5 = vmax.f32 %v1159_v51, 0.0  ;;  %v4493_v35 = vld [vmem:[#allocation38_spill] sm:$0xff] }
 0x1a4   : > { %v4063_v1 = vpop.f32.mrf.mxu0  ;;  %v4065_v14 = vpop.f32.mrf.mxu1  ;;  %2254 = vmatpush1.msra.mxu0 %v1860_v53  ;;  %2325 = vmatpush1.msra.mxu1 %v1862_v33  ;;  %v1308_v43 = vadd.f32 %v4488_v45, %v3626_v27  ;;  %v1815_v39 = vmax.f32 %v1320_v23, 0.0  ;;  %v1145_v21 = vadd.f32 %v4489_v15, %v3626_v27  ;;  %v1306_v62 = vadd.f32 %v4490_v26, %v3626_v27  ;;  %v4495_v37 = vld [vmem:[#allocation21_spill] sm:$0xff]  ;;  %v4497_v51 = vld [vmem:[#allocation50_spill] sm:$0xff] }
 0x1a5   : > { %4484 = vst [vmem:[#allocation26_spill] sm:$0xff] %v4063_v1  ;;  %4485 = vst [vmem:[#allocation27_spill] sm:$0xff] %v4065_v14  ;;  %2255 = vmatprep.subr.mxu0 %v1845_v20  ;;  %2326 = vmatprep.subr.mxu1 %v1847_v2  ;;  %v1812_v3 = vmax.f32 %v1157_v52, 0.0  ;;  %v1814_v8 = vmax.f32 %v1318_v17, 0.0  ;;  %v1141_v56 = vadd.f32 %v4494_v4, %v4493_v35  ;;  %v1797_v11 = vmax.f32 %v1153_v10, 0.0  ;;  %v4496_v53 = vld [vmem:[#allocation49_spill] sm:$0xff] }
 0x1a6   : > { %v4075_v30 = vpop.f32.mrf.mxu0  ;;  %v4077_v46 = vpop.f32.mrf.mxu1  ;;  %2256 = vmatpush1.msra.mxu0 %v1844_v7  ;;  %2327 = vmatpush1.msra.mxu1 %v1846_v44  ;;  %v1302_v60 = vadd.f32 %v4495_v37, %v4493_v35  ;;  %v1799_v22 = vmax.f32 %v1314_v24, 0.0  ;;  %v1139_v33 = vadd.f32 %v4496_v53, %v4493_v35  ;;  %v1300_v23 = vadd.f32 %v4497_v51, %v4493_v35  ;;  %v4500_v7 = vld [vmem:[#allocation43_spill] sm:$0xff]  ;;  %v4502_v24 = vld [vmem:[#allocation48_spill] sm:$0xff]  ;;  %v4523_v12 = vld [vmem:[#allocation22_spill] sm:$0xff] }
 0x1a7   : > { %4486 = vst [vmem:[#allocation24_spill] sm:$0xff] %v4075_v30  ;;  %4487 = vst [vmem:[#allocation25_spill] sm:$0xff] %v4077_v46  ;;  %2257 = vmatprep.subr.mxu0 %v1829_v16  ;;  %2328 = vmatprep.subr.mxu1 %v1831_v31  ;;  %v1796_v20 = vmax.f32 %v1151_v61, 0.0  ;;  %v1798_v2 = vmax.f32 %v1312_v58, 0.0  ;;  %v4501_v44 = vld [vmem:[#allocation47_spill] sm:$0xff]  ;;  %v1296_v16 = vadd.f32 %v4502_v24, %v4500_v7  ;;  %v1781_v31 = vmax.f32 %v1147_v18, 0.0 }
 0x1a8   : > { %v4087_v13 = vpop.f32.mrf.mxu0  ;;  %v4089_v54 = vpop.f32.mrf.mxu1  ;;  %2258 = vmatpush1.msra.mxu0 %v1828_v25  ;;  %2329 = vmatpush1.msra.mxu1 %v1830_v32  ;;  %v1135_v10 = vadd.f32 %v4501_v44, %v4500_v7  ;;  %v1783_v25 = vmax.f32 %v1308_v43, 0.0  ;;  %v4503_v32 = vld [vmem:[#allocation4_spill] sm:$0xff]  ;;  %v4504_v58 = vld [vmem:[#allocation23_spill] sm:$0xff]  ;;  %v1765_v37 = vmax.f32 %v1141_v56, 0.0  ;;  %v1764_v51 = vmax.f32 %v1139_v33, 0.0  ;;  %v4511_v24 = vld [vmem:[#allocation17_spill] sm:$0xff] }
 0x1a9   : > { %4491 = vst [vmem:[#allocation15_spill] sm:$0xff] %v4087_v13  ;;  %4492 = vst [vmem:[#allocation45_spill] sm:$0xff] %v4089_v54  ;;  %2259 = vmatprep.subr.mxu0 %v1813_v5  ;;  %2330 = vmatprep.subr.mxu1 %v1815_v39  ;;  %v1133_v61 = vadd.f32 %v4503_v32, %v4500_v7  ;;  %v1294_v45 = vadd.f32 %v4504_v58, %v4500_v7  ;;  %v1780_v5 = vmax.f32 %v1145_v21, 0.0  ;;  %v4508_v43 = vld [vmem:[#allocation3_spill] sm:$0xff]  ;;  %v4512_v32 = vld [vmem:[#allocation10_spill] sm:$0xff] }
 0x1aa   : > { %v4099_v52 = vpop.f32.mrf.mxu0  ;;  %v4101_v17 = vpop.f32.mrf.mxu1  ;;  %2260 = vmatpush1.msra.mxu0 %v1812_v3  ;;  %2331 = vmatpush1.msra.mxu1 %v1814_v8  ;;  %v1782_v39 = vmax.f32 %v1306_v62, 0.0  ;;  %v4506_v3 = vld [vmem:[#allocation46_spill] sm:$0xff]  ;;  %v4510_v62 = vld [vmem:[#allocation5_spill] sm:$0xff]  ;;  %v1766_v44 = vmax.f32 %v1300_v23, 0.0  ;;  %v1123_v56 = vadd.f32 %v4512_v32, %v4511_v24  ;;  %v1751_v58 = vmax.f32 %v1296_v16, 0.0  ;;  %v4518_v16 = vld [vmem:[#allocation11_spill] sm:$0xff] }
 0x1ab   : > { %4498 = vst [vmem:[#allocation19_spill] sm:$0xff] %v4099_v52  ;;  %4499 = vst [vmem:[#allocation44_spill] sm:$0xff] %v4101_v17  ;;  %2261 = vmatprep.subr.mxu0 %v1797_v11  ;;  %2332 = vmatprep.subr.mxu1 %v1799_v22  ;;  %v4507_v8 = vld [vmem:[#allocation6_spill] sm:$0xff]  ;;  %v1290_v4 = vadd.f32 %v4508_v43, %v4506_v3  ;;  %v1767_v11 = vmax.f32 %v1302_v60, 0.0  ;;  %v4509_v22 = vld [vmem:[#allocation8_spill] sm:$0xff]  ;;  %v1288_v53 = vadd.f32 %v4510_v62, %v4506_v3 }
 0x1ac   : > { %v4111_v15 = vpop.f32.mrf.mxu0  ;;  %v4113_v26 = vpop.f32.mrf.mxu1  ;;  %2262 = vmatpush1.msra.mxu0 %v1796_v20  ;;  %2333 = vmatpush1.msra.mxu1 %v1798_v2  ;;  %v1129_v18 = vadd.f32 %v4507_v8, %v4506_v3  ;;  %v1127_v21 = vadd.f32 %v4509_v22, %v4506_v3  ;;  %v4513_v60 = vld [vmem:[#allocation7_spill] sm:$0xff]  ;;  %v4514_v8 = vld [vmem:[#allocation12_spill] sm:$0xff]  ;;  %v4515_v23 = vld [vmem:[#allocation9_spill] sm:$0xff]  ;;  %v1748_v22 = vmax.f32 %v1133_v61, 0.0  ;;  %v1750_v62 = vmax.f32 %v1294_v45, 0.0 }
 0x1ad   : > { %4505 = vst [vmem:[#allocation20_spill] sm:$0xff] %v4113_v26  ;;  %2263 = vmatprep.subr.mxu0 %v1781_v31  ;;  %2334 = vmatprep.subr.mxu1 %v1783_v25  ;;  %v1284_v31 = vadd.f32 %v4513_v60, %v4511_v24  ;;  %v1749_v25 = vmax.f32 %v1135_v10, 0.0  ;;  %v1121_v33 = vadd.f32 %v4514_v8, %v4511_v24  ;;  %v4516_v32 = vld [vmem:[#allocation18_spill] sm:$0xff]  ;;  %v1735_v19 = vmax.f32 %v1290_v4, 0.0  ;;  %v4519_v8 = vld [vmem:[#allocation16_spill] sm:$0xff]  ;;  %v4520_v45 = vld [vmem:[#allocation13_spill] sm:$0xff] }
 0x1ae   : > { %v4123_v20 = vpop.f32.mrf.mxu0  ;;  %v4125_v2 = vpop.f32.mrf.mxu1  ;;  %2264 = vmatpush1.msra.mxu0 %v1780_v5  ;;  %2335 = vmatpush1.msra.mxu1 %v1782_v39  ;;  %v1282_v43 = vadd.f32 %v4515_v23, %v4511_v24  ;;  %v4517_v60 = vld [vmem:[#allocation14_spill] sm:$0xff]  ;;  %v1115_v61 = vadd.f32 %v4519_v8, %v4516_v32  ;;  %v1276_v23 = vadd.f32 %v4520_v45, %v4516_v32  ;;  %v1732_v6 = vmax.f32 %v1127_v21, 0.0 }
 0x1af   : > { %2265 = vmatprep.subr.mxu0 %v1765_v37  ;;  %2336 = vmatprep.subr.mxu1 %v1767_v11  ;;  %v1117_v10 = vadd.f32 %v4517_v60, %v4516_v32  ;;  %v1278_v37 = vadd.f32 %v4518_v16, %v4516_v32  ;;  %v1733_v11 = vmax.f32 %v1129_v18, 0.0  ;;  %v1734_v47 = vmax.f32 %v1288_v53, 0.0 }
 0x1b0   : > { %v4135_v5 = vpop.f32.mrf.mxu0  ;;  %v4137_v39 = vpop.f32.mrf.mxu1  ;;  %2266 = vmatpush1.msra.mxu0 %v1764_v51  ;;  %2337 = vmatpush1.msra.mxu1 %v1766_v44  ;;  %v1717_v60 = vmax.f32 %v1123_v56, 0.0  ;;  %v1719_v16 = vmax.f32 %v1284_v31, 0.0  ;;  %v1716_v18 = vmax.f32 %v1121_v33, 0.0  ;;  %v1718_v4 = vmax.f32 %v1282_v43, 0.0 }
 0x1b1   : > { %2267 = vmatprep.subr.mxu0 %v1749_v25  ;;  %2338 = vmatprep.subr.mxu1 %v1751_v58  ;;  %v1701_v21 = vmax.f32 %v1117_v10, 0.0  ;;  %v1703_v53 = vmax.f32 %v1278_v37, 0.0  ;;  %v1700_v8 = vmax.f32 %v1115_v61, 0.0  ;;  %v1702_v45 = vmax.f32 %v1276_v23, 0.0 }
 0x1b2   : > { %v4147_v51 = vpop.f32.mrf.mxu0  ;;  %v4149_v44 = vpop.f32.mrf.mxu1  ;;  %2268 = vmatpush1.msra.mxu0 %v1748_v22  ;;  %2339 = vmatpush1.msra.mxu1 %v1750_v62  ;;  %v4522_v43 = vmov 0.0  }
 0x1b3   : > { %2269 = vmatprep.subr.mxu0 %v1733_v11  ;;  %2340 = vmatprep.subr.mxu1 %v1735_v19 }
 0x1b4   : > { %v4151_v25 = vpop.f32.mrf.mxu0  ;;  %v4153_v58 = vpop.f32.mrf.mxu1  ;;  %2270 = vmatpush1.msra.mxu0 %v1732_v6  ;;  %2341 = vmatpush1.msra.mxu1 %v1734_v47  ;;  %v4166_v6 = vld [vmem:[%s4307_s3] sm:$0x1] }
 0x1b5   : > { %2271 = vmatprep.subr.mxu0 %v1717_v60  ;;  %2342 = vmatprep.subr.mxu1 %v1719_v16  ;;  %4521 = vst [vmem:[#allocation21_spill] sm:$0xff] %v4166_v6 }
 0x1b6   : > { %v4155_v22 = vpop.f32.mrf.mxu0  ;;  %v4157_v56 = vpop.f32.mrf.mxu1  ;;  %2272 = vmatpush1.msra.mxu0 %v1716_v18  ;;  %2343 = vmatpush1.msra.mxu1 %v1718_v4 }
 0x1b7   : > { %2273 = vmatprep.subr.mxu0 %v1701_v21  ;;  %2344 = vmatprep.subr.mxu1 %v1703_v53 }
 0x1b8   : > { %v4159_v19 = vpop.f32.mrf.mxu0  ;;  %v4161_v31 = vpop.f32.mrf.mxu1  ;;  %2274 = vmatpush1.msra.mxu0 %v1700_v8  ;;  %2345 = vmatpush1.msra.mxu1 %v1702_v45 }
 0x1b9   : > { %2308 = vmatmul.mubr.f32.vlgmr.msra.gmra.mxu0 %v4166_v6  ;;  %2379 = vmatmul.mubr.f32.vlgmr.msra.gmra.mxu1 %v4166_v6 }
 0x1ba   : > { %v4170_v47 = vpop.f32.mrf.mxu0  ;;  %v4172_v33 = vpop.f32.mrf.mxu1  ;;  %2449 = vmatprep.mubr.f32.mxu0 %v4522_v43  ;;  %2520 = vmatprep.mubr.f32.mxu1 %v4522_v43 }
 0x1bc   : > { %v4176_v62 = vpop.f32.mrf.mxu0  ;;  %v4178_v10 = vpop.f32.mrf.mxu1 }
 0x1be   : > { %v4180_v37 = vpop.f32.mrf.mxu0  ;;  %v4182_v11 = vpop.f32.mrf.mxu1 }
 0x1c0   : > { %v1498_v61 = vpop.f32.mrf.mxu0  ;;  %v1659_v23 = vpop.f32.mrf.mxu1 }
 0x1c2   : > { %v1502_v60 = vpop.f32.mrf.mxu0  ;;  %v1663_v16 = vpop.f32.mrf.mxu1 }
 0x1c4   : > { %v1504_v18 = vpop.f32.mrf.mxu0  ;;  %v1665_v4 = vpop.f32.mrf.mxu1 }
 0x1c6   : > { %v1508_v21 = vpop.f32.mrf.mxu0  ;;  %v1669_v53 = vpop.f32.mrf.mxu1 }
 0x1c8   : > { %v1510_v8 = vpop.f32.mrf.mxu0  ;;  %v1671_v45 = vpop.f32.mrf.mxu1 }
 0x1ca   : > { %v1514_v6 = vpop.f32.mrf.mxu0  ;;  %v1675_v43 = vpop.f32.mrf.mxu1 }
 0x1cb   : > { %v1515_v52 = vadd.f32 %v1514_v6, %v3514_v38  ;;  %v1658_v6 = vadd.f32 %v4182_v11, %v3544_v57 }
 0x1cc   : > { %v1516_v32 = vpop.f32.mrf.mxu0  ;;  %v1677_v9 = vpop.f32.mrf.mxu1 }
 0x1cd   : > { %v1517_v35 = vadd.f32 %v1516_v32, %v3514_v38 }
 0x1ce   : > { %v1520_v49 = vpop.f32.mrf.mxu0  ;;  %v1681_v42 = vpop.f32.mrf.mxu1 }
 0x1cf   : > { %v1521_v54 = vadd.f32 %v1520_v49, %v4415_v34  ;;  %v1682_v13 = vadd.f32 %v1681_v42, %v4415_v34 }
 0x1d0   : > { %v1522_v24 = vpop.f32.mrf.mxu0  ;;  %v1683_v29 = vpop.f32.mrf.mxu1 }
 0x1d1   : > { %v1523_v1 = vadd.f32 %v1522_v24, %v4415_v34  ;;  %v1684_v7 = vadd.f32 %v1683_v29, %v4415_v34  ;;  %v1676_v24 = vadd.f32 %v1675_v43, %v3514_v38  ;;  %v1509_v34 = vadd.f32 %v1508_v21, %v3532_v50 }
 0x1d2   : > { %v1526_v0 = vpop.f32.mrf.mxu0  ;;  %v1687_v48 = vpop.f32.mrf.mxu1  ;;  %v1928_v42 = vmax.f32 %v1521_v54, 0.0 }
 0x1d3   : > { %v1527_v3 = vadd.f32 %v1526_v0, %v4523_v12  ;;  %v1688_v28 = vadd.f32 %v1687_v48, %v4523_v12  ;;  %v1678_v0 = vadd.f32 %v1677_v9, %v3514_v38  ;;  %v1931_v49 = vmax.f32 %v1684_v7, 0.0 }
 0x1d4   : > { %v1528_v41 = vpop.f32.mrf.mxu0  ;;  %v1689_v14 = vpop.f32.mrf.mxu1  ;;  %v1670_v9 = vadd.f32 %v1669_v53, %v3532_v50  ;;  %v1505_v38 = vadd.f32 %v1504_v18, %v3540_v55  ;;  %v1912_v7 = vmax.f32 %v1515_v52, 0.0  ;;  %v1914_v32 = vmax.f32 %v1676_v24, 0.0 }
 0x1d5   : > { %v1529_v46 = vadd.f32 %v1528_v41, %v4523_v12  ;;  %v1690_v30 = vadd.f32 %v1689_v14, %v4523_v12  ;;  %v1944_v26 = vmax.f32 %v1527_v3, 0.0  ;;  %v1946_v29 = vmax.f32 %v1688_v28, 0.0 }
 0x1d6   : > { %v1511_v41 = vadd.f32 %v1510_v8, %v3532_v50  ;;  %v1672_v12 = vadd.f32 %v1671_v45, %v3532_v50  ;;  %v1929_v14 = vmax.f32 %v1523_v1, 0.0  ;;  %v1666_v28 = vadd.f32 %v1665_v4, %v3540_v55 }
 0x1d7   : > { %v1945_v17 = vmax.f32 %v1529_v46, 0.0  ;;  %v1947_v48 = vmax.f32 %v1690_v30, 0.0  ;;  %v1930_v30 = vmax.f32 %v1682_v13, 0.0  ;;  %v1913_v46 = vmax.f32 %v1517_v35, 0.0 }
 0x1d8   : > { %v1915_v3 = vmax.f32 %v1678_v0, 0.0  ;;  %v1503_v1 = vadd.f32 %v1502_v60, %v3540_v55  ;;  %v1499_v50 = vadd.f32 %v1498_v61, %v3544_v57  ;;  %v1660_v13 = vadd.f32 %v1659_v23, %v3544_v57 }
 0x1d9   : > { %2385 = vmatprep.subr.mxu0 %v1945_v17  ;;  %2456 = vmatprep.subr.mxu1 %v1947_v48  ;;  %v1664_v17 = vadd.f32 %v1663_v16, %v3540_v55  ;;  %v1897_v54 = vmax.f32 %v1511_v41, 0.0  ;;  %v1497_v35 = vadd.f32 %v4180_v37, %v3544_v57  ;;  %v1896_v60 = vmax.f32 %v1509_v34, 0.0 }
 0x1da   : > { %2386 = vmatpush1.msra.mxu0 %v1944_v26  ;;  %2457 = vmatpush1.msra.mxu1 %v1946_v29  ;;  %v1899_v26 = vmax.f32 %v1672_v12, 0.0  ;;  %v1898_v55 = vmax.f32 %v1670_v9, 0.0  ;;  %v1493_v52 = vadd.f32 %v4176_v62, %v3554_v63  ;;  %v1654_v61 = vadd.f32 %v4178_v10, %v3554_v63  ;;  %v4524_v29 = vld [vmem:[#allocation20_spill] sm:$0xff]  ;;  %v4527_v9 = vld [vmem:[#allocation38_spill] sm:$0xff] }
 0x1db   : > { %2387 = vmatprep.subr.mxu0 %v1929_v14  ;;  %2458 = vmatprep.subr.mxu1 %v1931_v49  ;;  %v1881_v23 = vmax.f32 %v1505_v38, 0.0  ;;  %v1883_v16 = vmax.f32 %v1666_v28, 0.0  ;;  %v1491_v37 = vadd.f32 %v4170_v47, %v3554_v63  ;;  %v1652_v57 = vadd.f32 %v4172_v33, %v3554_v63  ;;  %v4525_v14 = vld [vmem:[#allocation19_spill] sm:$0xff]  ;;  %v4526_v49 = vld [vmem:[#allocation44_spill] sm:$0xff] }
 0x1dc   : > { %2388 = vmatpush1.msra.mxu0 %v1928_v42  ;;  %2459 = vmatpush1.msra.mxu1 %v1930_v30  ;;  %v1880_v11 = vmax.f32 %v1503_v1, 0.0  ;;  %v1882_v18 = vmax.f32 %v1664_v17, 0.0  ;;  %v1487_v62 = vadd.f32 %v4159_v19, %v3566_v59  ;;  %v1648_v10 = vadd.f32 %v4161_v31, %v3566_v59  ;;  %v4528_v42 = vld [vmem:[#allocation15_spill] sm:$0xff]  ;;  %v4529_v30 = vld [vmem:[#allocation45_spill] sm:$0xff] }
 0x1dd   : > { %2389 = vmatprep.subr.mxu0 %v1913_v46  ;;  %2460 = vmatprep.subr.mxu1 %v1915_v3  ;;  %v1865_v4 = vmax.f32 %v1499_v50, 0.0  ;;  %v1867_v21 = vmax.f32 %v1660_v13, 0.0  ;;  %v1485_v47 = vadd.f32 %v4155_v22, %v3566_v59  ;;  %v1646_v63 = vadd.f32 %v4157_v56, %v3566_v59  ;;  %v4530_v3 = vld [vmem:[#allocation24_spill] sm:$0xff]  ;;  %v4531_v17 = vld [vmem:[#allocation25_spill] sm:$0xff]  ;;  %v4532_v50 = vld [vmem:[#allocation43_spill] sm:$0xff] }
 0x1de   : > { %2390 = vmatpush1.msra.mxu0 %v1912_v7  ;;  %2461 = vmatpush1.msra.mxu1 %v1914_v32  ;;  %v1864_v33 = vmax.f32 %v1497_v35, 0.0  ;;  %v1866_v53 = vmax.f32 %v1658_v6, 0.0  ;;  %v1481_v19 = vadd.f32 %v4151_v25, %v3586_v40  ;;  %v1642_v31 = vadd.f32 %v4153_v58, %v3586_v40  ;;  %v4533_v13 = vld [vmem:[#allocation26_spill] sm:$0xff] }
 0x1df   : > { %2391 = vmatprep.subr.mxu0 %v1897_v54  ;;  %2462 = vmatprep.subr.mxu1 %v1899_v26  ;;  %v1849_v8 = vmax.f32 %v1493_v52, 0.0  ;;  %v1851_v45 = vmax.f32 %v1654_v61, 0.0  ;;  %v1479_v22 = vadd.f32 %v4147_v51, %v3586_v40  ;;  %v1640_v59 = vadd.f32 %v4149_v44, %v3586_v40  ;;  %v4534_v26 = vld [vmem:[#allocation27_spill] sm:$0xff]  ;;  %v4536_v61 = vld [vmem:[#allocation29_spill] sm:$0xff] }
 0x1e0   : > { %2392 = vmatpush1.msra.mxu0 %v1896_v60  ;;  %2463 = vmatpush1.msra.mxu1 %v1898_v55  ;;  %v1848_v56 = vmax.f32 %v1491_v37, 0.0  ;;  %v1850_v43 = vmax.f32 %v1652_v57, 0.0  ;;  %v1475_v25 = vadd.f32 %v4135_v5, %v3600_v36  ;;  %v1636_v58 = vadd.f32 %v4137_v39, %v3600_v36  ;;  %v4535_v55 = vld [vmem:[#allocation28_spill] sm:$0xff]  ;;  %v4537_v57 = vld [vmem:[#allocation46_spill] sm:$0xff] }
 0x1e1   : > { %2393 = vmatprep.subr.mxu0 %v1881_v23  ;;  %2464 = vmatprep.subr.mxu1 %v1883_v16  ;;  %v1833_v0 = vmax.f32 %v1487_v62, 0.0  ;;  %v1835_v48 = vmax.f32 %v1648_v10, 0.0  ;;  %v1473_v51 = vadd.f32 %v4123_v20, %v3600_v36  ;;  %v1634_v40 = vadd.f32 %v4125_v2, %v3600_v36  ;;  %v4539_v62 = vld [vmem:[#allocation31_spill] sm:$0xff] }
 0x1e2   : > { %2394 = vmatpush1.msra.mxu0 %v1880_v11  ;;  %2465 = vmatpush1.msra.mxu1 %v1882_v18  ;;  %v1832_v44 = vmax.f32 %v1485_v47, 0.0  ;;  %v1834_v24 = vmax.f32 %v1646_v63, 0.0  ;;  %v1469_v5 = vadd.f32 %v4111_v15, %v3626_v27  ;;  %v1630_v39 = vadd.f32 %v4524_v29, %v3626_v27  ;;  %v4538_v11 = vld [vmem:[#allocation30_spill] sm:$0xff]  ;;  %v4540_v47 = vld [vmem:[#allocation32_spill] sm:$0xff] }
 0x1e3   : > { %2395 = vmatprep.subr.mxu0 %v1865_v4  ;;  %2466 = vmatprep.subr.mxu1 %v1867_v21  ;;  %v1817_v41 = vmax.f32 %v1481_v19, 0.0  ;;  %v1819_v12 = vmax.f32 %v1642_v31, 0.0  ;;  %v1467_v20 = vadd.f32 %v4525_v14, %v3626_v27  ;;  %v1628_v36 = vadd.f32 %v4526_v49, %v3626_v27 }
 0x1e4   : > { %2396 = vmatpush1.msra.mxu0 %v1864_v33  ;;  %2467 = vmatpush1.msra.mxu1 %v1866_v53  ;;  %v1816_v2 = vmax.f32 %v1479_v22, 0.0  ;;  %v1818_v34 = vmax.f32 %v1640_v59, 0.0  ;;  %v1463_v15 = vadd.f32 %v4528_v42, %v4527_v9  ;;  %v1624_v38 = vadd.f32 %v4529_v30, %v4527_v9  ;;  %v4541_v33 = vld [vmem:[#allocation33_spill] sm:$0xff]  ;;  %v4544_v59 = vld [vmem:[#allocation35_spill] sm:$0xff] }
 0x1e5   : > { %2397 = vmatprep.subr.mxu0 %v1849_v8  ;;  %2468 = vmatprep.subr.mxu1 %v1851_v45  ;;  %v1801_v28 = vmax.f32 %v1475_v25, 0.0  ;;  %v1803_v46 = vmax.f32 %v1636_v58, 0.0  ;;  %v1461_v1 = vadd.f32 %v4530_v3, %v4527_v9  ;;  %v1622_v27 = vadd.f32 %v4531_v17, %v4527_v9  ;;  %v4542_v8 = vld [vmem:[#allocation17_spill] sm:$0xff]  ;;  %v4543_v45 = vld [vmem:[#allocation34_spill] sm:$0xff]  ;;  %v4545_v58 = vld [vmem:[#allocation36_spill] sm:$0xff] }
 0x1e6   : > { %2398 = vmatpush1.msra.mxu0 %v1848_v56  ;;  %2469 = vmatpush1.msra.mxu1 %v1850_v43  ;;  %v1800_v7 = vmax.f32 %v1473_v51, 0.0  ;;  %v1802_v32 = vmax.f32 %v1634_v40, 0.0  ;;  %v1457_v54 = vadd.f32 %v4533_v13, %v4532_v50  ;;  %v1618_v35 = vadd.f32 %v4534_v26, %v4532_v50  ;;  %v4552_v17 = vld [vmem:[#allocation21_spill] sm:$0xff] }
 0x1e7   : > { %2399 = vmatprep.subr.mxu0 %v1833_v0  ;;  %2470 = vmatprep.subr.mxu1 %v1835_v48  ;;  %v1785_v6 = vmax.f32 %v1469_v5, 0.0  ;;  %v1787_v60 = vmax.f32 %v1630_v39, 0.0  ;;  %v1455_v52 = vadd.f32 %v4535_v55, %v4532_v50  ;;  %v1616_v23 = vadd.f32 %v4536_v61, %v4532_v50  ;;  %v4546_v48 = vld [vmem:[#allocation37_spill] sm:$0xff]  ;;  %v4548_v5 = vld [vmem:[#allocation39_spill] sm:$0xff]  ;;  %v4549_v39 = vld [vmem:[#allocation40_spill] sm:$0xff] }
 0x1e8   : > { %2400 = vmatpush1.msra.mxu0 %v1832_v44  ;;  %2471 = vmatpush1.msra.mxu1 %v1834_v24  ;;  %v1784_v16 = vmax.f32 %v1467_v20, 0.0  ;;  %v1786_v37 = vmax.f32 %v1628_v36, 0.0  ;;  %v1451_v18 = vadd.f32 %v4538_v11, %v4537_v57  ;;  %v1612_v10 = vadd.f32 %v4539_v62, %v4537_v57  ;;  %v4547_v24 = vld [vmem:[#allocation18_spill] sm:$0xff]  ;;  %v4550_v20 = vld [vmem:[#allocation41_spill] sm:$0xff] }
 0x1e9   : > { %2401 = vmatprep.subr.mxu0 %v1817_v41  ;;  %2472 = vmatprep.subr.mxu1 %v1819_v12  ;;  %v1769_v4 = vmax.f32 %v1463_v15, 0.0  ;;  %v1771_v21 = vmax.f32 %v1624_v38, 0.0  ;;  %v1449_v63 = vadd.f32 %v4540_v47, %v4537_v57  ;;  %v1610_v53 = vadd.f32 %v4541_v33, %v4537_v57  ;;  %v4551_v36 = vld [vmem:[#allocation42_spill] sm:$0xff] }
 0x1ea   : > { %2402 = vmatpush1.msra.mxu0 %v1816_v2  ;;  %2473 = vmatpush1.msra.mxu1 %v1818_v34  ;;  %v1768_v19 = vmax.f32 %v1461_v1, 0.0  ;;  %v1770_v31 = vmax.f32 %v1622_v27, 0.0  ;;  %v1445_v22 = vadd.f32 %v4543_v45, %v4542_v8  ;;  %v1606_v56 = vadd.f32 %v4544_v59, %v4542_v8 }
 0x1eb   : > { %2403 = vmatprep.subr.mxu0 %v1801_v28  ;;  %2474 = vmatprep.subr.mxu1 %v1803_v46  ;;  %v1753_v43 = vmax.f32 %v1457_v54, 0.0  ;;  %v1755_v25 = vmax.f32 %v1618_v35, 0.0  ;;  %v1443_v0 = vadd.f32 %v4545_v58, %v4542_v8  ;;  %v1604_v51 = vadd.f32 %v4546_v48, %v4542_v8  ;;  %v1953_v54 = vpop.permute.xlu0 %1952 }
 0x1ec   : > { %2404 = vmatpush1.msra.mxu0 %v1800_v7  ;;  %2475 = vmatpush1.msra.mxu1 %v1802_v32  ;;  %v1752_v40 = vmax.f32 %v1455_v52, 0.0  ;;  %v1754_v44 = vmax.f32 %v1616_v23, 0.0  ;;  %v1439_v29 = vadd.f32 %v4548_v5, %v4547_v24  ;;  %v1600_v41 = vadd.f32 %v4549_v39, %v4547_v24 }
 0x1ed   : > { %2405 = vmatprep.subr.mxu0 %v1785_v6  ;;  %2476 = vmatprep.subr.mxu1 %v1787_v60  ;;  %v1737_v12 = vmax.f32 %v1451_v18, 0.0  ;;  %v1739_v14 = vmax.f32 %v1612_v10, 0.0  ;;  %v1437_v49 = vadd.f32 %v4550_v20, %v4547_v24  ;;  %v1598_v2 = vadd.f32 %v4551_v36, %v4547_v24 }
 0x1ee   : > { %2406 = vmatpush1.msra.mxu0 %v1784_v16  ;;  %2477 = vmatpush1.msra.mxu1 %v1786_v37  ;;  %v1736_v34 = vmax.f32 %v1449_v63, 0.0  ;;  %v1738_v9 = vmax.f32 %v1610_v53, 0.0  ;;  %v1721_v42 = vmax.f32 %v1445_v22, 0.0  ;;  %v1723_v15 = vmax.f32 %v1606_v56, 0.0 }
 0x1ef   : > { %2407 = vmatprep.subr.mxu0 %v1769_v4  ;;  %2478 = vmatprep.subr.mxu1 %v1771_v21  ;;  %v1720_v30 = vmax.f32 %v1443_v0, 0.0  ;;  %v1722_v38 = vmax.f32 %v1604_v51, 0.0  ;;  %v1705_v28 = vmax.f32 %v1439_v29, 0.0  ;;  %v1707_v46 = vmax.f32 %v1600_v41, 0.0 }
 0x1f0   : > { %2408 = vmatpush1.msra.mxu0 %v1768_v19  ;;  %2479 = vmatpush1.msra.mxu1 %v1770_v31  ;;  %v1704_v3 = vmax.f32 %v1437_v49, 0.0  ;;  %v1706_v1 = vmax.f32 %v1598_v2, 0.0  ;;  %v1955_v27 = vlaneseq  ;;  %v2860_v26 = vmov 1966171168  }
 0x1f1   : > { %2409 = vmatprep.subr.mxu0 %v1753_v43  ;;  %2480 = vmatprep.subr.mxu1 %v1755_v25  ;;  %v2548_v35 = vunpack.c.l.s4 %v2860_v26 }
 0x1f2   : > { %2410 = vmatpush1.msra.mxu0 %v1752_v40  ;;  %2481 = vmatpush1.msra.mxu1 %v1754_v44  ;;  %v1956_v7 = vshrl.u32 %v1955_v27, 7 }
 0x1f3   : > { %2411 = vmatprep.subr.mxu0 %v1737_v12  ;;  %2482 = vmatprep.subr.mxu1 %v1739_v14  ;;  %v2549_v52 = vunpack.c.0.s8 %v2548_v35 }
 0x1f4   : > { %2412 = vmatpush1.msra.mxu0 %v1736_v34  ;;  %2483 = vmatpush1.msra.mxu1 %v1738_v9  ;;  %v1957_v13 = vsub.s32 0, %v1956_v7 }
 0x1f5   : > { %2413 = vmatprep.subr.mxu0 %v1721_v42  ;;  %2484 = vmatprep.subr.mxu1 %v1723_v15  ;;  %v2552_v57 = vsub.s32 %v2549_v52, %v1956_v7 }
 0x1f6   : > { %2414 = vmatpush1.msra.mxu0 %v1720_v30  ;;  %2485 = vmatpush1.msra.mxu1 %v1722_v38  ;;  %v1958_v55 = vrot.slane %v1953_v54, %v1957_v13 }
 0x1f7   : > { %2415 = vmatprep.subr.mxu0 %v1705_v28  ;;  %2486 = vmatprep.subr.mxu1 %v1707_v46 }
 0x1f8   : > { %2416 = vmatpush1.msra.mxu0 %v1704_v3  ;;  %2487 = vmatpush1.msra.mxu1 %v1706_v1 }
 0x1f9   : > { %2450 = vmatmul.mubr.f32.vlgmr.msra.gmra.mxu0 %v4552_v17  ;;  %2521 = vmatmul.mubr.f32.vlgmr.msra.gmra.mxu1 %v4552_v17  ;;  %v2025_v32 = vpop.f32.mrf.mxu0  ;;  %v2096_v50 = vpop.f32.mrf.mxu1 }
 0x1fa   : > { %v2026_v16 = vadd.f32 %v2025_v32, %v1958_v55  ;;  %v2097_v37 = vadd.f32 %v2096_v50, %v1958_v55 }
 0x1fb   : > { %v2027_v6 = vpop.f32.mrf.mxu0  ;;  %v2098_v60 = vpop.f32.mrf.mxu1 }
 0x1fc   : > { %v2028_v61 = vadd.f32 %v2027_v6, %v1958_v55  ;;  %v2099_v23 = vadd.f32 %v2098_v60, %v1958_v55 }
 0x1fe   : > { %v2543_v11 = vcombine.low %v2026_v16, %v2028_v61  ;;  %v2544_v18 = vcombine.low %v2097_v37, %v2099_v23 }
 0x200   : > { %v2553_v4 = vrot.slane %v2543_v11, %v2552_v57  ;;  %v2560_v21 = vrot.slane %v2544_v18, %v2552_v57 }
 0x202   : > { %v2575_v22 = vcombine.low %v2553_v4, %v2560_v21 }
 0x204   : > { %v2583_v25 = vrot.slane %v2575_v22, %v2552_v57 }
 0x239   : > { %v2167_v62 = vpop.f32.mrf.mxu0  ;;  %v2238_v10 = vpop.f32.mrf.mxu1 }
 0x23a   : > { %v2168_v33 = vadd.f32 %v2167_v62, %v1958_v55  ;;  %v2239_v53 = vadd.f32 %v2238_v10, %v1958_v55 }
 0x23b   : > { %v2169_v47 = vpop.f32.mrf.mxu0  ;;  %v2240_v63 = vpop.f32.mrf.mxu1 }
 0x23c   : > { %v2170_v19 = vadd.f32 %v2169_v47, %v1958_v55  ;;  %v2241_v31 = vadd.f32 %v2240_v63, %v1958_v55 }
 0x23e   : > { %v2545_v8 = vcombine.low %v2168_v33, %v2170_v19  ;;  %v2546_v45 = vcombine.low %v2239_v53, %v2241_v31 }
 0x240   : > { %v2567_v59 = vrot.slane %v2545_v8, %v2552_v57  ;;  %v2574_v56 = vrot.slane %v2546_v45, %v2552_v57 }
 0x242   : > { %v2576_v43 = vcombine.low %v2567_v59, %v2574_v56 }
 0x244   : > { %v2590_v58 = vrot.slane %v2576_v43, %v2552_v57 }
 0x246   : > { %v2591_v0 = vcombine.low %v2583_v25, %v2590_v58 }
 0x248   : > { %2643 = vst [vmem:[%s4297_s26] sm:$0xff] %v2591_v0 }
 0x279   : > { %v2309_v48 = vpop.f32.mrf.mxu0  ;;  %v2380_v51 = vpop.f32.mrf.mxu1 }
 0x27a   : > { %v2310_v29 = vadd.f32 %v2309_v48, %v1958_v55  ;;  %v2381_v39 = vadd.f32 %v2380_v51, %v1958_v55 }
 0x27b   : > { %v2311_v40 = vpop.f32.mrf.mxu0  ;;  %v2382_v44 = vpop.f32.mrf.mxu1 }
 0x27c   : > { %v2312_v24 = vadd.f32 %v2311_v40, %v1958_v55  ;;  %v2383_v5 = vadd.f32 %v2382_v44, %v1958_v55 }
 0x27e   : > { %v2592_v41 = vcombine.low %v2310_v29, %v2312_v24  ;;  %v2593_v12 = vcombine.low %v2381_v39, %v2383_v5 }
 0x280   : > { %v2602_v49 = vrot.slane %v2592_v41, %v2552_v57  ;;  %v2609_v36 = vrot.slane %v2593_v12, %v2552_v57 }
 0x282   : > { %v2624_v46 = vcombine.low %v2602_v49, %v2609_v36 }
 0x284   : > { %v2632_v27 = vrot.slane %v2624_v46, %v2552_v57 }
 0x2b9   : > { %v2451_v14 = vpop.f32.mrf.mxu0  ;;  %v2522_v20 = vpop.f32.mrf.mxu1 }
 0x2ba   : > { %v2452_v9 = vadd.f32 %v2451_v14, %v1958_v55  ;;  %v2523_v42 = vadd.f32 %v2522_v20, %v1958_v55 }
 0x2bb   : > { %v2453_v2 = vpop.f32.mrf.mxu0  ;;  %v2524_v34 = vpop.f32.mrf.mxu1 }
 0x2bc   : > { %v2454_v15 = vadd.f32 %v2453_v2, %v1958_v55  ;;  %v2525_v30 = vadd.f32 %v2524_v34, %v1958_v55 }
 0x2be   : > { %v2594_v38 = vcombine.low %v2452_v9, %v2454_v15  ;;  %v2595_v28 = vcombine.low %v2523_v42, %v2525_v30 }
 0x2c0   : > { %v2616_v3 = vrot.slane %v2594_v38, %v2552_v57  ;;  %v2623_v1 = vrot.slane %v2595_v28, %v2552_v57 }
 0x2c2   : > { %v2625_v17 = vcombine.low %v2616_v3, %v2623_v1 }
 0x2c4   : > { %v2639_v7 = vrot.slane %v2625_v17, %v2552_v57 }
 0x2c6   : > { %v2640_v32 = vcombine.low %v2632_v27, %v2639_v7 }
 0x2c8   : > { %2644 = vst [vmem:[%s4297_s26 + $0x8] sm:$0xff] %v2640_v32 }
 0x2c9 PF: > { %s17_s20 = sadd.s32 1, %s2856_s20  }
 0x2ca   : > { %p14_p5 = scmp.ge.s32.totalorder %s17_s20, 4  }
 0x2cc   :  { %16 = sbr.rel (!%p14_p5) target bundleno = 3 (0x3), region = 70 }

</bundles_post_ra>
